<compile_context>
chip_gen: v7x
topology: tpu7x:2x2x1
jax: 0.10.0
libtpu: 0.0.40
codegen_flags: <defaults>
</compile_context>

<pallas_src>
import numpy as np
import jax
import jax.numpy as jnp
from jax.experimental import pallas as pl
from jax.experimental.pallas import tpu as pltpu

# ----------------------- small, module-consistent config ---------------------
B = 2
IN_CHANS = 4
IMG = 9                         # img_size (odd, so the spiral ends on the border)
NUM_PATCHES = 4 * (IMG - 1)     # 32, as in cw_vit.__init__
N_TOK = NUM_PATCHES + 1         # +1 cls token -> 33
NP = 40                         # token rows padded to a multiple of 8 sublanes
DIM = 32                        # args.dim  (set_embed_linear = True)
HEADS = 2                       # args.heads
DIM_HEAD = 16
INNER = HEADS * DIM_HEAD        # 32
MLP = 64                        # args.mlp_dim
DEPTH = 2                       # args.depth
CLASSES = 10                    # args.CLASSES_NUM
CPAD = 128                      # lane-dense logits tile (sliced to CLASSES outside)
RATIO = 0.5                     # args.ratio (scalar -> same decay ratio per ring)
SCALE = DIM_HEAD ** -0.5
EPS = 1e-5                      # nn.LayerNorm default
NEG_INF = -1e9                  # additive key mask for padded rows
# dropout / emb_dropout are identity at inference.


# --------------------- clockwise spiral index precomputation -----------------
def _outer_sampling_indices(window_edge, global_edge, mid1, mid2):
    """Exact replica of the walk in outer_sampling(), returning static indices.

    The update rule is unified:  x[t] = (x[sa] + x[sb]) * ratio / 2 + x[t]
    (the "equal distance" branch has sa == sb, which reproduces x[s]*ratio).
    """
    a1, a2, b1, b2 = window_edge
    e1, e2, e3, e4 = global_edge
    edge = e4 - e3
    tgt, src_a, src_b = [], [], []
    direction = [0, 1]
    l1, l2 = a1, b1 - 1
    start = 0
    while True:
        l1 += direction[0]
        l2 += direction[1]
        if l1 == a1 and l2 == b1:
            if start == 1:
                break
            start = 1
        if l1 > a2:
            direction = [0, -1]; l1 -= 1; continue
        elif l2 < b1:
            direction = [-1, 0]; l2 += 1; continue
        elif l2 > b2:
            direction = [1, 0]; l2 -= 1; continue
        if l1 < e1 or l1 > e2 or l2 < e3 or l2 > e4:
            continue
        m1 = 0 if l1 - mid1 == 0 else int(-(l1 - mid1) / abs(l1 - mid1))
        m2 = 0 if l2 - mid2 == 0 else int(-(l2 - mid2) / abs(l2 - mid2))
        if abs(l1 - mid1) > abs(l2 - mid2):
            sa = (l1 + m1) * edge + l2
            sb = (l1 + m1) * edge + l2 + m2
        elif abs(l1 - mid1) < abs(l2 - mid2):
            sa = l1 * edge + l2 + m2
            sb = (l1 + m1) * edge + l2 + m2
        else:
            sa = (l1 + m1) * edge + l2 + m2
            sb = sa
        tgt.append(l1 * edge + l2)
        src_a.append(sa)
        src_b.append(sb)
    return np.array(tgt), np.array(src_a), np.array(src_b)


def build_clockwise(edge):
    mid1 = mid2 = edge // 2
    rings, border = [], None
    for i in range(1, edge // 2 + 1):
        a1, a2, b1, b2 = mid1 - i, mid1 + i, mid2 - i, mid2 + i
        t, sa, sb = _outer_sampling_indices([a1, a2, b1, b2], [0, edge, 0, edge],
                                            mid1, mid2)
        # Guard: the vectorized ring update is only equivalent to the sequential
        # PyTorch walk if no source index is a target of the same ring.
        assert not ((set(sa.tolist()) | set(sb.tolist())) & set(t.tolist()))
        rings.append((t, sa, sb))
        border = t                         # last ring == image border, walk order
    return rings, border


RINGS, BORDER = build_clockwise(IMG)
assert BORDER.shape[0] == NUM_PATCHES


def clockwise_tokens(x_nchw):
    """clockwise_input(): (B,C,H,W) -> (B, num_patches, C).  Static-index glue."""
    b, c, h, w = x_nchw.shape
    xf = x_nchw.reshape(b, c, h * w)
    for t, sa, sb in RINGS:
        upd = (xf[:, :, sa] + xf[:, :, sb]) * (RATIO / 2.0) + xf[:, :, t]
        xf = xf.at[:, :, t].set(upd)
    return jnp.transpose(xf[:, :, BORDER], (0, 2, 1))


# ---------------------------- sinusoid pos-embedding -------------------------
def get_sinusoid_encoding(n_position, d_hid):
    def angle_vec(pos):
        return [pos / np.power(10000, 2 * (j // 2) / d_hid) for j in range(d_hid)]
    table = np.array([angle_vec(p) for p in range(n_position)], dtype=np.float64)
    table[:, 0::2] = np.sin(table[:, 0::2])
    table[:, 1::2] = np.cos(table[:, 1::2])
    return table.astype(np.float32)          # (n_position, d_hid)


# ------------------------------- shared math ----------------------------------
def _layer_norm(h, g, b):
    mu = jnp.mean(h, axis=-1, keepdims=True)
    var = jnp.mean((h - mu) ** 2, axis=-1, keepdims=True)
    return (h - mu) * jax.lax.rsqrt(var + EPS) * g + b


def _erf(x):
    # Abramowitz & Stegun 7.1.26, |err| <= 1.5e-7; basic VPU/EUP ops only.
    a1, a2, a3, a4, a5 = 0.254829592, -0.284496736, 1.421413741, -1.453152027, 1.061405429
    pc = 0.3275911
    ax = jnp.abs(x)
    t = 1.0 / (1.0 + pc * ax)
    poly = ((((a5 * t + a4) * t + a3) * t + a2) * t + a1) * t
    y = 1.0 - poly * jnp.exp(-ax * ax)
    return jnp.where(x >= 0, y, -y)


def _gelu_exact(x):
    # matches PyTorch nn.GELU() (erf form) to ~1e-7
    return 0.5 * x * (1.0 + _erf(x * np.float32(1.0 / np.sqrt(2.0))))


# ------------------------------- Pallas kernel --------------------------------
def cw_vit_kernel(x_ref, we_ref, add_ref, mask_ref,
                  wq_ref, wk_ref, wv_ref, wo_ref, bo_ref,
                  ln1g_ref, ln1b_ref, ln2g_ref, ln2b_ref,
                  w1_ref, b1_ref, w2_ref, b2_ref,
                  lnhg_ref, lnhb_ref, poolw_ref, wh_ref, bh_ref,
                  out_ref):
    f32 = jnp.float32
    bf16 = jnp.bfloat16

    # embed + folded (cls | bias | pos) additive matrix; padded rows stay ~0 here
    x = jnp.dot(x_ref[0], we_ref[...], preferred_element_type=f32) + add_ref[...]
    mask = mask_ref[...]                                   # (1, NP) additive key mask

    for l in range(DEPTH):                                 # static unroll
        # ---- prenorm multi-head attention (per-head weights, no lane slicing) ----
        h = _layer_norm(x, ln1g_ref[l], ln1b_ref[l]).astype(bf16)
        attn = jnp.zeros((NP, DIM), f32)
        for hd in range(HEADS):
            w_idx = l * HEADS + hd
            q = jnp.dot(h, wq_ref[w_idx], preferred_element_type=f32)   # (NP, Dh)
            k = jnp.dot(h, wk_ref[w_idx], preferred_element_type=f32)
            v = jnp.dot(h, wv_ref[w_idx], preferred_element_type=f32)
            s = jax.lax.dot_general(q.astype(bf16), k.astype(bf16),
                                    (((1,), (1,)), ((), ())),
                                    preferred_element_type=f32) * SCALE + mask
            s = s - jnp.max(s, axis=-1, keepdims=True)
            e = jnp.exp(s)
            p = e * pl.reciprocal(jnp.sum(e, axis=-1, keepdims=True), approx=True)
            ho = jnp.dot(p.astype(bf16), v.astype(bf16), preferred_element_type=f32)
            attn = attn + jnp.dot(ho.astype(bf16), wo_ref[w_idx],
                                  preferred_element_type=f32)
        x = x + attn + bo_ref[l]

        # ---- prenorm feed-forward ----
        h = _layer_norm(x, ln2g_ref[l], ln2b_ref[l]).astype(bf16)
        h1 = jnp.dot(h, w1_ref[l], preferred_element_type=f32) + b1_ref[l]
        h1 = _gelu_exact(h1)
        x = x + jnp.dot(h1.astype(bf16), w2_ref[l], preferred_element_type=f32) + b2_ref[l]

    # masked mean pool over the N_TOK real tokens (padded rows weighted 0)
    pooled = jnp.sum(x * poolw_ref[...], axis=0, keepdims=True)        # (1, DIM)
    ph = _layer_norm(pooled, lnhg_ref[...], lnhb_ref[...])
    out_ref[0] = jnp.dot(ph.astype(bf16), wh_ref[...],
                         preferred_element_type=f32) + bh_ref[...]     # (1, CPAD)


# ----------------------------- host-side wrapper -------------------------------
def run_pallas(tokens, params):
    bsz = tokens.shape[0]
    f32, bf16 = jnp.float32, jnp.bfloat16

    # pad tokens to (B, NP, Cin): row 0 is the cls slot (zeros), rows 1..N_TOK-1
    # are the spiral tokens, rows N_TOK.. are zero padding.
    tok_pad = jnp.zeros((bsz, NP, IN_CHANS), f32)
    tok_pad = tok_pad.at[:, 1:N_TOK, :].set(tokens).astype(bf16)

    # fold cls token, embed bias and positional encoding into one additive matrix
    addmat = jnp.concatenate(
        [params['cls'] + params['pos'][0:1],                 # row 0: cls + pos[0]
         params['pos'][1:N_TOK] + params['be'],              # rows 1..32: be + pos
         jnp.zeros((NP - N_TOK, DIM), f32)], axis=0)         # padded rows

    col = jnp.arange(NP)
    maskbias = jnp.where(col < N_TOK, 0.0, NEG_INF).astype(f32).reshape(1, NP)
    poolw = jnp.where(col < N_TOK, 1.0 / N_TOK, 0.0).astype(f32).reshape(NP, 1)

    wh_pad = jnp.zeros((DIM, CPAD), f32).at[:, :CLASSES].set(params['wh'])
    bh_pad = jnp.zeros((1, CPAD), f32).at[:, :CLASSES].set(params['bh'])

    weights = [
        params['we'].astype(bf16),
        addmat,
        maskbias,
        params['wq'].reshape(DEPTH * HEADS, DIM, DIM_HEAD).astype(bf16),
        params['wk'].reshape(DEPTH * HEADS, DIM, DIM_HEAD).astype(bf16),
        params['wv'].reshape(DEPTH * HEADS, DIM, DIM_HEAD).astype(bf16),
        params['wo'].reshape(DEPTH * HEADS, DIM_HEAD, DIM).astype(bf16),
        params['bo'],
        params['ln1g'], params['ln1b'], params['ln2g'], params['ln2b'],
        params['w1'].astype(bf16), params['b1'],
        params['w2'].astype(bf16), params['b2'],
        params['lnhg'], params['lnhb'],
        poolw,
        wh_pad.astype(bf16),
        bh_pad,
    ]

    def full_spec(a):
        nd = a.ndim
        return pl.BlockSpec(a.shape, lambda b, _nd=nd: (0,) * _nd)

    in_specs = ([pl.BlockSpec((1, NP, IN_CHANS), lambda b: (b, 0, 0))]
                + [full_spec(w) for w in weights])
    out_specs = pl.BlockSpec((1, 1, CPAD), lambda b: (b, 0, 0))

    out = pl.pallas_call(
        cw_vit_kernel,
        grid=(bsz,),
        in_specs=in_specs,
        out_specs=out_specs,
        out_shape=jax.ShapeDtypeStruct((bsz, 1, CPAD), jnp.float32),
        compiler_params=pltpu.CompilerParams(
            # independent batch elements -> shard the grid across TensorCores (v7x)
            dimension_semantics=("parallel",)),
    )(tok_pad, *weights)
    return out[:, 0, :CLASSES]


# -------------------------- pure-JAX reference (check) ------------------------
def _bdot(a, b):
    return jnp.dot(a.astype(jnp.bfloat16), b.astype(jnp.bfloat16),
                   preferred_element_type=jnp.float32)


def reference_forward(tokens, p):
    bsz = tokens.shape[0]
    emb = _bdot(tokens, p['we']) + p['be']
    cls = jnp.broadcast_to(p['cls'][None], (bsz, 1, DIM))
    x = jnp.concatenate([cls, emb], axis=1) + p['pos'][None]
    for l in range(DEPTH):
        h = _layer_norm(x, p['ln1g'][l], p['ln1b'][l])
        attn = jnp.zeros_like(x)
        for hd in range(HEADS):
            q = _bdot(h, p['wq'][l, hd])
            k = _bdot(h, p['wk'][l, hd])
            v = _bdot(h, p['wv'][l, hd])
            s = jnp.einsum('bnd,bmd->bnm', q.astype(jnp.bfloat16),
                           k.astype(jnp.bfloat16),
                           preferred_element_type=jnp.float32) * SCALE
            a = jax.nn.softmax(s, axis=-1)
            ho = jnp.einsum('bnm,bmd->bnd', a.astype(jnp.bfloat16),
                            v.astype(jnp.bfloat16),
                            preferred_element_type=jnp.float32)
            attn = attn + _bdot(ho, p['wo'][l, hd])
        x = x + attn + p['bo'][l]
        h = _layer_norm(x, p['ln2g'][l], p['ln2b'][l])
        h1 = jax.nn.gelu(_bdot(h, p['w1'][l]) + p['b1'][l], approximate=False)
        x = x + _bdot(h1, p['w2'][l]) + p['b2'][l]
    pooled = x.mean(axis=1)
    ph = _layer_norm(pooled, p['lnhg'], p['lnhb'])
    return _bdot(ph, p['wh']) + p['bh']


# ----------------------------------- main -------------------------------------
def init_params(key):
    ks = jax.random.split(key, 16)

    def nrm(k, shape, std=0.02):
        return (jax.random.normal(k, shape) * std).astype(jnp.float32)

    return dict(
        we=nrm(ks[0], (IN_CHANS, DIM)),                       # embed_linear
        be=nrm(ks[1], (1, DIM), std=0.01),
        cls=jax.random.normal(ks[2], (1, DIM)).astype(jnp.float32),   # cls_token ~ randn
        pos=jnp.asarray(get_sinusoid_encoding(N_TOK, DIM)),   # pos_embed='sin'
        ln1g=jnp.ones((DEPTH, 1, DIM), jnp.float32),
        ln1b=jnp.zeros((DEPTH, 1, DIM), jnp.float32),
        wq=nrm(ks[3], (DEPTH, HEADS, DIM, DIM_HEAD)),         # to_qkv (no bias), pre-split
        wk=nrm(ks[4], (DEPTH, HEADS, DIM, DIM_HEAD)),
        wv=nrm(ks[5], (DEPTH, HEADS, DIM, DIM_HEAD)),
        wo=nrm(ks[6], (DEPTH, HEADS, DIM_HEAD, DIM)),         # to_out, per head
        bo=nrm(ks[7], (DEPTH, 1, DIM), std=0.01),
        ln2g=jnp.ones((DEPTH, 1, DIM), jnp.float32),
        ln2b=jnp.zeros((DEPTH, 1, DIM), jnp.float32),
        w1=nrm(ks[8], (DEPTH, DIM, MLP)),                     # feed-forward
        b1=nrm(ks[9], (DEPTH, 1, MLP), std=0.01),
        w2=nrm(ks[10], (DEPTH, MLP, DIM)),
        b2=nrm(ks[11], (DEPTH, 1, DIM), std=0.01),
        lnhg=jnp.ones((1, DIM), jnp.float32),                 # mlp_head LayerNorm
        lnhb=jnp.zeros((1, DIM), jnp.float32),
        wh=nrm(ks[12], (DIM, CLASSES)),                       # mlp_head Linear
        bh=nrm(ks[13], (1, CLASSES), std=0.01),
    )


if __name__ == "__main__":
    key = jax.random.PRNGKey(0)
    kx, kp = jax.random.split(key)
    x = jax.random.normal(kx, (B, IN_CHANS, IMG, IMG), dtype=jnp.float32)
    params = init_params(kp)

    tokens = clockwise_tokens(x)             # (B, num_patches, in_chans) glue
    out = run_pallas(tokens, params)         # (B, num_classes) via Pallas kernel
    out = jax.block_until_ready(out)

    ref = reference_forward(tokens, params)
    np.testing.assert_allclose(np.asarray(out), np.asarray(ref),
                               rtol=5e-3, atol=5e-3)
    print("KERNEL_OK")
</pallas_src>

<mosaic_0001>
module attributes {stable_mosaic.version = 11 : i64} {
  func.func @cw_vit_kernel(%arg0: i32, %arg1: memref<1x40x4xbf16, #tpu.memory_space<vmem>>, %arg2: memref<4x32xbf16, #tpu.memory_space<vmem>>, %arg3: memref<40x32xf32, #tpu.memory_space<vmem>>, %arg4: memref<1x40xf32, #tpu.memory_space<vmem>>, %arg5: memref<4x32x16xbf16, #tpu.memory_space<vmem>>, %arg6: memref<4x32x16xbf16, #tpu.memory_space<vmem>>, %arg7: memref<4x32x16xbf16, #tpu.memory_space<vmem>>, %arg8: memref<4x16x32xbf16, #tpu.memory_space<vmem>>, %arg9: memref<2x1x32xf32, #tpu.memory_space<vmem>>, %arg10: memref<2x1x32xf32, #tpu.memory_space<vmem>>, %arg11: memref<2x1x32xf32, #tpu.memory_space<vmem>>, %arg12: memref<2x1x32xf32, #tpu.memory_space<vmem>>, %arg13: memref<2x1x32xf32, #tpu.memory_space<vmem>>, %arg14: memref<2x32x64xbf16, #tpu.memory_space<vmem>>, %arg15: memref<2x1x64xf32, #tpu.memory_space<vmem>>, %arg16: memref<2x64x32xbf16, #tpu.memory_space<vmem>>, %arg17: memref<2x1x32xf32, #tpu.memory_space<vmem>>, %arg18: memref<1x32xf32, #tpu.memory_space<vmem>>, %arg19: memref<1x32xf32, #tpu.memory_space<vmem>>, %arg20: memref<40x1xf32, #tpu.memory_space<vmem>>, %arg21: memref<32x128xbf16, #tpu.memory_space<vmem>>, %arg22: memref<1x128xf32, #tpu.memory_space<vmem>>, %arg23: memref<1x1x128xf32, #tpu.memory_space<vmem>>) attributes {dimension_semantics = [#tpu.dimension_semantics<parallel>], iteration_bounds = array<i64: 2>, scalar_prefetch = 0 : i64, scratch_operands = 0 : i64, tpu.core_type = #tpu.core_type<tc>, window_params = [{transform_indices = @transform_0, window_bounds = array<i64: 1, 40, 4>}, {pipeline_mode = #tpu.pipeline_mode<synchronous>, transform_indices = @transform_1, window_bounds = array<i64: 4, 32>}, {pipeline_mode = #tpu.pipeline_mode<synchronous>, transform_indices = @transform_2, window_bounds = array<i64: 40, 32>}, {pipeline_mode = #tpu.pipeline_mode<synchronous>, transform_indices = @transform_3, window_bounds = array<i64: 1, 40>}, {pipeline_mode = #tpu.pipeline_mode<synchronous>, transform_indices = @transform_4, window_bounds = array<i64: 4, 32, 16>}, {pipeline_mode = #tpu.pipeline_mode<synchronous>, transform_indices = @transform_5, window_bounds = array<i64: 4, 32, 16>}, {pipeline_mode = #tpu.pipeline_mode<synchronous>, transform_indices = @transform_6, window_bounds = array<i64: 4, 32, 16>}, {pipeline_mode = #tpu.pipeline_mode<synchronous>, transform_indices = @transform_7, window_bounds = array<i64: 4, 16, 32>}, {pipeline_mode = #tpu.pipeline_mode<synchronous>, transform_indices = @transform_8, window_bounds = array<i64: 2, 1, 32>}, {pipeline_mode = #tpu.pipeline_mode<synchronous>, transform_indices = @transform_9, window_bounds = array<i64: 2, 1, 32>}, {pipeline_mode = #tpu.pipeline_mode<synchronous>, transform_indices = @transform_10, window_bounds = array<i64: 2, 1, 32>}, {pipeline_mode = #tpu.pipeline_mode<synchronous>, transform_indices = @transform_11, window_bounds = array<i64: 2, 1, 32>}, {pipeline_mode = #tpu.pipeline_mode<synchronous>, transform_indices = @transform_12, window_bounds = array<i64: 2, 1, 32>}, {pipeline_mode = #tpu.pipeline_mode<synchronous>, transform_indices = @transform_13, window_bounds = array<i64: 2, 32, 64>}, {pipeline_mode = #tpu.pipeline_mode<synchronous>, transform_indices = @transform_14, window_bounds = array<i64: 2, 1, 64>}, {pipeline_mode = #tpu.pipeline_mode<synchronous>, transform_indices = @transform_15, window_bounds = array<i64: 2, 64, 32>}, {pipeline_mode = #tpu.pipeline_mode<synchronous>, transform_indices = @transform_16, window_bounds = array<i64: 2, 1, 32>}, {pipeline_mode = #tpu.pipeline_mode<synchronous>, transform_indices = @transform_17, window_bounds = array<i64: 1, 32>}, {pipeline_mode = #tpu.pipeline_mode<synchronous>, transform_indices = @transform_18, window_bounds = array<i64: 1, 32>}, {pipeline_mode = #tpu.pipeline_mode<synchronous>, transform_indices = @transform_19, window_bounds = array<i64: 40, 1>}, {pipeline_mode = #tpu.pipeline_mode<synchronous>, transform_indices = @transform_20, window_bounds = array<i64: 32, 128>}, {pipeline_mode = #tpu.pipeline_mode<synchronous>, transform_indices = @transform_21, window_bounds = array<i64: 1, 128>}, {transform_indices = @transform_22, window_bounds = array<i64: 1, 1, 128>}]} {
    %c0 = arith.constant 0 : index
    %c0_0 = arith.constant 0 : index
    %c0_1 = arith.constant 0 : index
    %0 = vector.load %arg1[%c0, %c0_0, %c0_1] : memref<1x40x4xbf16, #tpu.memory_space<vmem>>, vector<1x40x4xbf16>
    %1 = vector.shape_cast %0 : vector<1x40x4xbf16> to vector<40x4xbf16>
    %c0_2 = arith.constant 0 : index
    %c0_3 = arith.constant 0 : index
    %2 = vector.load %arg2[%c0_2, %c0_3] : memref<4x32xbf16, #tpu.memory_space<vmem>>, vector<4x32xbf16>
    %cst = arith.constant dense<0.000000e+00> : vector<40x32xf32>
    %3 = tpu.matmul %1, %2, %cst {dimension_numbers = #tpu.dot_dimension_numbers<[1], [0], [0], [1], [0, 0, 1, 1], [], []>} : vector<40x4xbf16>, vector<4x32xbf16>, vector<40x32xf32> -> vector<40x32xf32>
    %c0_4 = arith.constant 0 : index
    %c0_5 = arith.constant 0 : index
    %4 = vector.load %arg3[%c0_4, %c0_5] : memref<40x32xf32, #tpu.memory_space<vmem>>, vector<40x32xf32>
    %5 = arith.addf %3, %4 : vector<40x32xf32>
    %c0_6 = arith.constant 0 : index
    %c0_7 = arith.constant 0 : index
    %6 = vector.load %arg4[%c0_6, %c0_7] : memref<1x40xf32, #tpu.memory_space<vmem>>, vector<1x40xf32>
    %c0_8 = arith.constant 0 : index
    %c0_9 = arith.constant 0 : index
    %c0_10 = arith.constant 0 : index
    %7 = vector.load %arg10[%c0_8, %c0_9, %c0_10] : memref<2x1x32xf32, #tpu.memory_space<vmem>>, vector<1x1x32xf32>
    %8 = vector.shape_cast %7 : vector<1x1x32xf32> to vector<1x32xf32>
    %c0_11 = arith.constant 0 : index
    %c0_12 = arith.constant 0 : index
    %c0_13 = arith.constant 0 : index
    %9 = vector.load %arg11[%c0_11, %c0_12, %c0_13] : memref<2x1x32xf32, #tpu.memory_space<vmem>>, vector<1x1x32xf32>
    %10 = vector.shape_cast %9 : vector<1x1x32xf32> to vector<1x32xf32>
    %cst_14 = arith.constant dense<0.000000e+00> : vector<40xf32>
    %11 = vector.multi_reduction <add>, %5, %cst_14 [1] : vector<40x32xf32> to vector<40xf32>
    %12 = vector.shape_cast %11 : vector<40xf32> to vector<40x1xf32>
    %cst_15 = arith.constant 3.200000e+01 : f32
    %13 = vector.broadcast %cst_15 : f32 to vector<40x1xf32>
    %14 = arith.divf %12, %13 : vector<40x1xf32>
    %15 = vector.broadcast %14 : vector<40x1xf32> to vector<40x32xf32>
    %16 = arith.subf %5, %15 : vector<40x32xf32>
    %17 = arith.mulf %16, %16 : vector<40x32xf32>
    %cst_16 = arith.constant dense<0.000000e+00> : vector<40xf32>
    %18 = vector.multi_reduction <add>, %17, %cst_16 [1] : vector<40x32xf32> to vector<40xf32>
    %19 = vector.shape_cast %18 : vector<40xf32> to vector<40x1xf32>
    %cst_17 = arith.constant 3.200000e+01 : f32
    %20 = vector.broadcast %cst_17 : f32 to vector<40x1xf32>
    %21 = arith.divf %19, %20 : vector<40x1xf32>
    %22 = vector.broadcast %14 : vector<40x1xf32> to vector<40x32xf32>
    %23 = arith.subf %5, %22 : vector<40x32xf32>
    %cst_18 = arith.constant 9.99999974E-6 : f32
    %24 = vector.broadcast %cst_18 : f32 to vector<40x1xf32>
    %25 = arith.addf %21, %24 : vector<40x1xf32>
    %26 = math.rsqrt %25 : vector<40x1xf32>
    %27 = vector.broadcast %26 : vector<40x1xf32> to vector<40x32xf32>
    %28 = arith.mulf %23, %27 : vector<40x32xf32>
    %29 = vector.broadcast %8 : vector<1x32xf32> to vector<40x32xf32>
    %30 = arith.mulf %28, %29 : vector<40x32xf32>
    %31 = vector.broadcast %10 : vector<1x32xf32> to vector<40x32xf32>
    %32 = arith.addf %30, %31 : vector<40x32xf32>
    %33 = arith.truncf %32 : vector<40x32xf32> to vector<40x32xbf16>
    %cst_19 = arith.constant 0.000000e+00 : f32
    %34 = vector.broadcast %cst_19 : f32 to vector<40x32xf32>
    %c0_20 = arith.constant 0 : index
    %c0_21 = arith.constant 0 : index
    %c0_22 = arith.constant 0 : index
    %35 = vector.load %arg5[%c0_20, %c0_21, %c0_22] : memref<4x32x16xbf16, #tpu.memory_space<vmem>>, vector<1x32x16xbf16>
    %36 = vector.shape_cast %35 : vector<1x32x16xbf16> to vector<32x16xbf16>
    %cst_23 = arith.constant dense<0.000000e+00> : vector<40x16xf32>
    %37 = tpu.matmul %33, %36, %cst_23 {dimension_numbers = #tpu.dot_dimension_numbers<[1], [0], [0], [1], [0, 0, 1, 1], [], []>} : vector<40x32xbf16>, vector<32x16xbf16>, vector<40x16xf32> -> vector<40x16xf32>
    %c0_24 = arith.constant 0 : index
    %c0_25 = arith.constant 0 : index
    %c0_26 = arith.constant 0 : index
    %38 = vector.load %arg6[%c0_24, %c0_25, %c0_26] : memref<4x32x16xbf16, #tpu.memory_space<vmem>>, vector<1x32x16xbf16>
    %39 = vector.shape_cast %38 : vector<1x32x16xbf16> to vector<32x16xbf16>
    %cst_27 = arith.constant dense<0.000000e+00> : vector<40x16xf32>
    %40 = tpu.matmul %33, %39, %cst_27 {dimension_numbers = #tpu.dot_dimension_numbers<[1], [0], [0], [1], [0, 0, 1, 1], [], []>} : vector<40x32xbf16>, vector<32x16xbf16>, vector<40x16xf32> -> vector<40x16xf32>
    %c0_28 = arith.constant 0 : index
    %c0_29 = arith.constant 0 : index
    %c0_30 = arith.constant 0 : index
    %41 = vector.load %arg7[%c0_28, %c0_29, %c0_30] : memref<4x32x16xbf16, #tpu.memory_space<vmem>>, vector<1x32x16xbf16>
    %42 = vector.shape_cast %41 : vector<1x32x16xbf16> to vector<32x16xbf16>
    %cst_31 = arith.constant dense<0.000000e+00> : vector<40x16xf32>
    %43 = tpu.matmul %33, %42, %cst_31 {dimension_numbers = #tpu.dot_dimension_numbers<[1], [0], [0], [1], [0, 0, 1, 1], [], []>} : vector<40x32xbf16>, vector<32x16xbf16>, vector<40x16xf32> -> vector<40x16xf32>
    %44 = arith.truncf %37 : vector<40x16xf32> to vector<40x16xbf16>
    %45 = arith.truncf %40 : vector<40x16xf32> to vector<40x16xbf16>
    %cst_32 = arith.constant dense<0.000000e+00> : vector<40x40xf32>
    %46 = tpu.matmul %44, %45, %cst_32 {dimension_numbers = #tpu.dot_dimension_numbers<[1], [1], [0], [0], [0, 0, 1, 0], [], []>} : vector<40x16xbf16>, vector<40x16xbf16>, vector<40x40xf32> -> vector<40x40xf32>
    %cst_33 = arith.constant 2.500000e-01 : f32
    %47 = vector.broadcast %cst_33 : f32 to vector<40x40xf32>
    %48 = arith.mulf %46, %47 : vector<40x40xf32>
    %49 = vector.broadcast %6 : vector<1x40xf32> to vector<40x40xf32>
    %50 = arith.addf %48, %49 : vector<40x40xf32>
    %cst_34 = arith.constant dense<0xFF800000> : vector<40xf32>
    %51 = vector.multi_reduction <maximumf>, %50, %cst_34 [1] : vector<40x40xf32> to vector<40xf32>
    %52 = vector.shape_cast %51 : vector<40xf32> to vector<40x1xf32>
    %53 = vector.broadcast %52 : vector<40x1xf32> to vector<40x40xf32>
    %54 = arith.subf %50, %53 : vector<40x40xf32>
    %55 = math.exp %54 : vector<40x40xf32>
    %cst_35 = arith.constant dense<0.000000e+00> : vector<40xf32>
    %56 = vector.multi_reduction <add>, %55, %cst_35 [1] : vector<40x40xf32> to vector<40xf32>
    %57 = vector.shape_cast %56 : vector<40xf32> to vector<40x1xf32>
    %58 = tpu.reciprocal %57 {approx = true} : vector<40x1xf32> -> vector<40x1xf32>
    %59 = vector.broadcast %58 : vector<40x1xf32> to vector<40x40xf32>
    %60 = arith.mulf %55, %59 : vector<40x40xf32>
    %61 = arith.truncf %60 : vector<40x40xf32> to vector<40x40xbf16>
    %62 = arith.truncf %43 : vector<40x16xf32> to vector<40x16xbf16>
    %cst_36 = arith.constant dense<0.000000e+00> : vector<40x16xf32>
    %63 = tpu.matmul %61, %62, %cst_36 {dimension_numbers = #tpu.dot_dimension_numbers<[1], [0], [0], [1], [0, 0, 1, 1], [], []>} : vector<40x40xbf16>, vector<40x16xbf16>, vector<40x16xf32> -> vector<40x16xf32>
    %64 = arith.truncf %63 : vector<40x16xf32> to vector<40x16xbf16>
    %c0_37 = arith.constant 0 : index
    %c0_38 = arith.constant 0 : index
    %c0_39 = arith.constant 0 : index
    %65 = vector.load %arg8[%c0_37, %c0_38, %c0_39] : memref<4x16x32xbf16, #tpu.memory_space<vmem>>, vector<1x16x32xbf16>
    %66 = vector.shape_cast %65 : vector<1x16x32xbf16> to vector<16x32xbf16>
    %cst_40 = arith.constant dense<0.000000e+00> : vector<40x32xf32>
    %67 = tpu.matmul %64, %66, %cst_40 {dimension_numbers = #tpu.dot_dimension_numbers<[1], [0], [0], [1], [0, 0, 1, 1], [], []>} : vector<40x16xbf16>, vector<16x32xbf16>, vector<40x32xf32> -> vector<40x32xf32>
    %68 = arith.addf %34, %67 : vector<40x32xf32>
    %c1 = arith.constant 1 : index
    %c0_41 = arith.constant 0 : index
    %c0_42 = arith.constant 0 : index
    %69 = vector.load %arg5[%c1, %c0_41, %c0_42] : memref<4x32x16xbf16, #tpu.memory_space<vmem>>, vector<1x32x16xbf16>
    %70 = vector.shape_cast %69 : vector<1x32x16xbf16> to vector<32x16xbf16>
    %cst_43 = arith.constant dense<0.000000e+00> : vector<40x16xf32>
    %71 = tpu.matmul %33, %70, %cst_43 {dimension_numbers = #tpu.dot_dimension_numbers<[1], [0], [0], [1], [0, 0, 1, 1], [], []>} : vector<40x32xbf16>, vector<32x16xbf16>, vector<40x16xf32> -> vector<40x16xf32>
    %c1_44 = arith.constant 1 : index
    %c0_45 = arith.constant 0 : index
    %c0_46 = arith.constant 0 : index
    %72 = vector.load %arg6[%c1_44, %c0_45, %c0_46] : memref<4x32x16xbf16, #tpu.memory_space<vmem>>, vector<1x32x16xbf16>
    %73 = vector.shape_cast %72 : vector<1x32x16xbf16> to vector<32x16xbf16>
    %cst_47 = arith.constant dense<0.000000e+00> : vector<40x16xf32>
    %74 = tpu.matmul %33, %73, %cst_47 {dimension_numbers = #tpu.dot_dimension_numbers<[1], [0], [0], [1], [0, 0, 1, 1], [], []>} : vector<40x32xbf16>, vector<32x16xbf16>, vector<40x16xf32> -> vector<40x16xf32>
    %c1_48 = arith.constant 1 : index
    %c0_49 = arith.constant 0 : index
    %c0_50 = arith.constant 0 : index
    %75 = vector.load %arg7[%c1_48, %c0_49, %c0_50] : memref<4x32x16xbf16, #tpu.memory_space<vmem>>, vector<1x32x16xbf16>
    %76 = vector.shape_cast %75 : vector<1x32x16xbf16> to vector<32x16xbf16>
    %cst_51 = arith.constant dense<0.000000e+00> : vector<40x16xf32>
    %77 = tpu.matmul %33, %76, %cst_51 {dimension_numbers = #tpu.dot_dimension_numbers<[1], [0], [0], [1], [0, 0, 1, 1], [], []>} : vector<40x32xbf16>, vector<32x16xbf16>, vector<40x16xf32> -> vector<40x16xf32>
    %78 = arith.truncf %71 : vector<40x16xf32> to vector<40x16xbf16>
    %79 = arith.truncf %74 : vector<40x16xf32> to vector<40x16xbf16>
    %cst_52 = arith.constant dense<0.000000e+00> : vector<40x40xf32>
    %80 = tpu.matmul %78, %79, %cst_52 {dimension_numbers = #tpu.dot_dimension_numbers<[1], [1], [0], [0], [0, 0, 1, 0], [], []>} : vector<40x16xbf16>, vector<40x16xbf16>, vector<40x40xf32> -> vector<40x40xf32>
    %cst_53 = arith.constant 2.500000e-01 : f32
    %81 = vector.broadcast %cst_53 : f32 to vector<40x40xf32>
    %82 = arith.mulf %80, %81 : vector<40x40xf32>
    %83 = vector.broadcast %6 : vector<1x40xf32> to vector<40x40xf32>
    %84 = arith.addf %82, %83 : vector<40x40xf32>
    %cst_54 = arith.constant dense<0xFF800000> : vector<40xf32>
    %85 = vector.multi_reduction <maximumf>, %84, %cst_54 [1] : vector<40x40xf32> to vector<40xf32>
    %86 = vector.shape_cast %85 : vector<40xf32> to vector<40x1xf32>
    %87 = vector.broadcast %86 : vector<40x1xf32> to vector<40x40xf32>
    %88 = arith.subf %84, %87 : vector<40x40xf32>
    %89 = math.exp %88 : vector<40x40xf32>
    %cst_55 = arith.constant dense<0.000000e+00> : vector<40xf32>
    %90 = vector.multi_reduction <add>, %89, %cst_55 [1] : vector<40x40xf32> to vector<40xf32>
    %91 = vector.shape_cast %90 : vector<40xf32> to vector<40x1xf32>
    %92 = tpu.reciprocal %91 {approx = true} : vector<40x1xf32> -> vector<40x1xf32>
    %93 = vector.broadcast %92 : vector<40x1xf32> to vector<40x40xf32>
    %94 = arith.mulf %89, %93 : vector<40x40xf32>
    %95 = arith.truncf %94 : vector<40x40xf32> to vector<40x40xbf16>
    %96 = arith.truncf %77 : vector<40x16xf32> to vector<40x16xbf16>
    %cst_56 = arith.constant dense<0.000000e+00> : vector<40x16xf32>
    %97 = tpu.matmul %95, %96, %cst_56 {dimension_numbers = #tpu.dot_dimension_numbers<[1], [0], [0], [1], [0, 0, 1, 1], [], []>} : vector<40x40xbf16>, vector<40x16xbf16>, vector<40x16xf32> -> vector<40x16xf32>
    %98 = arith.truncf %97 : vector<40x16xf32> to vector<40x16xbf16>
    %c1_57 = arith.constant 1 : index
    %c0_58 = arith.constant 0 : index
    %c0_59 = arith.constant 0 : index
    %99 = vector.load %arg8[%c1_57, %c0_58, %c0_59] : memref<4x16x32xbf16, #tpu.memory_space<vmem>>, vector<1x16x32xbf16>
    %100 = vector.shape_cast %99 : vector<1x16x32xbf16> to vector<16x32xbf16>
    %cst_60 = arith.constant dense<0.000000e+00> : vector<40x32xf32>
    %101 = tpu.matmul %98, %100, %cst_60 {dimension_numbers = #tpu.dot_dimension_numbers<[1], [0], [0], [1], [0, 0, 1, 1], [], []>} : vector<40x16xbf16>, vector<16x32xbf16>, vector<40x32xf32> -> vector<40x32xf32>
    %102 = arith.addf %68, %101 : vector<40x32xf32>
    %103 = arith.addf %5, %102 : vector<40x32xf32>
    %c0_61 = arith.constant 0 : index
    %c0_62 = arith.constant 0 : index
    %c0_63 = arith.constant 0 : index
    %104 = vector.load %arg9[%c0_61, %c0_62, %c0_63] : memref<2x1x32xf32, #tpu.memory_space<vmem>>, vector<1x1x32xf32>
    %105 = vector.shape_cast %104 : vector<1x1x32xf32> to vector<1x32xf32>
    %106 = vector.broadcast %105 : vector<1x32xf32> to vector<40x32xf32>
    %107 = arith.addf %103, %106 : vector<40x32xf32>
    %c0_64 = arith.constant 0 : index
    %c0_65 = arith.constant 0 : index
    %c0_66 = arith.constant 0 : index
    %108 = vector.load %arg12[%c0_64, %c0_65, %c0_66] : memref<2x1x32xf32, #tpu.memory_space<vmem>>, vector<1x1x32xf32>
    %109 = vector.shape_cast %108 : vector<1x1x32xf32> to vector<1x32xf32>
    %c0_67 = arith.constant 0 : index
    %c0_68 = arith.constant 0 : index
    %c0_69 = arith.constant 0 : index
    %110 = vector.load %arg13[%c0_67, %c0_68, %c0_69] : memref<2x1x32xf32, #tpu.memory_space<vmem>>, vector<1x1x32xf32>
    %111 = vector.shape_cast %110 : vector<1x1x32xf32> to vector<1x32xf32>
    %cst_70 = arith.constant dense<0.000000e+00> : vector<40xf32>
    %112 = vector.multi_reduction <add>, %107, %cst_70 [1] : vector<40x32xf32> to vector<40xf32>
    %113 = vector.shape_cast %112 : vector<40xf32> to vector<40x1xf32>
    %cst_71 = arith.constant 3.200000e+01 : f32
    %114 = vector.broadcast %cst_71 : f32 to vector<40x1xf32>
    %115 = arith.divf %113, %114 : vector<40x1xf32>
    %116 = vector.broadcast %115 : vector<40x1xf32> to vector<40x32xf32>
    %117 = arith.subf %107, %116 : vector<40x32xf32>
    %118 = arith.mulf %117, %117 : vector<40x32xf32>
    %cst_72 = arith.constant dense<0.000000e+00> : vector<40xf32>
    %119 = vector.multi_reduction <add>, %118, %cst_72 [1] : vector<40x32xf32> to vector<40xf32>
    %120 = vector.shape_cast %119 : vector<40xf32> to vector<40x1xf32>
    %cst_73 = arith.constant 3.200000e+01 : f32
    %121 = vector.broadcast %cst_73 : f32 to vector<40x1xf32>
    %122 = arith.divf %120, %121 : vector<40x1xf32>
    %123 = vector.broadcast %115 : vector<40x1xf32> to vector<40x32xf32>
    %124 = arith.subf %107, %123 : vector<40x32xf32>
    %cst_74 = arith.constant 9.99999974E-6 : f32
    %125 = vector.broadcast %cst_74 : f32 to vector<40x1xf32>
    %126 = arith.addf %122, %125 : vector<40x1xf32>
    %127 = math.rsqrt %126 : vector<40x1xf32>
    %128 = vector.broadcast %127 : vector<40x1xf32> to vector<40x32xf32>
    %129 = arith.mulf %124, %128 : vector<40x32xf32>
    %130 = vector.broadcast %109 : vector<1x32xf32> to vector<40x32xf32>
    %131 = arith.mulf %129, %130 : vector<40x32xf32>
    %132 = vector.broadcast %111 : vector<1x32xf32> to vector<40x32xf32>
    %133 = arith.addf %131, %132 : vector<40x32xf32>
    %134 = arith.truncf %133 : vector<40x32xf32> to vector<40x32xbf16>
    %c0_75 = arith.constant 0 : index
    %c0_76 = arith.constant 0 : index
    %c0_77 = arith.constant 0 : index
    %135 = vector.load %arg14[%c0_75, %c0_76, %c0_77] : memref<2x32x64xbf16, #tpu.memory_space<vmem>>, vector<1x32x64xbf16>
    %136 = vector.shape_cast %135 : vector<1x32x64xbf16> to vector<32x64xbf16>
    %cst_78 = arith.constant dense<0.000000e+00> : vector<40x64xf32>
    %137 = tpu.matmul %134, %136, %cst_78 {dimension_numbers = #tpu.dot_dimension_numbers<[1], [0], [0], [1], [0, 0, 1, 1], [], []>} : vector<40x32xbf16>, vector<32x64xbf16>, vector<40x64xf32> -> vector<40x64xf32>
    %c0_79 = arith.constant 0 : index
    %c0_80 = arith.constant 0 : index
    %c0_81 = arith.constant 0 : index
    %138 = vector.load %arg15[%c0_79, %c0_80, %c0_81] : memref<2x1x64xf32, #tpu.memory_space<vmem>>, vector<1x1x64xf32>
    %139 = vector.shape_cast %138 : vector<1x1x64xf32> to vector<1x64xf32>
    %140 = vector.broadcast %139 : vector<1x64xf32> to vector<40x64xf32>
    %141 = arith.addf %137, %140 : vector<40x64xf32>
    %cst_82 = arith.constant 5.000000e-01 : f32
    %142 = vector.broadcast %cst_82 : f32 to vector<40x64xf32>
    %143 = arith.mulf %142, %141 : vector<40x64xf32>
    %cst_83 = arith.constant 0.707106769 : f32
    %144 = vector.broadcast %cst_83 : f32 to vector<40x64xf32>
    %145 = arith.mulf %141, %144 : vector<40x64xf32>
    %146 = math.absf %145 : vector<40x64xf32>
    %cst_84 = arith.constant 0.327591091 : f32
    %147 = vector.broadcast %cst_84 : f32 to vector<40x64xf32>
    %148 = arith.mulf %147, %146 : vector<40x64xf32>
    %cst_85 = arith.constant 1.000000e+00 : f32
    %149 = vector.broadcast %cst_85 : f32 to vector<40x64xf32>
    %150 = arith.addf %149, %148 : vector<40x64xf32>
    %cst_86 = arith.constant 1.000000e+00 : f32
    %151 = vector.broadcast %cst_86 : f32 to vector<40x64xf32>
    %152 = arith.divf %151, %150 : vector<40x64xf32>
    %cst_87 = arith.constant 1.06140542 : f32
    %153 = vector.broadcast %cst_87 : f32 to vector<40x64xf32>
    %154 = arith.mulf %153, %152 : vector<40x64xf32>
    %cst_88 = arith.constant -1.45315206 : f32
    %155 = vector.broadcast %cst_88 : f32 to vector<40x64xf32>
    %156 = arith.addf %154, %155 : vector<40x64xf32>
    %157 = arith.mulf %156, %152 : vector<40x64xf32>
    %cst_89 = arith.constant 1.42141378 : f32
    %158 = vector.broadcast %cst_89 : f32 to vector<40x64xf32>
    %159 = arith.addf %157, %158 : vector<40x64xf32>
    %160 = arith.mulf %159, %152 : vector<40x64xf32>
    %cst_90 = arith.constant -0.284496725 : f32
    %161 = vector.broadcast %cst_90 : f32 to vector<40x64xf32>
    %162 = arith.addf %160, %161 : vector<40x64xf32>
    %163 = arith.mulf %162, %152 : vector<40x64xf32>
    %cst_91 = arith.constant 0.254829586 : f32
    %164 = vector.broadcast %cst_91 : f32 to vector<40x64xf32>
    %165 = arith.addf %163, %164 : vector<40x64xf32>
    %166 = arith.mulf %165, %152 : vector<40x64xf32>
    %cst_92 = arith.constant 0.000000e+00 : f32
    %167 = vector.broadcast %cst_92 : f32 to vector<40x64xf32>
    %168 = arith.subf %167, %146 : vector<40x64xf32>
    %169 = arith.mulf %168, %146 : vector<40x64xf32>
    %170 = math.exp %169 : vector<40x64xf32>
    %171 = arith.mulf %166, %170 : vector<40x64xf32>
    %cst_93 = arith.constant 1.000000e+00 : f32
    %172 = vector.broadcast %cst_93 : f32 to vector<40x64xf32>
    %173 = arith.subf %172, %171 : vector<40x64xf32>
    %cst_94 = arith.constant 0.000000e+00 : f32
    %174 = vector.broadcast %cst_94 : f32 to vector<40x64xf32>
    %175 = arith.cmpf oge, %145, %174 : vector<40x64xf32>
    %cst_95 = arith.constant 0.000000e+00 : f32
    %176 = vector.broadcast %cst_95 : f32 to vector<40x64xf32>
    %177 = arith.subf %176, %173 : vector<40x64xf32>
    %178 = arith.select %175, %173, %177 : vector<40x64xi1>, vector<40x64xf32>
    %cst_96 = arith.constant 1.000000e+00 : f32
    %179 = vector.broadcast %cst_96 : f32 to vector<40x64xf32>
    %180 = arith.addf %179, %178 : vector<40x64xf32>
    %181 = arith.mulf %143, %180 : vector<40x64xf32>
    %182 = arith.truncf %181 : vector<40x64xf32> to vector<40x64xbf16>
    %c0_97 = arith.constant 0 : index
    %c0_98 = arith.constant 0 : index
    %c0_99 = arith.constant 0 : index
    %183 = vector.load %arg16[%c0_97, %c0_98, %c0_99] : memref<2x64x32xbf16, #tpu.memory_space<vmem>>, vector<1x64x32xbf16>
    %184 = vector.shape_cast %183 : vector<1x64x32xbf16> to vector<64x32xbf16>
    %cst_100 = arith.constant dense<0.000000e+00> : vector<40x32xf32>
    %185 = tpu.matmul %182, %184, %cst_100 {dimension_numbers = #tpu.dot_dimension_numbers<[1], [0], [0], [1], [0, 0, 1, 1], [], []>} : vector<40x64xbf16>, vector<64x32xbf16>, vector<40x32xf32> -> vector<40x32xf32>
    %186 = arith.addf %107, %185 : vector<40x32xf32>
    %c0_101 = arith.constant 0 : index
    %c0_102 = arith.constant 0 : index
    %c0_103 = arith.constant 0 : index
    %187 = vector.load %arg17[%c0_101, %c0_102, %c0_103] : memref<2x1x32xf32, #tpu.memory_space<vmem>>, vector<1x1x32xf32>
    %188 = vector.shape_cast %187 : vector<1x1x32xf32> to vector<1x32xf32>
    %189 = vector.broadcast %188 : vector<1x32xf32> to vector<40x32xf32>
    %190 = arith.addf %186, %189 : vector<40x32xf32>
    %c1_104 = arith.constant 1 : index
    %c0_105 = arith.constant 0 : index
    %c0_106 = arith.constant 0 : index
    %191 = vector.load %arg10[%c1_104, %c0_105, %c0_106] : memref<2x1x32xf32, #tpu.memory_space<vmem>>, vector<1x1x32xf32>
    %192 = vector.shape_cast %191 : vector<1x1x32xf32> to vector<1x32xf32>
    %c1_107 = arith.constant 1 : index
    %c0_108 = arith.constant 0 : index
    %c0_109 = arith.constant 0 : index
    %193 = vector.load %arg11[%c1_107, %c0_108, %c0_109] : memref<2x1x32xf32, #tpu.memory_space<vmem>>, vector<1x1x32xf32>
    %194 = vector.shape_cast %193 : vector<1x1x32xf32> to vector<1x32xf32>
    %cst_110 = arith.constant dense<0.000000e+00> : vector<40xf32>
    %195 = vector.multi_reduction <add>, %190, %cst_110 [1] : vector<40x32xf32> to vector<40xf32>
    %196 = vector.shape_cast %195 : vector<40xf32> to vector<40x1xf32>
    %cst_111 = arith.constant 3.200000e+01 : f32
    %197 = vector.broadcast %cst_111 : f32 to vector<40x1xf32>
    %198 = arith.divf %196, %197 : vector<40x1xf32>
    %199 = vector.broadcast %198 : vector<40x1xf32> to vector<40x32xf32>
    %200 = arith.subf %190, %199 : vector<40x32xf32>
    %201 = arith.mulf %200, %200 : vector<40x32xf32>
    %cst_112 = arith.constant dense<0.000000e+00> : vector<40xf32>
    %202 = vector.multi_reduction <add>, %201, %cst_112 [1] : vector<40x32xf32> to vector<40xf32>
    %203 = vector.shape_cast %202 : vector<40xf32> to vector<40x1xf32>
    %cst_113 = arith.constant 3.200000e+01 : f32
    %204 = vector.broadcast %cst_113 : f32 to vector<40x1xf32>
    %205 = arith.divf %203, %204 : vector<40x1xf32>
    %206 = vector.broadcast %198 : vector<40x1xf32> to vector<40x32xf32>
    %207 = arith.subf %190, %206 : vector<40x32xf32>
    %cst_114 = arith.constant 9.99999974E-6 : f32
    %208 = vector.broadcast %cst_114 : f32 to vector<40x1xf32>
    %209 = arith.addf %205, %208 : vector<40x1xf32>
    %210 = math.rsqrt %209 : vector<40x1xf32>
    %211 = vector.broadcast %210 : vector<40x1xf32> to vector<40x32xf32>
    %212 = arith.mulf %207, %211 : vector<40x32xf32>
    %213 = vector.broadcast %192 : vector<1x32xf32> to vector<40x32xf32>
    %214 = arith.mulf %212, %213 : vector<40x32xf32>
    %215 = vector.broadcast %194 : vector<1x32xf32> to vector<40x32xf32>
    %216 = arith.addf %214, %215 : vector<40x32xf32>
    %217 = arith.truncf %216 : vector<40x32xf32> to vector<40x32xbf16>
    %cst_115 = arith.constant 0.000000e+00 : f32
    %218 = vector.broadcast %cst_115 : f32 to vector<40x32xf32>
    %c2 = arith.constant 2 : index
    %c0_116 = arith.constant 0 : index
    %c0_117 = arith.constant 0 : index
    %219 = vector.load %arg5[%c2, %c0_116, %c0_117] : memref<4x32x16xbf16, #tpu.memory_space<vmem>>, vector<1x32x16xbf16>
    %220 = vector.shape_cast %219 : vector<1x32x16xbf16> to vector<32x16xbf16>
    %cst_118 = arith.constant dense<0.000000e+00> : vector<40x16xf32>
    %221 = tpu.matmul %217, %220, %cst_118 {dimension_numbers = #tpu.dot_dimension_numbers<[1], [0], [0], [1], [0, 0, 1, 1], [], []>} : vector<40x32xbf16>, vector<32x16xbf16>, vector<40x16xf32> -> vector<40x16xf32>
    %c2_119 = arith.constant 2 : index
    %c0_120 = arith.constant 0 : index
    %c0_121 = arith.constant 0 : index
    %222 = vector.load %arg6[%c2_119, %c0_120, %c0_121] : memref<4x32x16xbf16, #tpu.memory_space<vmem>>, vector<1x32x16xbf16>
    %223 = vector.shape_cast %222 : vector<1x32x16xbf16> to vector<32x16xbf16>
    %cst_122 = arith.constant dense<0.000000e+00> : vector<40x16xf32>
    %224 = tpu.matmul %217, %223, %cst_122 {dimension_numbers = #tpu.dot_dimension_numbers<[1], [0], [0], [1], [0, 0, 1, 1], [], []>} : vector<40x32xbf16>, vector<32x16xbf16>, vector<40x16xf32> -> vector<40x16xf32>
    %c2_123 = arith.constant 2 : index
    %c0_124 = arith.constant 0 : index
    %c0_125 = arith.constant 0 : index
    %225 = vector.load %arg7[%c2_123, %c0_124, %c0_125] : memref<4x32x16xbf16, #tpu.memory_space<vmem>>, vector<1x32x16xbf16>
    %226 = vector.shape_cast %225 : vector<1x32x16xbf16> to vector<32x16xbf16>
    %cst_126 = arith.constant dense<0.000000e+00> : vector<40x16xf32>
    %227 = tpu.matmul %217, %226, %cst_126 {dimension_numbers = #tpu.dot_dimension_numbers<[1], [0], [0], [1], [0, 0, 1, 1], [], []>} : vector<40x32xbf16>, vector<32x16xbf16>, vector<40x16xf32> -> vector<40x16xf32>
    %228 = arith.truncf %221 : vector<40x16xf32> to vector<40x16xbf16>
    %229 = arith.truncf %224 : vector<40x16xf32> to vector<40x16xbf16>
    %cst_127 = arith.constant dense<0.000000e+00> : vector<40x40xf32>
    %230 = tpu.matmul %228, %229, %cst_127 {dimension_numbers = #tpu.dot_dimension_numbers<[1], [1], [0], [0], [0, 0, 1, 0], [], []>} : vector<40x16xbf16>, vector<40x16xbf16>, vector<40x40xf32> -> vector<40x40xf32>
    %cst_128 = arith.constant 2.500000e-01 : f32
    %231 = vector.broadcast %cst_128 : f32 to vector<40x40xf32>
    %232 = arith.mulf %230, %231 : vector<40x40xf32>
    %233 = vector.broadcast %6 : vector<1x40xf32> to vector<40x40xf32>
    %234 = arith.addf %232, %233 : vector<40x40xf32>
    %cst_129 = arith.constant dense<0xFF800000> : vector<40xf32>
    %235 = vector.multi_reduction <maximumf>, %234, %cst_129 [1] : vector<40x40xf32> to vector<40xf32>
    %236 = vector.shape_cast %235 : vector<40xf32> to vector<40x1xf32>
    %237 = vector.broadcast %236 : vector<40x1xf32> to vector<40x40xf32>
    %238 = arith.subf %234, %237 : vector<40x40xf32>
    %239 = math.exp %238 : vector<40x40xf32>
    %cst_130 = arith.constant dense<0.000000e+00> : vector<40xf32>
    %240 = vector.multi_reduction <add>, %239, %cst_130 [1] : vector<40x40xf32> to vector<40xf32>
    %241 = vector.shape_cast %240 : vector<40xf32> to vector<40x1xf32>
    %242 = tpu.reciprocal %241 {approx = true} : vector<40x1xf32> -> vector<40x1xf32>
    %243 = vector.broadcast %242 : vector<40x1xf32> to vector<40x40xf32>
    %244 = arith.mulf %239, %243 : vector<40x40xf32>
    %245 = arith.truncf %244 : vector<40x40xf32> to vector<40x40xbf16>
    %246 = arith.truncf %227 : vector<40x16xf32> to vector<40x16xbf16>
    %cst_131 = arith.constant dense<0.000000e+00> : vector<40x16xf32>
    %247 = tpu.matmul %245, %246, %cst_131 {dimension_numbers = #tpu.dot_dimension_numbers<[1], [0], [0], [1], [0, 0, 1, 1], [], []>} : vector<40x40xbf16>, vector<40x16xbf16>, vector<40x16xf32> -> vector<40x16xf32>
    %248 = arith.truncf %247 : vector<40x16xf32> to vector<40x16xbf16>
    %c2_132 = arith.constant 2 : index
    %c0_133 = arith.constant 0 : index
    %c0_134 = arith.constant 0 : index
    %249 = vector.load %arg8[%c2_132, %c0_133, %c0_134] : memref<4x16x32xbf16, #tpu.memory_space<vmem>>, vector<1x16x32xbf16>
    %250 = vector.shape_cast %249 : vector<1x16x32xbf16> to vector<16x32xbf16>
    %cst_135 = arith.constant dense<0.000000e+00> : vector<40x32xf32>
    %251 = tpu.matmul %248, %250, %cst_135 {dimension_numbers = #tpu.dot_dimension_numbers<[1], [0], [0], [1], [0, 0, 1, 1], [], []>} : vector<40x16xbf16>, vector<16x32xbf16>, vector<40x32xf32> -> vector<40x32xf32>
    %252 = arith.addf %218, %251 : vector<40x32xf32>
    %c3 = arith.constant 3 : index
    %c0_136 = arith.constant 0 : index
    %c0_137 = arith.constant 0 : index
    %253 = vector.load %arg5[%c3, %c0_136, %c0_137] : memref<4x32x16xbf16, #tpu.memory_space<vmem>>, vector<1x32x16xbf16>
    %254 = vector.shape_cast %253 : vector<1x32x16xbf16> to vector<32x16xbf16>
    %cst_138 = arith.constant dense<0.000000e+00> : vector<40x16xf32>
    %255 = tpu.matmul %217, %254, %cst_138 {dimension_numbers = #tpu.dot_dimension_numbers<[1], [0], [0], [1], [0, 0, 1, 1], [], []>} : vector<40x32xbf16>, vector<32x16xbf16>, vector<40x16xf32> -> vector<40x16xf32>
    %c3_139 = arith.constant 3 : index
    %c0_140 = arith.constant 0 : index
    %c0_141 = arith.constant 0 : index
    %256 = vector.load %arg6[%c3_139, %c0_140, %c0_141] : memref<4x32x16xbf16, #tpu.memory_space<vmem>>, vector<1x32x16xbf16>
    %257 = vector.shape_cast %256 : vector<1x32x16xbf16> to vector<32x16xbf16>
    %cst_142 = arith.constant dense<0.000000e+00> : vector<40x16xf32>
    %258 = tpu.matmul %217, %257, %cst_142 {dimension_numbers = #tpu.dot_dimension_numbers<[1], [0], [0], [1], [0, 0, 1, 1], [], []>} : vector<40x32xbf16>, vector<32x16xbf16>, vector<40x16xf32> -> vector<40x16xf32>
    %c3_143 = arith.constant 3 : index
    %c0_144 = arith.constant 0 : index
    %c0_145 = arith.constant 0 : index
    %259 = vector.load %arg7[%c3_143, %c0_144, %c0_145] : memref<4x32x16xbf16, #tpu.memory_space<vmem>>, vector<1x32x16xbf16>
    %260 = vector.shape_cast %259 : vector<1x32x16xbf16> to vector<32x16xbf16>
    %cst_146 = arith.constant dense<0.000000e+00> : vector<40x16xf32>
    %261 = tpu.matmul %217, %260, %cst_146 {dimension_numbers = #tpu.dot_dimension_numbers<[1], [0], [0], [1], [0, 0, 1, 1], [], []>} : vector<40x32xbf16>, vector<32x16xbf16>, vector<40x16xf32> -> vector<40x16xf32>
    %262 = arith.truncf %255 : vector<40x16xf32> to vector<40x16xbf16>
    %263 = arith.truncf %258 : vector<40x16xf32> to vector<40x16xbf16>
    %cst_147 = arith.constant dense<0.000000e+00> : vector<40x40xf32>
    %264 = tpu.matmul %262, %263, %cst_147 {dimension_numbers = #tpu.dot_dimension_numbers<[1], [1], [0], [0], [0, 0, 1, 0], [], []>} : vector<40x16xbf16>, vector<40x16xbf16>, vector<40x40xf32> -> vector<40x40xf32>
    %cst_148 = arith.constant 2.500000e-01 : f32
    %265 = vector.broadcast %cst_148 : f32 to vector<40x40xf32>
    %266 = arith.mulf %264, %265 : vector<40x40xf32>
    %267 = vector.broadcast %6 : vector<1x40xf32> to vector<40x40xf32>
    %268 = arith.addf %266, %267 : vector<40x40xf32>
    %cst_149 = arith.constant dense<0xFF800000> : vector<40xf32>
    %269 = vector.multi_reduction <maximumf>, %268, %cst_149 [1] : vector<40x40xf32> to vector<40xf32>
    %270 = vector.shape_cast %269 : vector<40xf32> to vector<40x1xf32>
    %271 = vector.broadcast %270 : vector<40x1xf32> to vector<40x40xf32>
    %272 = arith.subf %268, %271 : vector<40x40xf32>
    %273 = math.exp %272 : vector<40x40xf32>
    %cst_150 = arith.constant dense<0.000000e+00> : vector<40xf32>
    %274 = vector.multi_reduction <add>, %273, %cst_150 [1] : vector<40x40xf32> to vector<40xf32>
    %275 = vector.shape_cast %274 : vector<40xf32> to vector<40x1xf32>
    %276 = tpu.reciprocal %275 {approx = true} : vector<40x1xf32> -> vector<40x1xf32>
    %277 = vector.broadcast %276 : vector<40x1xf32> to vector<40x40xf32>
    %278 = arith.mulf %273, %277 : vector<40x40xf32>
    %279 = arith.truncf %278 : vector<40x40xf32> to vector<40x40xbf16>
    %280 = arith.truncf %261 : vector<40x16xf32> to vector<40x16xbf16>
    %cst_151 = arith.constant dense<0.000000e+00> : vector<40x16xf32>
    %281 = tpu.matmul %279, %280, %cst_151 {dimension_numbers = #tpu.dot_dimension_numbers<[1], [0], [0], [1], [0, 0, 1, 1], [], []>} : vector<40x40xbf16>, vector<40x16xbf16>, vector<40x16xf32> -> vector<40x16xf32>
    %282 = arith.truncf %281 : vector<40x16xf32> to vector<40x16xbf16>
    %c3_152 = arith.constant 3 : index
    %c0_153 = arith.constant 0 : index
    %c0_154 = arith.constant 0 : index
    %283 = vector.load %arg8[%c3_152, %c0_153, %c0_154] : memref<4x16x32xbf16, #tpu.memory_space<vmem>>, vector<1x16x32xbf16>
    %284 = vector.shape_cast %283 : vector<1x16x32xbf16> to vector<16x32xbf16>
    %cst_155 = arith.constant dense<0.000000e+00> : vector<40x32xf32>
    %285 = tpu.matmul %282, %284, %cst_155 {dimension_numbers = #tpu.dot_dimension_numbers<[1], [0], [0], [1], [0, 0, 1, 1], [], []>} : vector<40x16xbf16>, vector<16x32xbf16>, vector<40x32xf32> -> vector<40x32xf32>
    %286 = arith.addf %252, %285 : vector<40x32xf32>
    %287 = arith.addf %190, %286 : vector<40x32xf32>
    %c1_156 = arith.constant 1 : index
    %c0_157 = arith.constant 0 : index
    %c0_158 = arith.constant 0 : index
    %288 = vector.load %arg9[%c1_156, %c0_157, %c0_158] : memref<2x1x32xf32, #tpu.memory_space<vmem>>, vector<1x1x32xf32>
    %289 = vector.shape_cast %288 : vector<1x1x32xf32> to vector<1x32xf32>
    %290 = vector.broadcast %289 : vector<1x32xf32> to vector<40x32xf32>
    %291 = arith.addf %287, %290 : vector<40x32xf32>
    %c1_159 = arith.constant 1 : index
    %c0_160 = arith.constant 0 : index
    %c0_161 = arith.constant 0 : index
    %292 = vector.load %arg12[%c1_159, %c0_160, %c0_161] : memref<2x1x32xf32, #tpu.memory_space<vmem>>, vector<1x1x32xf32>
    %293 = vector.shape_cast %292 : vector<1x1x32xf32> to vector<1x32xf32>
    %c1_162 = arith.constant 1 : index
    %c0_163 = arith.constant 0 : index
    %c0_164 = arith.constant 0 : index
    %294 = vector.load %arg13[%c1_162, %c0_163, %c0_164] : memref<2x1x32xf32, #tpu.memory_space<vmem>>, vector<1x1x32xf32>
    %295 = vector.shape_cast %294 : vector<1x1x32xf32> to vector<1x32xf32>
    %cst_165 = arith.constant dense<0.000000e+00> : vector<40xf32>
    %296 = vector.multi_reduction <add>, %291, %cst_165 [1] : vector<40x32xf32> to vector<40xf32>
    %297 = vector.shape_cast %296 : vector<40xf32> to vector<40x1xf32>
    %cst_166 = arith.constant 3.200000e+01 : f32
    %298 = vector.broadcast %cst_166 : f32 to vector<40x1xf32>
    %299 = arith.divf %297, %298 : vector<40x1xf32>
    %300 = vector.broadcast %299 : vector<40x1xf32> to vector<40x32xf32>
    %301 = arith.subf %291, %300 : vector<40x32xf32>
    %302 = arith.mulf %301, %301 : vector<40x32xf32>
    %cst_167 = arith.constant dense<0.000000e+00> : vector<40xf32>
    %303 = vector.multi_reduction <add>, %302, %cst_167 [1] : vector<40x32xf32> to vector<40xf32>
    %304 = vector.shape_cast %303 : vector<40xf32> to vector<40x1xf32>
    %cst_168 = arith.constant 3.200000e+01 : f32
    %305 = vector.broadcast %cst_168 : f32 to vector<40x1xf32>
    %306 = arith.divf %304, %305 : vector<40x1xf32>
    %307 = vector.broadcast %299 : vector<40x1xf32> to vector<40x32xf32>
    %308 = arith.subf %291, %307 : vector<40x32xf32>
    %cst_169 = arith.constant 9.99999974E-6 : f32
    %309 = vector.broadcast %cst_169 : f32 to vector<40x1xf32>
    %310 = arith.addf %306, %309 : vector<40x1xf32>
    %311 = math.rsqrt %310 : vector<40x1xf32>
    %312 = vector.broadcast %311 : vector<40x1xf32> to vector<40x32xf32>
    %313 = arith.mulf %308, %312 : vector<40x32xf32>
    %314 = vector.broadcast %293 : vector<1x32xf32> to vector<40x32xf32>
    %315 = arith.mulf %313, %314 : vector<40x32xf32>
    %316 = vector.broadcast %295 : vector<1x32xf32> to vector<40x32xf32>
    %317 = arith.addf %315, %316 : vector<40x32xf32>
    %318 = arith.truncf %317 : vector<40x32xf32> to vector<40x32xbf16>
    %c1_170 = arith.constant 1 : index
    %c0_171 = arith.constant 0 : index
    %c0_172 = arith.constant 0 : index
    %319 = vector.load %arg14[%c1_170, %c0_171, %c0_172] : memref<2x32x64xbf16, #tpu.memory_space<vmem>>, vector<1x32x64xbf16>
    %320 = vector.shape_cast %319 : vector<1x32x64xbf16> to vector<32x64xbf16>
    %cst_173 = arith.constant dense<0.000000e+00> : vector<40x64xf32>
    %321 = tpu.matmul %318, %320, %cst_173 {dimension_numbers = #tpu.dot_dimension_numbers<[1], [0], [0], [1], [0, 0, 1, 1], [], []>} : vector<40x32xbf16>, vector<32x64xbf16>, vector<40x64xf32> -> vector<40x64xf32>
    %c1_174 = arith.constant 1 : index
    %c0_175 = arith.constant 0 : index
    %c0_176 = arith.constant 0 : index
    %322 = vector.load %arg15[%c1_174, %c0_175, %c0_176] : memref<2x1x64xf32, #tpu.memory_space<vmem>>, vector<1x1x64xf32>
    %323 = vector.shape_cast %322 : vector<1x1x64xf32> to vector<1x64xf32>
    %324 = vector.broadcast %323 : vector<1x64xf32> to vector<40x64xf32>
    %325 = arith.addf %321, %324 : vector<40x64xf32>
    %cst_177 = arith.constant 5.000000e-01 : f32
    %326 = vector.broadcast %cst_177 : f32 to vector<40x64xf32>
    %327 = arith.mulf %326, %325 : vector<40x64xf32>
    %cst_178 = arith.constant 0.707106769 : f32
    %328 = vector.broadcast %cst_178 : f32 to vector<40x64xf32>
    %329 = arith.mulf %325, %328 : vector<40x64xf32>
    %330 = math.absf %329 : vector<40x64xf32>
    %cst_179 = arith.constant 0.327591091 : f32
    %331 = vector.broadcast %cst_179 : f32 to vector<40x64xf32>
    %332 = arith.mulf %331, %330 : vector<40x64xf32>
    %cst_180 = arith.constant 1.000000e+00 : f32
    %333 = vector.broadcast %cst_180 : f32 to vector<40x64xf32>
    %334 = arith.addf %333, %332 : vector<40x64xf32>
    %cst_181 = arith.constant 1.000000e+00 : f32
    %335 = vector.broadcast %cst_181 : f32 to vector<40x64xf32>
    %336 = arith.divf %335, %334 : vector<40x64xf32>
    %cst_182 = arith.constant 1.06140542 : f32
    %337 = vector.broadcast %cst_182 : f32 to vector<40x64xf32>
    %338 = arith.mulf %337, %336 : vector<40x64xf32>
    %cst_183 = arith.constant -1.45315206 : f32
    %339 = vector.broadcast %cst_183 : f32 to vector<40x64xf32>
    %340 = arith.addf %338, %339 : vector<40x64xf32>
    %341 = arith.mulf %340, %336 : vector<40x64xf32>
    %cst_184 = arith.constant 1.42141378 : f32
    %342 = vector.broadcast %cst_184 : f32 to vector<40x64xf32>
    %343 = arith.addf %341, %342 : vector<40x64xf32>
    %344 = arith.mulf %343, %336 : vector<40x64xf32>
    %cst_185 = arith.constant -0.284496725 : f32
    %345 = vector.broadcast %cst_185 : f32 to vector<40x64xf32>
    %346 = arith.addf %344, %345 : vector<40x64xf32>
    %347 = arith.mulf %346, %336 : vector<40x64xf32>
    %cst_186 = arith.constant 0.254829586 : f32
    %348 = vector.broadcast %cst_186 : f32 to vector<40x64xf32>
    %349 = arith.addf %347, %348 : vector<40x64xf32>
    %350 = arith.mulf %349, %336 : vector<40x64xf32>
    %cst_187 = arith.constant 0.000000e+00 : f32
    %351 = vector.broadcast %cst_187 : f32 to vector<40x64xf32>
    %352 = arith.subf %351, %330 : vector<40x64xf32>
    %353 = arith.mulf %352, %330 : vector<40x64xf32>
    %354 = math.exp %353 : vector<40x64xf32>
    %355 = arith.mulf %350, %354 : vector<40x64xf32>
    %cst_188 = arith.constant 1.000000e+00 : f32
    %356 = vector.broadcast %cst_188 : f32 to vector<40x64xf32>
    %357 = arith.subf %356, %355 : vector<40x64xf32>
    %cst_189 = arith.constant 0.000000e+00 : f32
    %358 = vector.broadcast %cst_189 : f32 to vector<40x64xf32>
    %359 = arith.cmpf oge, %329, %358 : vector<40x64xf32>
    %cst_190 = arith.constant 0.000000e+00 : f32
    %360 = vector.broadcast %cst_190 : f32 to vector<40x64xf32>
    %361 = arith.subf %360, %357 : vector<40x64xf32>
    %362 = arith.select %359, %357, %361 : vector<40x64xi1>, vector<40x64xf32>
    %cst_191 = arith.constant 1.000000e+00 : f32
    %363 = vector.broadcast %cst_191 : f32 to vector<40x64xf32>
    %364 = arith.addf %363, %362 : vector<40x64xf32>
    %365 = arith.mulf %327, %364 : vector<40x64xf32>
    %366 = arith.truncf %365 : vector<40x64xf32> to vector<40x64xbf16>
    %c1_192 = arith.constant 1 : index
    %c0_193 = arith.constant 0 : index
    %c0_194 = arith.constant 0 : index
    %367 = vector.load %arg16[%c1_192, %c0_193, %c0_194] : memref<2x64x32xbf16, #tpu.memory_space<vmem>>, vector<1x64x32xbf16>
    %368 = vector.shape_cast %367 : vector<1x64x32xbf16> to vector<64x32xbf16>
    %cst_195 = arith.constant dense<0.000000e+00> : vector<40x32xf32>
    %369 = tpu.matmul %366, %368, %cst_195 {dimension_numbers = #tpu.dot_dimension_numbers<[1], [0], [0], [1], [0, 0, 1, 1], [], []>} : vector<40x64xbf16>, vector<64x32xbf16>, vector<40x32xf32> -> vector<40x32xf32>
    %370 = arith.addf %291, %369 : vector<40x32xf32>
    %c1_196 = arith.constant 1 : index
    %c0_197 = arith.constant 0 : index
    %c0_198 = arith.constant 0 : index
    %371 = vector.load %arg17[%c1_196, %c0_197, %c0_198] : memref<2x1x32xf32, #tpu.memory_space<vmem>>, vector<1x1x32xf32>
    %372 = vector.shape_cast %371 : vector<1x1x32xf32> to vector<1x32xf32>
    %373 = vector.broadcast %372 : vector<1x32xf32> to vector<40x32xf32>
    %374 = arith.addf %370, %373 : vector<40x32xf32>
    %c0_199 = arith.constant 0 : index
    %c0_200 = arith.constant 0 : index
    %375 = vector.load %arg20[%c0_199, %c0_200] : memref<40x1xf32, #tpu.memory_space<vmem>>, vector<40x1xf32>
    %376 = vector.broadcast %375 : vector<40x1xf32> to vector<40x32xf32>
    %377 = arith.mulf %374, %376 : vector<40x32xf32>
    %cst_201 = arith.constant dense<0.000000e+00> : vector<32xf32>
    %378 = vector.multi_reduction <add>, %377, %cst_201 [0] : vector<40x32xf32> to vector<32xf32>
    %379 = vector.shape_cast %378 : vector<32xf32> to vector<1x32xf32>
    %c0_202 = arith.constant 0 : index
    %c0_203 = arith.constant 0 : index
    %380 = vector.load %arg18[%c0_202, %c0_203] : memref<1x32xf32, #tpu.memory_space<vmem>>, vector<1x32xf32>
    %c0_204 = arith.constant 0 : index
    %c0_205 = arith.constant 0 : index
    %381 = vector.load %arg19[%c0_204, %c0_205] : memref<1x32xf32, #tpu.memory_space<vmem>>, vector<1x32xf32>
    %cst_206 = arith.constant dense<0.000000e+00> : vector<1xf32>
    %382 = vector.multi_reduction <add>, %379, %cst_206 [1] : vector<1x32xf32> to vector<1xf32>
    %383 = vector.shape_cast %382 : vector<1xf32> to vector<1x1xf32>
    %cst_207 = arith.constant 3.200000e+01 : f32
    %384 = vector.broadcast %cst_207 : f32 to vector<1x1xf32>
    %385 = arith.divf %383, %384 : vector<1x1xf32>
    %386 = vector.broadcast %385 : vector<1x1xf32> to vector<1x32xf32>
    %387 = arith.subf %379, %386 : vector<1x32xf32>
    %388 = arith.mulf %387, %387 : vector<1x32xf32>
    %cst_208 = arith.constant dense<0.000000e+00> : vector<1xf32>
    %389 = vector.multi_reduction <add>, %388, %cst_208 [1] : vector<1x32xf32> to vector<1xf32>
    %390 = vector.shape_cast %389 : vector<1xf32> to vector<1x1xf32>
    %cst_209 = arith.constant 3.200000e+01 : f32
    %391 = vector.broadcast %cst_209 : f32 to vector<1x1xf32>
    %392 = arith.divf %390, %391 : vector<1x1xf32>
    %393 = vector.broadcast %385 : vector<1x1xf32> to vector<1x32xf32>
    %394 = arith.subf %379, %393 : vector<1x32xf32>
    %cst_210 = arith.constant 9.99999974E-6 : f32
    %395 = vector.broadcast %cst_210 : f32 to vector<1x1xf32>
    %396 = arith.addf %392, %395 : vector<1x1xf32>
    %397 = math.rsqrt %396 : vector<1x1xf32>
    %398 = vector.broadcast %397 : vector<1x1xf32> to vector<1x32xf32>
    %399 = arith.mulf %394, %398 : vector<1x32xf32>
    %400 = arith.mulf %399, %380 : vector<1x32xf32>
    %401 = arith.addf %400, %381 : vector<1x32xf32>
    %402 = arith.truncf %401 : vector<1x32xf32> to vector<1x32xbf16>
    %c0_211 = arith.constant 0 : index
    %c0_212 = arith.constant 0 : index
    %403 = vector.load %arg21[%c0_211, %c0_212] : memref<32x128xbf16, #tpu.memory_space<vmem>>, vector<32x128xbf16>
    %cst_213 = arith.constant dense<0.000000e+00> : vector<1x128xf32>
    %404 = tpu.matmul %402, %403, %cst_213 {dimension_numbers = #tpu.dot_dimension_numbers<[1], [0], [0], [1], [0, 0, 1, 1], [], []>} : vector<1x32xbf16>, vector<32x128xbf16>, vector<1x128xf32> -> vector<1x128xf32>
    %c0_214 = arith.constant 0 : index
    %c0_215 = arith.constant 0 : index
    %405 = vector.load %arg22[%c0_214, %c0_215] : memref<1x128xf32, #tpu.memory_space<vmem>>, vector<1x128xf32>
    %406 = arith.addf %404, %405 : vector<1x128xf32>
    %c0_216 = arith.constant 0 : index
    %c0_217 = arith.constant 0 : index
    %c0_218 = arith.constant 0 : index
    %407 = vector.load %arg23[%c0_216, %c0_217, %c0_218] : memref<1x1x128xf32, #tpu.memory_space<vmem>>, vector<1x1x128xf32>
    %408 = vector.shape_cast %407 : vector<1x1x128xf32> to vector<1x128xf32>
    %409 = vector.shape_cast %406 : vector<1x128xf32> to vector<1x1x128xf32>
    tpu.vector_store %arg23[%c0_216, %c0_217, %c0_218], %409 {strides = array<i32>} : memref<1x1x128xf32, #tpu.memory_space<vmem>>, vector<1x1x128xf32>,
    return
  }
  func.func @transform_0(%arg0: i32) -> (i32, i32, i32) {
    %c0_i32 = arith.constant 0 : i32
    %c0_i32_0 = arith.constant 0 : i32
    %c0_i32_1 = arith.constant 0 : i32
    return %arg0, %c0_i32, %c0_i32_0 : i32, i32, i32
  }
  func.func @transform_1(%arg0: i32) -> (i32, i32) {
    %c0_i32 = arith.constant 0 : i32
    %c0_i32_0 = arith.constant 0 : i32
    %c0_i32_1 = arith.constant 0 : i32
    return %c0_i32, %c0_i32_0 : i32, i32
  }
  func.func @transform_2(%arg0: i32) -> (i32, i32) {
    %c0_i32 = arith.constant 0 : i32
    %c0_i32_0 = arith.constant 0 : i32
    %c0_i32_1 = arith.constant 0 : i32
    return %c0_i32, %c0_i32_0 : i32, i32
  }
  func.func @transform_3(%arg0: i32) -> (i32, i32) {
    %c0_i32 = arith.constant 0 : i32
    %c0_i32_0 = arith.constant 0 : i32
    %c0_i32_1 = arith.constant 0 : i32
    return %c0_i32, %c0_i32_0 : i32, i32
  }
  func.func @transform_4(%arg0: i32) -> (i32, i32, i32) {
    %c0_i32 = arith.constant 0 : i32
    %c0_i32_0 = arith.constant 0 : i32
    %c0_i32_1 = arith.constant 0 : i32
    %c0_i32_2 = arith.constant 0 : i32
    return %c0_i32, %c0_i32_0, %c0_i32_1 : i32, i32, i32
  }
  func.func @transform_5(%arg0: i32) -> (i32, i32, i32) {
    %c0_i32 = arith.constant 0 : i32
    %c0_i32_0 = arith.constant 0 : i32
    %c0_i32_1 = arith.constant 0 : i32
    %c0_i32_2 = arith.constant 0 : i32
    return %c0_i32, %c0_i32_0, %c0_i32_1 : i32, i32, i32
  }
  func.func @transform_6(%arg0: i32) -> (i32, i32, i32) {
    %c0_i32 = arith.constant 0 : i32
    %c0_i32_0 = arith.constant 0 : i32
    %c0_i32_1 = arith.constant 0 : i32
    %c0_i32_2 = arith.constant 0 : i32
    return %c0_i32, %c0_i32_0, %c0_i32_1 : i32, i32, i32
  }
  func.func @transform_7(%arg0: i32) -> (i32, i32, i32) {
    %c0_i32 = arith.constant 0 : i32
    %c0_i32_0 = arith.constant 0 : i32
    %c0_i32_1 = arith.constant 0 : i32
    %c0_i32_2 = arith.constant 0 : i32
    return %c0_i32, %c0_i32_0, %c0_i32_1 : i32, i32, i32
  }
  func.func @transform_8(%arg0: i32) -> (i32, i32, i32) {
    %c0_i32 = arith.constant 0 : i32
    %c0_i32_0 = arith.constant 0 : i32
    %c0_i32_1 = arith.constant 0 : i32
    %c0_i32_2 = arith.constant 0 : i32
    return %c0_i32, %c0_i32_0, %c0_i32_1 : i32, i32, i32
  }
  func.func @transform_9(%arg0: i32) -> (i32, i32, i32) {
    %c0_i32 = arith.constant 0 : i32
    %c0_i32_0 = arith.constant 0 : i32
    %c0_i32_1 = arith.constant 0 : i32
    %c0_i32_2 = arith.constant 0 : i32
    return %c0_i32, %c0_i32_0, %c0_i32_1 : i32, i32, i32
  }
  func.func @transform_10(%arg0: i32) -> (i32, i32, i32) {
    %c0_i32 = arith.constant 0 : i32
    %c0_i32_0 = arith.constant 0 : i32
    %c0_i32_1 = arith.constant 0 : i32
    %c0_i32_2 = arith.constant 0 : i32
    return %c0_i32, %c0_i32_0, %c0_i32_1 : i32, i32, i32
  }
  func.func @transform_11(%arg0: i32) -> (i32, i32, i32) {
    %c0_i32 = arith.constant 0 : i32
    %c0_i32_0 = arith.constant 0 : i32
    %c0_i32_1 = arith.constant 0 : i32
    %c0_i32_2 = arith.constant 0 : i32
    return %c0_i32, %c0_i32_0, %c0_i32_1 : i32, i32, i32
  }
  func.func @transform_12(%arg0: i32) -> (i32, i32, i32) {
    %c0_i32 = arith.constant 0 : i32
    %c0_i32_0 = arith.constant 0 : i32
    %c0_i32_1 = arith.constant 0 : i32
    %c0_i32_2 = arith.constant 0 : i32
    return %c0_i32, %c0_i32_0, %c0_i32_1 : i32, i32, i32
  }
  func.func @transform_13(%arg0: i32) -> (i32, i32, i32) {
    %c0_i32 = arith.constant 0 : i32
    %c0_i32_0 = arith.constant 0 : i32
    %c0_i32_1 = arith.constant 0 : i32
    %c0_i32_2 = arith.constant 0 : i32
    return %c0_i32, %c0_i32_0, %c0_i32_1 : i32, i32, i32
  }
  func.func @transform_14(%arg0: i32) -> (i32, i32, i32) {
    %c0_i32 = arith.constant 0 : i32
    %c0_i32_0 = arith.constant 0 : i32
    %c0_i32_1 = arith.constant 0 : i32
    %c0_i32_2 = arith.constant 0 : i32
    return %c0_i32, %c0_i32_0, %c0_i32_1 : i32, i32, i32
  }
  func.func @transform_15(%arg0: i32) -> (i32, i32, i32) {
    %c0_i32 = arith.constant 0 : i32
    %c0_i32_0 = arith.constant 0 : i32
    %c0_i32_1 = arith.constant 0 : i32
    %c0_i32_2 = arith.constant 0 : i32
    return %c0_i32, %c0_i32_0, %c0_i32_1 : i32, i32, i32
  }
  func.func @transform_16(%arg0: i32) -> (i32, i32, i32) {
    %c0_i32 = arith.constant 0 : i32
    %c0_i32_0 = arith.constant 0 : i32
    %c0_i32_1 = arith.constant 0 : i32
    %c0_i32_2 = arith.constant 0 : i32
    return %c0_i32, %c0_i32_0, %c0_i32_1 : i32, i32, i32
  }
  func.func @transform_17(%arg0: i32) -> (i32, i32) {
    %c0_i32 = arith.constant 0 : i32
    %c0_i32_0 = arith.constant 0 : i32
    %c0_i32_1 = arith.constant 0 : i32
    return %c0_i32, %c0_i32_0 : i32, i32
  }
  func.func @transform_18(%arg0: i32) -> (i32, i32) {
    %c0_i32 = arith.constant 0 : i32
    %c0_i32_0 = arith.constant 0 : i32
    %c0_i32_1 = arith.constant 0 : i32
    return %c0_i32, %c0_i32_0 : i32, i32
  }
  func.func @transform_19(%arg0: i32) -> (i32, i32) {
    %c0_i32 = arith.constant 0 : i32
    %c0_i32_0 = arith.constant 0 : i32
    %c0_i32_1 = arith.constant 0 : i32
    return %c0_i32, %c0_i32_0 : i32, i32
  }
  func.func @transform_20(%arg0: i32) -> (i32, i32) {
    %c0_i32 = arith.constant 0 : i32
    %c0_i32_0 = arith.constant 0 : i32
    %c0_i32_1 = arith.constant 0 : i32
    return %c0_i32, %c0_i32_0 : i32, i32
  }
  func.func @transform_21(%arg0: i32) -> (i32, i32) {
    %c0_i32 = arith.constant 0 : i32
    %c0_i32_0 = arith.constant 0 : i32
    %c0_i32_1 = arith.constant 0 : i32
    return %c0_i32, %c0_i32_0 : i32, i32
  }
  func.func @transform_22(%arg0: i32) -> (i32, i32, i32) {
    %c0_i32 = arith.constant 0 : i32
    %c0_i32_0 = arith.constant 0 : i32
    %c0_i32_1 = arith.constant 0 : i32
    return %arg0, %c0_i32, %c0_i32_0 : i32, i32, i32
  }
}

</mosaic_0001>

<bundles_post_ra>
// kernel: tpu_custom_call.1
= control target key start
LH: loop header
LB: loop body
LE: loop exit
PB: predicated region body
PF: predicated region fallthrough
CT: control target
= control target key end

     0   :  { %s6566_s0 = inlined_call_operand.vmem [shape: bf16[2,40,4], index: 0, kind: input, shape index: {}]   ;;  %s6567_s1 = inlined_call_operand.vmem [shape: bf16[4,32], index: 1, kind: input, shape index: {}]   ;;  %s6568_s2 = inlined_call_operand.vmem [shape: f32[40,32], index: 2, kind: input, shape index: {}]   ;;  %s6569_s3 = inlined_call_operand.vmem [shape: f32[1,40], index: 3, kind: input, shape index: {}]   ;;  %s6570_s4 = inlined_call_operand.vmem [shape: bf16[4,32,16], index: 4, kind: input, shape index: {}]   ;;  %s6571_s5 = inlined_call_operand.vmem [shape: bf16[4,32,16], index: 5, kind: input, shape index: {}]   ;;  %s6572_s6 = inlined_call_operand.vmem [shape: bf16[4,32,16], index: 6, kind: input, shape index: {}]   ;;  %s6573_s7 = inlined_call_operand.vmem [shape: bf16[4,16,32], index: 7, kind: input, shape index: {}]   ;;  %s6574_s8 = inlined_call_operand.vmem [shape: f32[2,1,32], index: 8, kind: input, shape index: {}]   ;;  %s6575_s9 = inlined_call_operand.vmem [shape: f32[2,1,32], index: 9, kind: input, shape index: {}]   ;;  %s6576_s10 = inlined_call_operand.vmem [shape: f32[2,1,32], index: 10, kind: input, shape index: {}]   ;;  %s6577_s11 = inlined_call_operand.vmem [shape: f32[2,1,32], index: 11, kind: input, shape index: {}]   ;;  %s6578_s12 = inlined_call_operand.vmem [shape: f32[2,1,32], index: 12, kind: input, shape index: {}]   ;;  %s6579_s13 = inlined_call_operand.vmem [shape: bf16[2,32,64], index: 13, kind: input, shape index: {}]   ;;  %s6580_s14 = inlined_call_operand.vmem [shape: f32[2,1,64], index: 14, kind: input, shape index: {}]   ;;  %s6581_s15 = inlined_call_operand.vmem [shape: bf16[2,64,32], index: 15, kind: input, shape index: {}]   ;;  %s6582_s16 = inlined_call_operand.vmem [shape: f32[2,1,32], index: 16, kind: input, shape index: {}]   ;;  %s6583_s17 = inlined_call_operand.vmem [shape: f32[1,32], index: 17, kind: input, shape index: {}]   ;;  %s6584_s18 = inlined_call_operand.vmem [shape: f32[1,32], index: 18, kind: input, shape index: {}]   ;;  %s6585_s19 = inlined_call_operand.vmem [shape: f32[40,1], index: 19, kind: input, shape index: {}]   ;;  %s6586_s20 = inlined_call_operand.vmem [shape: bf16[32,128], index: 20, kind: input, shape index: {}]   ;;  %s6587_s21 = inlined_call_operand.vmem [shape: f32[1,128], index: 21, kind: input, shape index: {}]   ;;  %s6588_s22 = inlined_call_operand.hbm [shape: f32[2,1,128], index: 22, kind: output, shape index: {}]  }
   0x1   :  { %6602 = sst [smem:[#allocation11_spill]] %s6566_s0 }
   0x2   :  { %6603 = sst [smem:[#allocation12_spill]] %s6567_s1 }
   0x3   :  { %6604 = sst [smem:[#allocation13_spill]] %s6568_s2 }
   0x4   :  { %6605 = sst [smem:[#allocation14_spill]] %s6569_s3 }
   0x5   :  { %6606 = sst [smem:[#allocation15_spill]] %s6570_s4 }
   0x6   :  { %6607 = sst [smem:[#allocation16_spill]] %s6571_s5 }
   0x7   :  { %6608 = sst [smem:[#allocation17_spill]] %s6572_s6 }
   0x8   :  { %6609 = sst [smem:[#allocation18_spill]] %s6573_s7 }
   0x9   :  { %27 = vsyncpa [#allocation3], 0 }
   0xa   :  { %29 = vsyncpa [#allocation3 + $0x1], 0  ;;  %s5447_s3 = smov 0   ;;  %s5449_s28 = smov 0  }
   0xb   :  { %s5451_s29 = smov 0   ;;  %s5453_s30 = smov 0  }
   0xc LB: > { %6610 = sst [smem:[#allocation5_spill]] %s5314_s3  ;;  %s5468_s4 = sadd.s32 4294967295, %s5326_s30   ;;  %s5326_s30 = sphi %s5453_s30, %s6630_s30   ;;  %s5322_s29 = sphi %s5451_s29, %s6632_s29   ;;  %s5318_s28 = sphi %s5449_s28, %s6634_s28   ;;  %s5314_s3 = sphi %s5447_s3, %s6633_s3  }
   0xd   : > { %6611 = sst [smem:[#allocation6_spill]] %s5322_s29  ;;  %s4151_s0 = sadd.s32 4294967294, %s5326_s30  }
   0xe   : > { %6612 = sst [smem:[#allocation7_spill]] %s5326_s30  ;;  %s5472_s23 = sadd.s32 1, %s5326_s30  }
   0xf   : > { %6613 = sst [smem:[#allocation8_spill]] %s5472_s23  ;;  %s509_s1 = sadd.s32 1, %s5322_s29 }
  0x10   : > { %s506_s5 = ssub.s32 %s5326_s30, %s5472_s23  ;;  %p519_p0 = scmp.ne.s32.totalorder %s5322_s29, %s5318_s28 }
  0x11   : > { %p507_p1 = scmp.eq.s32.totalorder %s506_s5, 0  ;;  %p520_p2 = scmp.eq.s32.totalorder %s5468_s4, 1 }
  0x12   : > { %p525_p3 = scmp.ne.s32.totalorder %s5318_s28, %s5314_s3  ;;  %p526_p4 = scmp.eq.s32.totalorder %s4151_s0, 1 }
  0x13   : > { %s5483_s24 = scalar_select %p507_p1, %s5322_s29, %s509_s1  }
  0x14   : > { %p5485_p5 = por %p520_p2, %p519_p0  ;;  %p5489_p6 = por %p526_p4, %p525_p3 }
  0x15   : > { %6614 = sst [smem:[#allocation9_spill]] %s5483_s24  ;;  %p4154_p7 = scmp.ge.s32.totalorder %s5326_s30, 1 }
  0x16   : > { %s6616_s25 = scalar_select %p5489_p6, 1, 0 }
  0x17   : > { %p615_p8 = scmp.lt.s32.totalorder %s5326_s30, 3 }
  0x18   : > { %6617 = sst [smem:[#allocation10_spill]] %s6616_s25 }
  0x19   : > { %p616_p9 = pnand %p4154_p7, %p615_p8 }
  0x1a   : > { %s6618_s27 = sld [smem:[#allocation12_spill]] (!%p616_p9)  ;;  %vm716_vm0 = vcmask (!%p616_p9), 1041408   ;;  %p676_p10 = scmp.lt.s32.totalorder (!%p616_p9), %s5468_s4, 1  ;;  %v5328_v1 = vmov (!%p616_p9), 0.0   ;;  %vm5329_vm1 = vmmov (!%p616_p9), 0   ;;  %vm706_vm2 = vcmask (!%p616_p9), 31744  }
  0x1b   : > { %619 = sbr.rel (%p616_p9) target bundleno = 7078 (0x1ba6), region = 108  ;;  %4523 = vmatprep.subr.bf16.mxu0 (!%p616_p9), %v5328_v1  ;;  %4525 = vmatprep.mubr.msk.bf16.mxu0 (!%p616_p9), %vm5329_vm1, %v5328_v1  ;;  %s6619_s2 = sld [smem:[#allocation11_spill]] (!%p616_p9)  ;;  %vm779_vm3 = vcmask (!%p616_p9), 261120   ;;  %vm1102_vm4 = vcmask (!%p616_p9), 130048   ;;  %vm1264_vm5 = vcmask (!%p616_p9), 1043456   ;;  %vm1193_vm6 = vcmask (!%p616_p9), 326656  }
  0x1c   : > { %5009 = vmatprep.subr.bf16.mxu1 (!%p616_p9), %v5328_v1  ;;  %4533 = vmatprep.mubr.msk.bf16.mxu1 (!%p616_p9), %vm5329_vm1, %v5328_v1  ;;  %s6620_s29 = sld [smem:[#allocation13_spill]] (!%p616_p9)  ;;  %s6622_s26 = sld [smem:[#allocation16_spill]] (!%p616_p9)  ;;  %vm2282_vm9 = vcmask (!%p616_p9), 523264  }
  0x1d   : > { %s6623_s24 = sld [smem:[#allocation15_spill]] (!%p616_p9)  ;;  %s6626_s7 = sld [smem:[#allocation18_spill]] (!%p616_p9) }
  0x1e   : > { %s674_s5 = sand.u32 (!%p616_p9), 1, %s5318_s28  }
  0x20   : > { %v687_v0 = vld [vmem:[%s6618_s27] sm:$0x3] (!%p616_p9) }
  0x21   : > { %v718_v2 = vsel (!%p616_p9), %vm716_vm0, %v687_v0, 0 }
  0x22   : > { %4524 = vmatpush3.bf16.msra.mxu0 %v718_v2  ;;  %s677_s0 = scalar_select %p676_p10, %s5468_s4, 1  ;;  %5010 = vmatpush3.bf16.msra.mxu1 %v718_v2  ;;  %v688_v6 = vld [vmem:[%s6620_s29] sm:$0xff]  ;;  %v5061_v60 = vld [vmem:[%s6622_s26 + $0x8] sm:$0xff]  }
  0x23   : > { %4553 = vmatprep.subr.bf16.mxu0 %v5328_v1  ;;  %4537 = vmatprep.subr.bf16.mxu1 %v5328_v1  ;;  %s6621_s23 = smov %s6620_s29  ;;  %v5059_v58 = vld [vmem:[%s6622_s26] sm:$0xff]   ;;  %v5062_v61 = vld [vmem:[%s6623_s24 + $0x8] sm:$0xff]   ;;  %s4084_s29 = scalar_lea.sflag [#allocation3], %s674_s5 }
  0x24   : > { %s5011_s1 = smul.u32 20, %s677_s0  ;;  %v689_v8 = vld [vmem:[%s6621_s23 + $0x8] sm:$0xff]  ;;  %v692_v12 = vld [vmem:[%s6621_s23 + $0x20] sm:$0xff]  ;;  %v690_v21 = vld [vmem:[%s6621_s23 + $0x10] sm:$0xff]  ;;  %s5331_s0 = smov [#allocation2]  }
  0x25   : > { %v691_v24 = vld [vmem:[%s6621_s23 + $0x18] sm:$0xff]  ;;  %v5060_v59 = vld [vmem:[%s6623_s24] sm:$0xff]   ;;  %s4365_s23 = sshll.u32 %s5468_s4, 4 }
  0x26   : > { %s680_s27 = scalar_lea.vmem %s6619_s2, %s5011_s1  ;;  %s6625_s2 = sld [smem:[#allocation14_spill]] }
  0x27   : > { %v5056_v3 = vld [vmem:[%s680_s27] sm:$0xff]   ;;  %v5058_v4 = vld [vmem:[%s680_s27 + $0x10] ss:$0 sps:$4 sm:$0xff]   ;;  %v5057_v5 = vld [vmem:[%s680_s27 + $0x8] sm:$0xff]   ;;  %s6624_s27 = sld [smem:[#allocation17_spill]]  ;;  %s6524_s1 = scalar_lea.hbm %s6588_s22, %s4365_s23 }
  0x28   : > { %4526 = vmatmul.mubr.msk.bf16.vlgmr.msra.gmra.mrb[0].mxu0 %vm706_vm2, %v5056_v3  ;;  %4534 = vmatmul.mubr.msk.bf16.vlgmr.msra.gmra.mrb[0].mxu1 %vm706_vm2, %v5058_v4 }
  0x29   : > { %4529 = vmatprep.mubr.msk.bf16.mxu0 %vm5329_vm1, %v5328_v1  ;;  %4541 = vmatprep.mubr.msk.bf16.mxu1 %vm5329_vm1, %v5328_v1 }
  0x2a   : > { %4554 = vmatpush3.bf16.msra.mxu0 %v5059_v58  ;;  %4538 = vmatpush3.bf16.msra.mxu1 %v5060_v59 }
  0x2b   : > { %4555 = vmatprep.subr.bf16.mxu0 %v5328_v1  ;;  %4539 = vmatprep.subr.bf16.mxu1 %v5328_v1 }
  0x2e   : > { %4556 = vmatpush3.bf16.msra.mxu0 %v5061_v60  ;;  %4540 = vmatpush3.bf16.msra.mxu1 %v5062_v61 }
  0x2f   : > { %4569 = vmatprep.subr.bf16.mxu1 %v5328_v1  ;;  %4585 = vmatprep.subr.bf16.mxu0 %v5328_v1 }
  0x30   : > { %4530 = vmatmul.mubr.msk.bf16.gmra.mrb[4].mxu0 %vm706_vm2, %v5057_v5 }
  0x31   : > { %4557 = vmatprep.mubr.msk.bf16.mxu0 %vm5329_vm1, %v5328_v1 }
  0xfb   : > { %v754_v7 = vpop.f32.mrb[0].mxu0  ;;  %v770_v13 = vpop.f32.mrb[0].mxu1 }
  0xfc   : > { %v5523_v9 = vadd.f32 %v754_v7, %v688_v6  ;;  %v4527_v10 = vpop.f32.mrb[1].mxu0  ;;  %v4535_v17 = vpop.f32.mrb[1].mxu1  ;;  %v5532_v19 = vadd.f32 %v770_v13, %v692_v12 }
  0xfd   : > { %v757_v11 = vpop.f32.mrb[2].mxu0  ;;  %v773_v18 = vpop.f32.mrb[2].mxu1 }
  0xfe   : > { %v5528_v14 = vadd.f32 %v757_v11, %v689_v8  ;;  %v4528_v15 = vpop.f32.mrb[3].mxu0  ;;  %v780_v16 = vsel %vm779_vm3, %v5523_v9, 0.0  ;;  %v4536_v20 = vpop.f32.mrb[3].mxu1  ;;  %v792_v27 = vsel %vm779_vm3, %v5532_v19, 0.0  ;;  %v4162_v18 = vld [vmem:[%s6575_s9] ss:$0 sm:$0xff] }
  0xff   : > { %781 = vadd.xlane.f32.xlu0 %v780_v16 }
 0x100   : > { %v783_v22 = vsel %vm779_vm3, %v5528_v14, 0.0 }
 0x103   : > { %784 = vadd.xlane.f32.xlu0 %v783_v22  ;;  %v762_v23 = vpop.f32.mrb[4].mxu0 }
 0x104   : > { %v5542_v25 = vadd.f32 %v762_v23, %v690_v21  ;;  %v4531_v26 = vpop.f32.mrb[5].mxu0  ;;  %v4163_v23 = vld [vmem:[%s6576_s10] ss:$0 sm:$0xff] }
 0x105   : > { %v765_v28 = vpop.f32.mrb[6].mxu0 }
 0x106   : > { %v5546_v29 = vadd.f32 %v765_v28, %v691_v24  ;;  %v4532_v30 = vpop.f32.mrb[7].mxu0  ;;  %v786_v31 = vsel %vm779_vm3, %v5542_v25, 0.0 }
 0x107   : > { %793 = vadd.xlane.f32.xlu0 %v792_v27  ;;  %787 = vadd.xlane.f32.xlu1 %v786_v31 }
 0x108   : > { %v789_v32 = vsel %vm779_vm3, %v5546_v29, 0.0 }
 0x10b   : > { %790 = vadd.xlane.f32.xlu1 %v789_v32  ;;  %v5063_v32 = vld [vmem:[%s6624_s27] sm:$0xff]  }
 0x18c   : > { %v782_v33 = vpop.xlane.xlu0 %781 }
 0x18d   : > { %v796_v34 = vmul.f32 0.03125, %v782_v33 }
 0x18f   : > { %v801_v35 = vsub.f32 %v5523_v9, %v796_v34 }
 0x190   : > { %v785_v36 = vpop.xlane.xlu0 %784 }
 0x191   : > { %v797_v37 = vmul.f32 0.03125, %v785_v36  ;;  %v806_v38 = vmul.f32 %v801_v35, %v801_v35 }
 0x193   : > { %v802_v39 = vsub.f32 %v5528_v14, %v797_v37  ;;  %v811_v40 = vsel %vm779_vm3, %v806_v38, 0.0 }
 0x194   : > { %v794_v41 = vpop.xlane.xlu0 %793  ;;  %v788_v42 = vpop.xlane.xlu1 %787  ;;  %812 = vadd.xlane.f32.xlu1 %v811_v40 }
 0x195   : > { %v800_v43 = vmul.f32 0.03125, %v794_v41  ;;  %v798_v44 = vmul.f32 0.03125, %v788_v42  ;;  %v807_v45 = vmul.f32 %v802_v39, %v802_v39 }
 0x197   : > { %v5556_v46 = vsub.f32 %v5532_v19, %v800_v43  ;;  %v803_v47 = vsub.f32 %v5542_v25, %v798_v44  ;;  %v814_v48 = vsel %vm779_vm3, %v807_v45, 0.0 }
 0x198   : > { %815 = vadd.xlane.f32.xlu0 %v814_v48  ;;  %v791_v49 = vpop.xlane.xlu1 %790 }
 0x199   : > { %v799_v50 = vmul.f32 0.03125, %v791_v49  ;;  %v808_v51 = vmul.f32 %v803_v47, %v803_v47  ;;  %v810_v54 = vmul.f32 %v5556_v46, %v5556_v46 }
 0x19b   : > { %v804_v52 = vsub.f32 %v5546_v29, %v799_v50  ;;  %v817_v53 = vsel %vm779_vm3, %v808_v51, 0.0  ;;  %v823_v56 = vsel %vm779_vm3, %v810_v54, 0.0 }
 0x19c   : > { %818 = vadd.xlane.f32.xlu1 %v817_v53 }
 0x19d   : > { %v809_v55 = vmul.f32 %v804_v52, %v804_v52 }
 0x19f   : > { %v820_v57 = vsel %vm779_vm3, %v809_v55, 0.0 }
 0x1a0   : > { %824 = vadd.xlane.f32.xlu1 %v823_v56  ;;  %821 = vadd.xlane.f32.xlu0 %v820_v57 }
 0x221   : > { %v813_v62 = vpop.xlane.xlu1 %812 }
 0x222   : > { %v826_v63 = vmul.f32 0.03125, %v813_v62 }
 0x224   : > { %v831_v0 = vadd.f32 1e-05, %v826_v63 }
 0x225   : > { %v816_v2 = vpop.xlane.xlu0 %815 }
 0x226   : > { %5101 = vrsqrt.f32 %v831_v0  ;;  %v827_v3 = vmul.f32 0.03125, %v816_v2 }
 0x228   : > { %v832_v4 = vadd.f32 1e-05, %v827_v3 }
 0x229   : > { %v819_v5 = vpop.xlane.xlu1 %818 }
 0x22a   : > { %5103 = vrsqrt.f32 %v832_v4  ;;  %v828_v6 = vmul.f32 0.03125, %v819_v5 }
 0x22c   : > { %v833_v7 = vadd.f32 1e-05, %v828_v6 }
 0x22d   : > { %v822_v8 = vpop.xlane.xlu0 %821  ;;  %v825_v10 = vpop.xlane.xlu1 %824 }
 0x22e   : > { %5105 = vrsqrt.f32 %v833_v7  ;;  %v829_v11 = vmul.f32 0.03125, %v822_v8  ;;  %v830_v12 = vmul.f32 0.03125, %v825_v10 }
 0x230   : > { %v5102_v13 = vpop.eup %5101  ;;  %v834_v15 = vadd.f32 1e-05, %v829_v11  ;;  %v835_v16 = vadd.f32 1e-05, %v830_v12 }
 0x231   : > { %v841_v17 = vmul.f32 %v5102_v13, %v801_v35 }
 0x232   : > { %5107 = vrsqrt.f32 %v834_v15 }
 0x233   : > { %5109 = vrsqrt.f32 %v835_v16  ;;  %v852_v21 = vmul.f32 %v4162_v18, %v841_v17 }
 0x234   : > { %v5104_v20 = vpop.eup %5103 }
 0x235   : > { %v842_v22 = vmul.f32 %v5104_v20, %v802_v39  ;;  %v863_v27 = vadd.f32 %v4163_v23, %v852_v21  ;;  %v5064_v39 = vld [vmem:[%s6624_s27 + $0x8] sm:$0xff]  }
 0x237   : > { %v853_v24 = vmul.f32 %v4162_v18, %v842_v22 }
 0x238   : > { %v5106_v26 = vpop.eup %5105 }
 0x239   : > { %v864_v28 = vadd.f32 %v4163_v23, %v853_v24  ;;  %v843_v30 = vmul.f32 %v5106_v26, %v803_v47  ;;  %v5066_v24 = vld [vmem:[%s6623_s24 + $0x18] sm:$0xff]  }
 0x23b   : > { %v5588_v31 = vpack.c.bf16 %v864_v28, %v863_v27  ;;  %v854_v35 = vmul.f32 %v4162_v18, %v843_v30 }
 0x23c   : > { %v5108_v33 = vpop.eup %5107 }
 0x23d   : > { %v5110_v34 = vpop.eup %5109  ;;  %v844_v36 = vmul.f32 %v5108_v33, %v804_v52  ;;  %4542 = vmatmul.mubr.msk.bf16.vlgmr.msra.gmra.mrb[4].mxu1 %vm779_vm3, %v5588_v31  ;;  %4558 = vmatmul.mubr.msk.bf16.vlgmr.msra.gmra.mrb[8].mxu0 %vm779_vm3, %v5588_v31  ;;  %v865_v40 = vadd.f32 %v4163_v23, %v854_v35 }
 0x23e   : > { %4545 = vmatprep.mubr.msk.bf16.mxu1 %vm5329_vm1, %v5328_v1  ;;  %4561 = vmatprep.mubr.msk.bf16.mxu0 %vm5329_vm1, %v5328_v1  ;;  %v845_v38 = vmul.f32 %v5110_v34, %v5556_v46 }
 0x23f   : > { %v855_v37 = vmul.f32 %v4162_v18, %v844_v36  ;;  %4570 = vmatpush3.bf16.msra.mxu1 %v5063_v32 }
 0x240   : > { %4571 = vmatprep.subr.bf16.mxu1 %v5328_v1  ;;  %v856_v42 = vmul.f32 %v4162_v18, %v845_v38 }
 0x241   : > { %v866_v41 = vadd.f32 %v4163_v23, %v855_v37 }
 0x242   : > { %v867_v44 = vadd.f32 %v4163_v23, %v856_v42  ;;  %v5065_v23 = vld [vmem:[%s6623_s24 + $0x10] sm:$0xff]  }
 0x243   : > { %v5606_v43 = vpack.c.bf16 %v866_v41, %v865_v40  ;;  %4572 = vmatpush3.bf16.msra.mxu1 %v5064_v39  ;;  %v5067_v40 = vld [vmem:[%s6624_s27 + $0x10] sm:$0xff]   ;;  %v5068_v41 = vld [vmem:[%s6624_s27 + $0x18] sm:$0xff]  }
 0x244   : > { %4603 = vmatprep.subr.bf16.mxu1 %v5328_v1  ;;  %v5617_v45 = vpack.c.bf16 %v867_v44, %v867_v44  ;;  %v5701_v44 = vld [vmem:[%s6625_s2] ss:$0 sm:$0xff] }
 0x245   : > { %4546 = vmatmul.mubr.msk.bf16.gmra.mrb[8].mxu1 %vm779_vm3, %v5606_v43  ;;  %4562 = vmatmul.mubr.msk.bf16.gmra.mrb[12].mxu0 %vm779_vm3, %v5606_v43 }
 0x246   : > { %4549 = vmatprep.mubr.msk.bf16.mxu1 %vm5329_vm1, %v5328_v1  ;;  %4565 = vmatprep.mubr.msk.bf16.mxu0 %vm5329_vm1, %v5328_v1 }
 0x24d   : > { %4550 = vmatmul.mubr.msk.bf16.gmra.mrb[12].mxu1 %vm779_vm3, %v5617_v45  ;;  %4566 = vmatmul.mubr.msk.bf16.gmra.mrb[16].mxu0 %vm779_vm3, %v5617_v45 }
 0x24e   : > { %4573 = vmatprep.mubr.msk.bf16.mxu1 %vm5329_vm1, %v5328_v1  ;;  %4591 = vmatprep.mubr.msk.bf16.mxu0 %vm5329_vm1, %v5328_v1 }
 0x255   : > { %4574 = vmatmul.mubr.msk.bf16.vlgmr.msra.gmra.mrb[16].mxu1 %vm779_vm3, %v5588_v31 }
 0x256   : > { %4577 = vmatprep.mubr.msk.bf16.mxu1 %vm5329_vm1, %v5328_v1 }
 0x25d   : > { %4578 = vmatmul.mubr.msk.bf16.gmra.mrb[20].mxu1 %vm779_vm3, %v5606_v43 }
 0x25e   : > { %4581 = vmatprep.mubr.msk.bf16.mxu1 %vm5329_vm1, %v5328_v1 }
 0x265   : > { %4582 = vmatmul.mubr.msk.bf16.gmra.mrb[24].mxu1 %vm779_vm3, %v5617_v45 }
 0x266   : > { %4609 = vmatprep.mubr.msk.bf16.mxu1 %vm5329_vm1, %v5328_v1 }
 0x310   : > { %v930_v46 = vpop.f32.mrb[4].mxu1  ;;  %v1002_v47 = vpop.f32.mrb[8].mxu0 }
 0x311   : > { %v4543_v48 = vpop.f32.mrb[5].mxu1  ;;  %v4559_v49 = vpop.f32.mrb[9].mxu0 }
 0x312   : > { %v933_v50 = vpop.f32.mrb[6].mxu1  ;;  %v1005_v51 = vpop.f32.mrb[10].mxu0 }
 0x313   : > { %v1096_v52 = vpack.c.bf16 %v933_v50, %v930_v46  ;;  %v1099_v53 = vpack.c.bf16 %v1005_v51, %v1002_v47  ;;  %v4544_v54 = vpop.f32.mrb[7].mxu1  ;;  %v4560_v55 = vpop.f32.mrb[11].mxu0 }
 0x315   : > { %v1113_v56 = vsel %vm1102_vm4, %v1099_v53, 0 }
 0x316   : > { %4586 = vmatpush3.bf16.xpose.msra.mxu0 %v1113_v56 }
 0x317   : > { %4587 = vmatprep.subr.bf16.mxu0 %v5328_v1 }
 0x318   : > { %v938_v57 = vpop.f32.mrb[8].mxu1  ;;  %v1010_v58 = vpop.f32.mrb[12].mxu0 }
 0x319   : > { %v4547_v59 = vpop.f32.mrb[9].mxu1  ;;  %v4563_v60 = vpop.f32.mrb[13].mxu0 }
 0x31a   : > { %v941_v61 = vpop.f32.mrb[10].mxu1  ;;  %v1013_v62 = vpop.f32.mrb[14].mxu0 }
 0x31b   : > { %v1097_v63 = vpack.c.bf16 %v941_v61, %v938_v57  ;;  %v1100_v0 = vpack.c.bf16 %v1013_v62, %v1010_v58  ;;  %v4548_v2 = vpop.f32.mrb[11].mxu1  ;;  %v4564_v3 = vpop.f32.mrb[15].mxu0 }
 0x31d   : > { %v1116_v4 = vsel %vm1102_vm4, %v1100_v0, 0 }
 0x31e   : > { %4588 = vmatpush3.bf16.xpose.msra.mxu0 %v1116_v4 }
 0x31f   : > { %4589 = vmatprep.subr.bf16.mxu0 %v5328_v1 }
 0x320   : > { %v946_v5 = vpop.f32.mrb[12].mxu1  ;;  %v1018_v6 = vpop.f32.mrb[16].mxu0 }
 0x321   : > { %v1101_v7 = vpack.c.bf16 %v1018_v6, %v1018_v6  ;;  %v4551_v8 = vpop.f32.mrb[13].mxu1  ;;  %v4567_v10 = vpop.f32.mrb[17].mxu0  ;;  %v1098_v37 = vpack.c.bf16 %v946_v5, %v946_v5 }
 0x322   : > { %v949_v11 = vpop.f32.mrb[14].mxu1  ;;  %v1021_v12 = vpop.f32.mrb[18].mxu0 }
 0x323   : > { %v4552_v13 = vpop.f32.mrb[15].mxu1  ;;  %v4568_v15 = vpop.f32.mrb[19].mxu0  ;;  %v1119_v16 = vsel %vm1102_vm4, %v1101_v7, 0 }
 0x326   : > { %4590 = vmatpush3.bf16.xpose.msra.mxu0 %v1119_v16 }
 0x327   : > { %4621 = vmatprep.subr.bf16.mxu0 %v5328_v1 }
 0x328   : > { %v1074_v17 = vpop.f32.mrb[16].mxu1 }
 0x329   : > { %v4575_v18 = vpop.f32.mrb[17].mxu1 }
 0x32a   : > { %v1077_v20 = vpop.f32.mrb[18].mxu1 }
 0x32b   : > { %v1252_v21 = vpack.c.bf16 %v1077_v20, %v1074_v17  ;;  %v4576_v22 = vpop.f32.mrb[19].mxu1 }
 0x32d   : > { %4592 = vmatmul.mubr.msk.bf16.vlgmr.msra.gmra.mrb[20].mxu0 %vm1102_vm4, %v1096_v52  ;;  %4604 = vmatpush3.bf16.msra.mxu1 %v1252_v21 }
 0x32e   : > { %4595 = vmatprep.mubr.msk.bf16.mxu0 %vm5329_vm1, %v5328_v1  ;;  %4605 = vmatprep.subr.bf16.mxu1 %v5328_v1 }
 0x32f   : > { %4622 = vmatpush3.bf16.msra.mxu0 %v5065_v23 }
 0x330   : > { %v1082_v26 = vpop.f32.mrb[20].mxu1  ;;  %4623 = vmatprep.subr.bf16.mxu0 %v5328_v1 }
 0x331   : > { %v4579_v27 = vpop.f32.mrb[21].mxu1 }
 0x332   : > { %v1085_v28 = vpop.f32.mrb[22].mxu1 }
 0x333   : > { %v1253_v30 = vpack.c.bf16 %v1085_v28, %v1082_v26  ;;  %v4580_v32 = vpop.f32.mrb[23].mxu1  ;;  %4624 = vmatpush3.bf16.msra.mxu0 %v5066_v24 }
 0x334   : > { %4653 = vmatprep.subr.bf16.mxu0 %v5328_v1 }
 0x335   : > { %4596 = vmatmul.mubr.msk.bf16.gmra.mrb[24].mxu0 %vm1102_vm4, %v1097_v63  ;;  %4606 = vmatpush3.bf16.msra.mxu1 %v1253_v30 }
 0x336   : > { %4607 = vmatprep.subr.bf16.mxu1 %v5328_v1  ;;  %4599 = vmatprep.mubr.msk.bf16.mxu0 %vm5329_vm1, %v5328_v1 }
 0x338   : > { %v1090_v33 = vpop.f32.mrb[24].mxu1 }
 0x339   : > { %v1254_v34 = vpack.c.bf16 %v1090_v33, %v1090_v33  ;;  %v4583_v35 = vpop.f32.mrb[25].mxu1 }
 0x33a   : > { %v1093_v36 = vpop.f32.mrb[26].mxu1 }
 0x33b   : > { %v1266_v38 = vsel %vm1264_vm5, %v1254_v34, 0  ;;  %v4584_v39 = vpop.f32.mrb[27].mxu1 }
 0x33c   : > { %4608 = vmatpush3.bf16.msra.mxu1 %v1266_v38 }
 0x33d   : > { %4600 = vmatmul.mubr.msk.bf16.gmra.mrb[28].mxu0 %vm1102_vm4, %v1098_v37  ;;  %4637 = vmatprep.subr.bf16.mxu1 %v5328_v1 }
 0x33e   : > { %4625 = vmatprep.mubr.msk.bf16.mxu0 %vm5329_vm1, %v5328_v1 }
 0x345   : > { %4626 = vmatmul.mubr.msk.bf16.vlgmr.msra.gmra.mrb[32].mxu0 %vm779_vm3, %v5588_v31 }
 0x346   : > { %4629 = vmatprep.mubr.msk.bf16.mxu0 %vm5329_vm1, %v5328_v1  ;;  %4654 = vmatpush3.bf16.msra.mxu0 %v5067_v40 }
 0x347   : > { %4655 = vmatprep.subr.bf16.mxu0 %v5328_v1 }
 0x34a   : > { %4656 = vmatpush3.bf16.msra.mxu0 %v5068_v41 }
 0x34b   : > { %4687 = vmatprep.subr.bf16.mxu0 %v5328_v1 }
 0x34d   : > { %4630 = vmatmul.mubr.msk.bf16.gmra.mrb[36].mxu0 %vm779_vm3, %v5606_v43 }
 0x34e   : > { %4633 = vmatprep.mubr.msk.bf16.mxu0 %vm5329_vm1, %v5328_v1 }
 0x355   : > { %4634 = vmatmul.mubr.msk.bf16.gmra.mrb[40].mxu0 %vm779_vm3, %v5617_v45 }
 0x356   : > { %4657 = vmatprep.mubr.msk.bf16.mxu0 %vm5329_vm1, %v5328_v1 }
 0x35d   : > { %4658 = vmatmul.mubr.msk.bf16.vlgmr.msra.gmra.mrb[44].mxu0 %vm779_vm3, %v5588_v31 }
 0x35e   : > { %4661 = vmatprep.mubr.msk.bf16.mxu0 %vm5329_vm1, %v5328_v1 }
 0x365   : > { %4662 = vmatmul.mubr.msk.bf16.gmra.mrb[48].mxu0 %vm779_vm3, %v5606_v43 }
 0x366   : > { %4665 = vmatprep.mubr.msk.bf16.mxu0 %vm5329_vm1, %v5328_v1 }
 0x36d   : > { %4666 = vmatmul.mubr.msk.bf16.gmra.mrb[52].mxu0 %vm779_vm3, %v5617_v45 }
 0x36e   : > { %4693 = vmatprep.mubr.msk.bf16.mxu0 %vm5329_vm1, %v5328_v1 }
 0x400   : > { %v1155_v42 = vpop.f32.mrb[20].mxu0 }
 0x401   : > { %v1177_v46 = vmul.f32 0.25, %v1155_v42  ;;  %v4593_v47 = vpop.f32.mrb[21].mxu0 }
 0x402   : > { %v1158_v48 = vpop.f32.mrb[22].mxu0 }
 0x403   : > { %v1178_v49 = vmul.f32 0.25, %v1158_v48  ;;  %v4594_v50 = vpop.f32.mrb[23].mxu0  ;;  %v5704_v51 = vadd.f32 %v5701_v44, %v1177_v46 }
 0x405   : > { %v1194_v52 = vsel %vm1193_vm6, %v5704_v51, -inf  ;;  %v5709_v53 = vadd.f32 %v5701_v44, %v1178_v49 }
 0x406   : > { %1195 = vmax.xlane.f32.xlu0 %v1194_v52 }
 0x407   : > { %v1197_v54 = vsel %vm1193_vm6, %v5709_v53, -inf }
 0x408   : > { %1198 = vmax.xlane.f32.xlu1 %v1197_v54  ;;  %v1163_v55 = vpop.f32.mrb[24].mxu0 }
 0x409   : > { %v1179_v56 = vmul.f32 0.25, %v1163_v55  ;;  %v4597_v57 = vpop.f32.mrb[25].mxu0 }
 0x40a   : > { %v1166_v58 = vpop.f32.mrb[26].mxu0 }
 0x40b   : > { %v1180_v59 = vmul.f32 0.25, %v1166_v58  ;;  %v4598_v60 = vpop.f32.mrb[27].mxu0  ;;  %v1190_v61 = vadd.f32 %v5701_v44, %v1179_v56 }
 0x40d   : > { %v1200_v62 = vsel %vm1193_vm6, %v1190_v61, -inf  ;;  %v1191_v63 = vadd.f32 %v5701_v44, %v1180_v59 }
 0x40e   : > { %1201 = vmax.xlane.f32.xlu0 %v1200_v62 }
 0x40f   : > { %v1203_v0 = vsel %vm1193_vm6, %v1191_v63, -inf }
 0x410   : > { %1204 = vmax.xlane.f32.xlu1 %v1203_v0  ;;  %v1171_v2 = vpop.f32.mrb[28].mxu0 }
 0x411   : > { %v1181_v3 = vmul.f32 0.25, %v1171_v2  ;;  %v4601_v4 = vpop.f32.mrb[29].mxu0 }
 0x412   : > { %v1174_v5 = vpop.f32.mrb[30].mxu0 }
 0x413   : > { %v4602_v6 = vpop.f32.mrb[31].mxu0  ;;  %v1192_v7 = vadd.f32 %v5701_v44, %v1181_v3 }
 0x415   : > { %v1206_v8 = vsel %vm1193_vm6, %v1192_v7, -inf }
 0x416   : > { %1207 = vmax.xlane.f32.xlu0 %v1206_v8 }
 0x418   : > { %v5719_v10 = vpop.f32.mrb[32].mxu0 }
 0x419   : > { %v4627_v11 = vpop.f32.mrb[33].mxu0 }
 0x41a   : > { %v5721_v12 = vpop.f32.mrb[34].mxu0 }
 0x41b   : > { %v1548_v13 = vpack.c.bf16 %v5721_v12, %v5719_v10  ;;  %v4628_v15 = vpop.f32.mrb[35].mxu0 }
 0x420   : > { %v5725_v16 = vpop.f32.mrb[36].mxu0 }
 0x421   : > { %v4631_v17 = vpop.f32.mrb[37].mxu0 }
 0x422   : > { %v5727_v18 = vpop.f32.mrb[38].mxu0 }
 0x423   : > { %v1549_v20 = vpack.c.bf16 %v5727_v18, %v5725_v16  ;;  %v4632_v21 = vpop.f32.mrb[39].mxu0 }
 0x428   : > { %v5731_v22 = vpop.f32.mrb[40].mxu0 }
 0x429   : > { %v4635_v23 = vpop.f32.mrb[41].mxu0 }
 0x42a   : > { %v1399_v24 = vpop.f32.mrb[42].mxu0 }
 0x42b   : > { %v4636_v26 = vpop.f32.mrb[43].mxu0 }
 0x430   : > { %v1526_v27 = vpop.f32.mrb[44].mxu0 }
 0x431   : > { %v4659_v28 = vpop.f32.mrb[45].mxu0 }
 0x432   : > { %v1529_v30 = vpop.f32.mrb[46].mxu0 }
 0x433   : > { %v1696_v32 = vpack.c.bf16 %v1529_v30, %v1526_v27  ;;  %v4660_v33 = vpop.f32.mrb[47].mxu0  ;;  %v5069_v30 = vld [vmem:[%s6622_s26 + $0x10] sm:$0xff]  }
 0x435   : > { %4688 = vmatpush3.bf16.msra.mxu0 %v1696_v32 }
 0x436   : > { %4689 = vmatprep.subr.bf16.mxu0 %v5328_v1 }
 0x438   : > { %v1534_v34 = vpop.f32.mrb[48].mxu0 }
 0x439   : > { %v4663_v35 = vpop.f32.mrb[49].mxu0 }
 0x43a   : > { %v1537_v36 = vpop.f32.mrb[50].mxu0  ;;  %v5070_v35 = vld [vmem:[%s6622_s26 + $0x18] sm:$0xff]  }
 0x43b   : > { %v1697_v37 = vpack.c.bf16 %v1537_v36, %v1534_v34  ;;  %v4664_v38 = vpop.f32.mrb[51].mxu0 }
 0x43d   : > { %4690 = vmatpush3.bf16.msra.mxu0 %v1697_v37 }
 0x43e   : > { %4691 = vmatprep.subr.bf16.mxu0 %v5328_v1 }
 0x440   : > { %v1542_v39 = vpop.f32.mrb[52].mxu0 }
 0x441   : > { %v1698_v40 = vpack.c.bf16 %v1542_v39, %v1542_v39  ;;  %v4667_v41 = vpop.f32.mrb[53].mxu0 }
 0x442   : > { %v1545_v42 = vpop.f32.mrb[54].mxu0 }
 0x443   : > { %v1709_v46 = vsel %vm1264_vm5, %v1698_v40, 0  ;;  %v4668_v47 = vpop.f32.mrb[55].mxu0 }
 0x444   : > { %4692 = vmatpush3.bf16.msra.mxu0 %v1709_v46 }
 0x445   : > { %4719 = vmatprep.subr.bf16.mxu0 %v5328_v1 }
 0x493   : > { %v1196_v48 = vpop.xlane.xlu0 %1195 }
 0x494   : > { %v1209_v49 = vsub.f32 %v5704_v51, %v1196_v48 }
 0x495   : > { %v1199_v50 = vpop.xlane.xlu1 %1198 }
 0x496   : > { %v1214_v52 = vmul.f32 1.442695, %v1209_v49  ;;  %v1210_v54 = vsub.f32 %v5709_v53, %v1199_v50 }
 0x498   : > { %5111 = vpow2.f32 %v1214_v52  ;;  %v1216_v55 = vmul.f32 1.442695, %v1210_v54 }
 0x49a   : > { %5113 = vpow2.f32 %v1216_v55 }
 0x49b   : > { %v1202_v56 = vpop.xlane.xlu0 %1201 }
 0x49c   : > { %v1211_v57 = vsub.f32 %v1190_v61, %v1202_v56 }
 0x49d   : > { %v1205_v58 = vpop.xlane.xlu1 %1204 }
 0x49e   : > { %v1218_v59 = vmul.f32 1.442695, %v1211_v57  ;;  %v1212_v60 = vsub.f32 %v1191_v63, %v1205_v58 }
 0x4a0   : > { %5115 = vpow2.f32 %v1218_v59  ;;  %v1220_v62 = vmul.f32 1.442695, %v1212_v60 }
 0x4a2   : > { %v5112_v0 = vpop.eup %5111  ;;  %5117 = vpow2.f32 %v1220_v62 }
 0x4a3   : > { %v1208_v2 = vpop.xlane.xlu0 %1207  ;;  %v1224_v3 = vsel %vm1193_vm6, %v5112_v0, 0.0 }
 0x4a4   : > { %v5114_v51 = vpop.eup %5113  ;;  %v1213_v4 = vsub.f32 %v1192_v7, %v1208_v2  ;;  %1225 = vadd.xlane.f32.xlu1 %v1224_v3 }
 0x4a5   : > { %v1227_v53 = vsel %vm1193_vm6, %v5114_v51, 0.0 }
 0x4a6   : > { %v1222_v5 = vmul.f32 1.442695, %v1213_v4  ;;  %1228 = vadd.xlane.f32.xlu0 %v1227_v53 }
 0x4a8   : > { %5119 = vpow2.f32 %v1222_v5 }
 0x4aa   : > { %v5116_v6 = vpop.eup %5115 }
 0x4ab   : > { %v1230_v61 = vsel %vm1193_vm6, %v5116_v6, 0.0 }
 0x4ac   : > { %v5118_v8 = vpop.eup %5117  ;;  %1231 = vadd.xlane.f32.xlu1 %v1230_v61 }
 0x4ad   : > { %v1233_v63 = vsel %vm1193_vm6, %v5118_v8, 0.0 }
 0x4ae   : > { %1234 = vadd.xlane.f32.xlu0 %v1233_v63 }
 0x4b2   : > { %v5120_v11 = vpop.eup %5119 }
 0x4b3   : > { %v1236_v15 = vsel %vm1193_vm6, %v5120_v11, 0.0 }
 0x4b4   : > { %1237 = vadd.xlane.f32.xlu1 %v1236_v15 }
 0x531   : > { %v1226_v17 = vpop.xlane.xlu1 %1225 }
 0x532   : > { %5121 = vrcp.f32 %v1226_v17 }
 0x533   : > { %v1229_v7 = vpop.xlane.xlu0 %1228 }
 0x534   : > { %5123 = vrcp.f32 %v1229_v7 }
 0x539   : > { %v1232_v21 = vpop.xlane.xlu1 %1231 }
 0x53a   : > { %5125 = vrcp.f32 %v1232_v21  ;;  %v1550_v21 = vpack.c.bf16 %v5731_v22, %v5731_v22 }
 0x53b   : > { %v1235_v23 = vpop.xlane.xlu0 %1234 }
 0x53c   : > { %v5122_v24 = vpop.eup %5121  ;;  %5127 = vrcp.f32 %v1235_v23 }
 0x53d   : > { %v1244_v27 = vmul.f32 %v5122_v24, %v5112_v0 }
 0x53e   : > { %v5124_v26 = vpop.eup %5123 }
 0x53f   : > { %v1245_v28 = vmul.f32 %v5124_v26, %v5114_v51 }
 0x541   : > { %v1249_v32 = vpack.c.bf16 %v1245_v28, %v1244_v27  ;;  %v1238_v33 = vpop.xlane.xlu1 %1237 }
 0x542   : > { %5129 = vrcp.f32 %v1238_v33 }
 0x543   : > { %4610 = vmatmul.mubr.msk.bf16.vlgmr.msra.gmra.mrb[28].mxu1 %vm1193_vm6, %v1249_v32 }
 0x544   : > { %v5126_v34 = vpop.eup %5125  ;;  %4638 = vmatpush3.bf16.msra.mxu1 %v5069_v30  ;;  %4613 = vmatprep.mubr.msk.bf16.mxu1 %vm5329_vm1, %v5328_v1 }
 0x545   : > { %4639 = vmatprep.subr.bf16.mxu1 %v5328_v1  ;;  %v1246_v37 = vmul.f32 %v5126_v34, %v5116_v6 }
 0x546   : > { %v5128_v36 = vpop.eup %5127 }
 0x547   : > { %v1247_v38 = vmul.f32 %v5128_v36, %v5118_v8 }
 0x548   : > { %4640 = vmatpush3.bf16.msra.mxu1 %v5070_v35 }
 0x549   : > { %v1250_v39 = vpack.c.bf16 %v1247_v38, %v1246_v37  ;;  %4669 = vmatprep.subr.bf16.mxu1 %v5328_v1 }
 0x54b   : > { %4614 = vmatmul.mubr.msk.bf16.gmra.mrb[32].mxu1 %vm1193_vm6, %v1250_v39 }
 0x54c   : > { %v5130_v40 = vpop.eup %5129  ;;  %4617 = vmatprep.mubr.msk.bf16.mxu1 %vm5329_vm1, %v5328_v1 }
 0x54d   : > { %v1248_v41 = vmul.f32 %v5130_v40, %v5120_v11 }
 0x54f   : > { %v1251_v42 = vpack.c.bf16 %v1248_v41, %v1248_v41 }
 0x553   : > { %4618 = vmatmul.mubr.msk.bf16.gmra.mrb[36].mxu1 %vm1193_vm6, %v1251_v42 }
 0x554   : > { %4641 = vmatprep.mubr.msk.bf16.mxu1 %vm5329_vm1, %v5328_v1 }
 0x55b   : > { %4642 = vmatmul.mubr.msk.bf16.vlgmr.msra.gmra.mrb[40].mxu1 %vm779_vm3, %v5588_v31 }
 0x55c   : > { %4645 = vmatprep.mubr.msk.bf16.mxu1 %vm5329_vm1, %v5328_v1 }
 0x563   : > { %4646 = vmatmul.mubr.msk.bf16.gmra.mrb[44].mxu1 %vm779_vm3, %v5606_v43 }
 0x564   : > { %4649 = vmatprep.mubr.msk.bf16.mxu1 %vm5329_vm1, %v5328_v1 }
 0x56b   : > { %4650 = vmatmul.mubr.msk.bf16.gmra.mrb[48].mxu1 %vm779_vm3, %v5617_v45 }
 0x56c   : > { %4675 = vmatprep.mubr.msk.bf16.mxu1 %vm5329_vm1, %v5328_v1 }
 0x616   : > { %v5773_v46 = vpop.f32.mrb[28].mxu1 }
 0x617   : > { %v4611_v47 = vpop.f32.mrb[29].mxu1 }
 0x618   : > { %v5775_v48 = vpop.f32.mrb[30].mxu1 }
 0x619   : > { %v1324_v31 = vpack.c.bf16 %v5775_v48, %v5773_v46  ;;  %v4612_v49 = vpop.f32.mrb[31].mxu1 }
 0x61e   : > { %v5779_v50 = vpop.f32.mrb[32].mxu1 }
 0x61f   : > { %v4615_v43 = vpop.f32.mrb[33].mxu1 }
 0x620   : > { %v5781_v52 = vpop.f32.mrb[34].mxu1 }
 0x621   : > { %v1325_v45 = vpack.c.bf16 %v5781_v52, %v5779_v50  ;;  %v4616_v54 = vpop.f32.mrb[35].mxu1 }
 0x626   : > { %v5785_v55 = vpop.f32.mrb[36].mxu1 }
 0x627   : > { %v4619_v56 = vpop.f32.mrb[37].mxu1 }
 0x628   : > { %v1321_v57 = vpop.f32.mrb[38].mxu1 }
 0x629   : > { %v4620_v58 = vpop.f32.mrb[39].mxu1 }
 0x62e   : > { %v1453_v59 = vpop.f32.mrb[40].mxu1 }
 0x62f   : > { %v4643_v60 = vpop.f32.mrb[41].mxu1 }
 0x630   : > { %v1456_v62 = vpop.f32.mrb[42].mxu1 }
 0x631   : > { %v1551_v0 = vpack.c.bf16 %v1456_v62, %v1453_v59  ;;  %v4644_v2 = vpop.f32.mrb[43].mxu1 }
 0x633   : > { %v1564_v3 = vsel %vm1102_vm4, %v1551_v0, 0 }
 0x634   : > { %4670 = vmatpush3.bf16.xpose.msra.mxu1 %v1564_v3 }
 0x635   : > { %4671 = vmatprep.subr.bf16.mxu1 %v5328_v1 }
 0x636   : > { %v1461_v51 = vpop.f32.mrb[44].mxu1 }
 0x637   : > { %v4647_v4 = vpop.f32.mrb[45].mxu1 }
 0x638   : > { %v1464_v53 = vpop.f32.mrb[46].mxu1 }
 0x639   : > { %v1552_v5 = vpack.c.bf16 %v1464_v53, %v1461_v51  ;;  %v4648_v6 = vpop.f32.mrb[47].mxu1 }
 0x63b   : > { %v1567_v61 = vsel %vm1102_vm4, %v1552_v5, 0 }
 0x63c   : > { %4672 = vmatpush3.bf16.xpose.msra.mxu1 %v1567_v61 }
 0x63d   : > { %4673 = vmatprep.subr.bf16.mxu1 %v5328_v1 }
 0x63e   : > { %v1469_v8 = vpop.f32.mrb[48].mxu1 }
 0x63f   : > { %v1553_v63 = vpack.c.bf16 %v1469_v8, %v1469_v8  ;;  %v4651_v11 = vpop.f32.mrb[49].mxu1 }
 0x640   : > { %v1472_v15 = vpop.f32.mrb[50].mxu1 }
 0x641   : > { %v4652_v17 = vpop.f32.mrb[51].mxu1  ;;  %v1570_v7 = vsel %vm1102_vm4, %v1553_v63, 0 }
 0x644   : > { %4674 = vmatpush3.bf16.xpose.msra.mxu1 %v1570_v7 }
 0x645   : > { %4705 = vmatprep.subr.bf16.mxu1 %v5328_v1 }
 0x64b   : > { %4676 = vmatmul.mubr.msk.bf16.vlgmr.msra.gmra.mrb[52].mxu1 %vm1102_vm4, %v1548_v13 }
 0x64c   : > { %4679 = vmatprep.mubr.msk.bf16.mxu1 %vm5329_vm1, %v5328_v1 }
 0x653   : > { %4680 = vmatmul.mubr.msk.bf16.gmra.mrb[56].mxu1 %vm1102_vm4, %v1549_v20 }
 0x654   : > { %4683 = vmatprep.mubr.msk.bf16.mxu1 %vm5329_vm1, %v5328_v1 }
 0x65b   : > { %4684 = vmatmul.mubr.msk.bf16.gmra.mrb[60].mxu1 %vm1102_vm4, %v1550_v21 }
 0x65c   : > { %4707 = vmatprep.mubr.msk.bf16.mxu1 %vm5329_vm1, %v5328_v1 }
 0x71e   : > { %v1606_v10 = vpop.f32.mrb[52].mxu1 }
 0x71f   : > { %v1628_v12 = vmul.f32 0.25, %v1606_v10  ;;  %v4677_v13 = vpop.f32.mrb[53].mxu1 }
 0x720   : > { %v1609_v23 = vpop.f32.mrb[54].mxu1 }
 0x721   : > { %v1629_v24 = vmul.f32 0.25, %v1609_v23  ;;  %v4678_v26 = vpop.f32.mrb[55].mxu1  ;;  %v1633_v16 = vadd.f32 %v5701_v44, %v1628_v12  ;;  %v5072_v12 = vld [vmem:[%s6626_s7 + $0x8] sm:$0xff]  }
 0x722   : > { %4706 = vmatpush3.bf16.msra.mxu1 %v5072_v12 }
 0x723   : > { %v1638_v18 = vsel %vm1193_vm6, %v1633_v16, -inf  ;;  %v1634_v20 = vadd.f32 %v5701_v44, %v1629_v24  ;;  %4733 = vmatprep.subr.bf16.mxu1 %v5328_v1 }
 0x724   : > { %1639 = vmax.xlane.f32.xlu0 %v1638_v18 }
 0x725   : > { %v1641_v22 = vsel %vm1193_vm6, %v1634_v20, -inf }
 0x726   : > { %1642 = vmax.xlane.f32.xlu1 %v1641_v22  ;;  %v1614_v27 = vpop.f32.mrb[56].mxu1 }
 0x727   : > { %v1630_v28 = vmul.f32 0.25, %v1614_v27  ;;  %v4681_v30 = vpop.f32.mrb[57].mxu1  ;;  %v5071_v27 = vld [vmem:[%s6626_s7] sm:$0xff]  }
 0x728   : > { %v1617_v32 = vpop.f32.mrb[58].mxu1 }
 0x729   : > { %v1631_v33 = vmul.f32 0.25, %v1617_v32  ;;  %v4682_v34 = vpop.f32.mrb[59].mxu1  ;;  %v1635_v35 = vadd.f32 %v5701_v44, %v1630_v28 }
 0x72b   : > { %v1644_v36 = vsel %vm1193_vm6, %v1635_v35, -inf  ;;  %v1636_v37 = vadd.f32 %v5701_v44, %v1631_v33 }
 0x72c   : > { %1645 = vmax.xlane.f32.xlu0 %v1644_v36 }
 0x72d   : > { %v1647_v38 = vsel %vm1193_vm6, %v1636_v37, -inf }
 0x72e   : > { %1648 = vmax.xlane.f32.xlu1 %v1647_v38  ;;  %v1622_v39 = vpop.f32.mrb[60].mxu1 }
 0x72f   : > { %v1632_v40 = vmul.f32 0.25, %v1622_v39  ;;  %v4685_v41 = vpop.f32.mrb[61].mxu1 }
 0x730   : > { %v1625_v42 = vpop.f32.mrb[62].mxu1 }
 0x731   : > { %v4686_v47 = vpop.f32.mrb[63].mxu1  ;;  %v1637_v49 = vadd.f32 %v5701_v44, %v1632_v40  ;;  %v1326_v40 = vpack.c.bf16 %v5785_v55, %v5785_v55 }
 0x733   : > { %v1650_v43 = vsel %vm1193_vm6, %v1637_v49, -inf }
 0x734   : > { %1651 = vmax.xlane.f32.xlu0 %v1650_v43 }
 0x7b1   : > { %v1640_v54 = vpop.xlane.xlu0 %1639 }
 0x7b2   : > { %v1653_v56 = vsub.f32 %v1633_v16, %v1640_v54 }
 0x7b3   : > { %v1643_v57 = vpop.xlane.xlu1 %1642 }
 0x7b4   : > { %v1658_v58 = vmul.f32 1.442695, %v1653_v56  ;;  %v1654_v59 = vsub.f32 %v1634_v20, %v1643_v57 }
 0x7b6   : > { %5131 = vpow2.f32 %v1658_v58  ;;  %v1660_v60 = vmul.f32 1.442695, %v1654_v59 }
 0x7b8   : > { %5133 = vpow2.f32 %v1660_v60 }
 0x7b9   : > { %v1646_v62 = vpop.xlane.xlu0 %1645 }
 0x7ba   : > { %v1655_v0 = vsub.f32 %v1635_v35, %v1646_v62 }
 0x7bb   : > { %v1649_v2 = vpop.xlane.xlu1 %1648 }
 0x7bc   : > { %v1662_v3 = vmul.f32 1.442695, %v1655_v0  ;;  %v1656_v51 = vsub.f32 %v1636_v37, %v1649_v2 }
 0x7be   : > { %5135 = vpow2.f32 %v1662_v3  ;;  %v1664_v4 = vmul.f32 1.442695, %v1656_v51 }
 0x7c0   : > { %v5132_v53 = vpop.eup %5131  ;;  %5137 = vpow2.f32 %v1664_v4 }
 0x7c1   : > { %v1652_v44 = vpop.xlane.xlu0 %1651  ;;  %v1668_v5 = vsel %vm1193_vm6, %v5132_v53, 0.0 }
 0x7c2   : > { %v5134_v6 = vpop.eup %5133  ;;  %v1657_v61 = vsub.f32 %v1637_v49, %v1652_v44  ;;  %1669 = vadd.xlane.f32.xlu1 %v1668_v5 }
 0x7c3   : > { %v1671_v8 = vsel %vm1193_vm6, %v5134_v6, 0.0 }
 0x7c4   : > { %v1666_v63 = vmul.f32 1.442695, %v1657_v61  ;;  %1672 = vadd.xlane.f32.xlu0 %v1671_v8 }
 0x7c6   : > { %5139 = vpow2.f32 %v1666_v63  ;;  %v4229_v63 = vld [vmem:[%s6574_s8] ss:$0 sm:$0xff] }
 0x7c8   : > { %v5136_v11 = vpop.eup %5135 }
 0x7c9   : > { %v1674_v15 = vsel %vm1193_vm6, %v5136_v11, 0.0 }
 0x7ca   : > { %v5138_v17 = vpop.eup %5137  ;;  %1675 = vadd.xlane.f32.xlu1 %v1674_v15 }
 0x7cb   : > { %v1677_v7 = vsel %vm1193_vm6, %v5138_v17, 0.0 }
 0x7cc   : > { %1678 = vadd.xlane.f32.xlu0 %v1677_v7 }
 0x7d0   : > { %v5140_v21 = vpop.eup %5139 }
 0x7d1   : > { %v1680_v10 = vsel %vm1193_vm6, %v5140_v21, 0.0 }
 0x7d2   : > { %1681 = vadd.xlane.f32.xlu1 %v1680_v10 }
 0x84f   : > { %v1670_v13 = vpop.xlane.xlu1 %1669 }
 0x850   : > { %5141 = vrcp.f32 %v1670_v13 }
 0x851   : > { %v1673_v23 = vpop.xlane.xlu0 %1672 }
 0x852   : > { %5143 = vrcp.f32 %v1673_v23 }
 0x857   : > { %v1676_v24 = vpop.xlane.xlu1 %1675 }
 0x858   : > { %5145 = vrcp.f32 %v1676_v24 }
 0x859   : > { %v1679_v26 = vpop.xlane.xlu0 %1678 }
 0x85a   : > { %v5142_v16 = vpop.eup %5141  ;;  %5147 = vrcp.f32 %v1679_v26 }
 0x85b   : > { %v1688_v20 = vmul.f32 %v5142_v16, %v5132_v53 }
 0x85c   : > { %v5144_v18 = vpop.eup %5143 }
 0x85d   : > { %v1689_v22 = vmul.f32 %v5144_v18, %v5134_v6 }
 0x85f   : > { %v1693_v28 = vpack.c.bf16 %v1689_v22, %v1688_v20  ;;  %v1682_v30 = vpop.xlane.xlu1 %1681 }
 0x860   : > { %5149 = vrcp.f32 %v1682_v30 }
 0x861   : > { %4694 = vmatmul.mubr.msk.bf16.vlgmr.msra.gmra.mrb[56].mxu0 %vm1193_vm6, %v1693_v28 }
 0x862   : > { %v5146_v32 = vpop.eup %5145  ;;  %4697 = vmatprep.mubr.msk.bf16.mxu0 %vm5329_vm1, %v5328_v1  ;;  %4720 = vmatpush3.bf16.msra.mxu0 %v5071_v27 }
 0x863   : > { %4749 = vmatprep.subr.bf16.mxu0 %v5328_v1  ;;  %v1690_v34 = vmul.f32 %v5146_v32, %v5136_v11 }
 0x864   : > { %v5148_v33 = vpop.eup %5147 }
 0x865   : > { %v1691_v35 = vmul.f32 %v5148_v33, %v5138_v17 }
 0x867   : > { %v1694_v36 = vpack.c.bf16 %v1691_v35, %v1690_v34 }
 0x869   : > { %4698 = vmatmul.mubr.msk.bf16.gmra.mrb[60].mxu0 %vm1193_vm6, %v1694_v36 }
 0x86a   : > { %v5150_v37 = vpop.eup %5149  ;;  %4701 = vmatprep.mubr.msk.bf16.mxu0 %vm5329_vm1, %v5328_v1 }
 0x86b   : > { %v1692_v38 = vmul.f32 %v5150_v37, %v5140_v21 }
 0x86d   : > { %v1695_v39 = vpack.c.bf16 %v1692_v38, %v1692_v38 }
 0x871   : > { %4702 = vmatmul.mubr.msk.bf16.gmra.mrb[64].mxu0 %vm1193_vm6, %v1695_v39 }
 0x872   : > { %4721 = vmatprep.mubr.msk.bf16.mxu0 %vm5329_vm1, %v5328_v1 }
 0x879   : > { %4722 = vmatmul.mubr.msk.bf16.vlgmr.msra.gmra.mrb[68].mxu0 %vm1102_vm4, %v1324_v31 }
 0x87a   : > { %4725 = vmatprep.mubr.msk.bf16.mxu0 %vm5329_vm1, %v5328_v1 }
 0x881   : > { %4726 = vmatmul.mubr.msk.bf16.gmra.mrb[72].mxu0 %vm1102_vm4, %v1325_v45 }
 0x882   : > { %4729 = vmatprep.mubr.msk.bf16.mxu0 %vm5329_vm1, %v5328_v1 }
 0x889   : > { %4730 = vmatmul.mubr.msk.bf16.gmra.mrb[76].mxu0 %vm1102_vm4, %v1326_v40 }
 0x88a   : > { %4757 = vmatprep.mubr.msk.bf16.mxu0 %vm5329_vm1, %v5328_v1 }
 0x934   : > { %v1745_v46 = vpop.f32.mrb[56].mxu0 }
 0x935   : > { %v4695_v48 = vpop.f32.mrb[57].mxu0 }
 0x936   : > { %v1748_v31 = vpop.f32.mrb[58].mxu0 }
 0x937   : > { %v1767_v41 = vpack.c.bf16 %v1748_v31, %v1745_v46  ;;  %v4696_v42 = vpop.f32.mrb[59].mxu0 }
 0x939   : > { %4708 = vmatmul.mubr.msk.bf16.vlgmr.msra.gmra.mrb[64].mxu1 %vm1102_vm4, %v1767_v41 }
 0x93a   : > { %4711 = vmatprep.mubr.msk.bf16.mxu1 %vm5329_vm1, %v5328_v1 }
 0x93c   : > { %v1753_v50 = vpop.f32.mrb[60].mxu0 }
 0x93d   : > { %v4699_v52 = vpop.f32.mrb[61].mxu0 }
 0x93e   : > { %v1756_v45 = vpop.f32.mrb[62].mxu0 }
 0x93f   : > { %v1768_v47 = vpack.c.bf16 %v1756_v45, %v1753_v50  ;;  %v4700_v55 = vpop.f32.mrb[63].mxu0 }
 0x941   : > { %4712 = vmatmul.mubr.msk.bf16.gmra.mrb[68].mxu1 %vm1102_vm4, %v1768_v47 }
 0x942   : > { %4715 = vmatprep.mubr.msk.bf16.mxu1 %vm5329_vm1, %v5328_v1 }
 0x944   : > { %v1761_v49 = vpop.f32.mrb[64].mxu0 }
 0x945   : > { %v4703_v43 = vpop.f32.mrb[65].mxu0  ;;  %v1769_v56 = vpack.c.bf16 %v1761_v49, %v1761_v49 }
 0x946   : > { %v1764_v54 = vpop.f32.mrb[66].mxu0 }
 0x947   : > { %v4704_v57 = vpop.f32.mrb[67].mxu0 }
 0x949   : > { %4716 = vmatmul.mubr.msk.bf16.gmra.mrb[72].mxu1 %vm1102_vm4, %v1769_v56 }
 0x94a   : > { %4737 = vmatprep.mubr.msk.bf16.mxu1 %vm5329_vm1, %v5328_v1 }
 0x94c   : > { %v1893_v58 = vpop.f32.mrb[68].mxu0 }
 0x94d   : > { %v4723_v59 = vpop.f32.mrb[69].mxu0 }
 0x94e   : > { %v1896_v60 = vpop.f32.mrb[70].mxu0 }
 0x94f   : > { %v4724_v62 = vpop.f32.mrb[71].mxu0 }
 0x954   : > { %v1901_v0 = vpop.f32.mrb[72].mxu0 }
 0x955   : > { %v4727_v2 = vpop.f32.mrb[73].mxu0 }
 0x956   : > { %v1904_v3 = vpop.f32.mrb[74].mxu0 }
 0x957   : > { %v4728_v51 = vpop.f32.mrb[75].mxu0 }
 0x958   : > { %v5073_v51 = vld [vmem:[%s6579_s13] sm:$0xff]  }
 0x959   : > { %4734 = vmatpush3.bf16.msra.mxu1 %v5073_v51 }
 0x95a   : > { %4735 = vmatprep.subr.bf16.mxu1 %v5328_v1 }
 0x95c   : > { %v1909_v4 = vpop.f32.mrb[76].mxu0 }
 0x95d   : > { %v4731_v53 = vpop.f32.mrb[77].mxu0 }
 0x95e   : > { %v1912_v44 = vpop.f32.mrb[78].mxu0 }
 0x95f   : > { %v4732_v5 = vpop.f32.mrb[79].mxu0 }
 0xa0c   : > { %v1822_v6 = vpop.f32.mrb[64].mxu1 }
 0xa0d   : > { %v1894_v61 = vadd.f32 %v1893_v58, %v1822_v6  ;;  %v4709_v8 = vpop.f32.mrb[65].mxu1 }
 0xa0e   : > { %v1825_v11 = vpop.f32.mrb[66].mxu1 }
 0xa0f   : > { %v1915_v15 = vadd.f32 %v1894_v61, %v5523_v9  ;;  %v1897_v17 = vadd.f32 %v1896_v60, %v1825_v11  ;;  %v4710_v7 = vpop.f32.mrb[67].mxu1 }
 0xa11   : > { %v5872_v21 = vadd.f32 %v4229_v63, %v1915_v15  ;;  %v1916_v10 = vadd.f32 %v1897_v17, %v5528_v14 }
 0xa13   : > { %v5875_v12 = vadd.f32 %v4229_v63, %v1916_v10  ;;  %v1934_v13 = vsel %vm779_vm3, %v5872_v21, 0.0 }
 0xa14   : > { %v1830_v23 = vpop.f32.mrb[68].mxu1  ;;  %1935 = vadd.xlane.f32.xlu0 %v1934_v13 }
 0xa15   : > { %v1902_v24 = vadd.f32 %v1901_v0, %v1830_v23  ;;  %v4713_v26 = vpop.f32.mrb[69].mxu1  ;;  %v1937_v16 = vsel %vm779_vm3, %v5875_v12, 0.0  ;;  %v4230_v23 = vld [vmem:[%s6577_s11] ss:$0 sm:$0xff] }
 0xa16   : > { %v1833_v18 = vpop.f32.mrb[70].mxu1  ;;  %1938 = vadd.xlane.f32.xlu1 %v1937_v16 }
 0xa17   : > { %v1917_v9 = vadd.f32 %v1902_v24, %v5542_v25  ;;  %v1905_v20 = vadd.f32 %v1904_v3, %v1833_v18  ;;  %v4714_v22 = vpop.f32.mrb[71].mxu1 }
 0xa18   : > { %v4231_v22 = vld [vmem:[%s6578_s12] ss:$0 sm:$0xff] }
 0xa19   : > { %v5882_v27 = vadd.f32 %v4229_v63, %v1917_v9  ;;  %v1918_v14 = vadd.f32 %v1905_v20, %v5546_v29 }
 0xa1b   : > { %v5885_v28 = vadd.f32 %v4229_v63, %v1918_v14  ;;  %v1940_v30 = vsel %vm779_vm3, %v5882_v27, 0.0 }
 0xa1c   : > { %v1838_v32 = vpop.f32.mrb[72].mxu1  ;;  %1941 = vadd.xlane.f32.xlu0 %v1940_v30 }
 0xa1d   : > { %v1910_v33 = vadd.f32 %v1909_v4, %v1838_v32  ;;  %v4717_v34 = vpop.f32.mrb[73].mxu1  ;;  %v1943_v35 = vsel %vm779_vm3, %v5885_v28, 0.0  ;;  %v5074_v4 = vld [vmem:[%s6579_s13 + $0x8] sm:$0xff]  }
 0xa1e   : > { %v1841_v36 = vpop.f32.mrb[74].mxu1  ;;  %1944 = vadd.xlane.f32.xlu1 %v1943_v35  ;;  %4736 = vmatpush3.bf16.msra.mxu1 %v5074_v4 }
 0xa1f   : > { %v1919_v25 = vadd.f32 %v1910_v33, %v5532_v19  ;;  %v4718_v37 = vpop.f32.mrb[75].mxu1  ;;  %4769 = vmatprep.subr.bf16.mxu1 %v5328_v1 }
 0xa21   : > { %v5892_v38 = vadd.f32 %v4229_v63, %v1919_v25 }
 0xa23   : > { %v1946_v29 = vsel %vm779_vm3, %v5892_v38, 0.0 }
 0xa24   : > { %1947 = vadd.xlane.f32.xlu0 %v1946_v29 }
 0xaa1   : > { %v1936_v39 = vpop.xlane.xlu0 %1935 }
 0xaa2   : > { %v1949_v40 = vmul.f32 0.03125, %v1936_v39 }
 0xaa3   : > { %v1939_v46 = vpop.xlane.xlu1 %1938 }
 0xaa4   : > { %v1954_v48 = vsub.f32 %v5872_v21, %v1949_v40  ;;  %v1950_v31 = vmul.f32 0.03125, %v1939_v46 }
 0xaa6   : > { %v1955_v41 = vsub.f32 %v5875_v12, %v1950_v31  ;;  %v1959_v42 = vmul.f32 %v1954_v48, %v1954_v48 }
 0xaa8   : > { %v1964_v50 = vsel %vm779_vm3, %v1959_v42, 0.0  ;;  %v1960_v52 = vmul.f32 %v1955_v41, %v1955_v41 }
 0xaa9   : > { %v1942_v19 = vpop.xlane.xlu0 %1941  ;;  %1965 = vadd.xlane.f32.xlu1 %v1964_v50 }
 0xaaa   : > { %v1951_v45 = vmul.f32 0.03125, %v1942_v19  ;;  %v1967_v47 = vsel %vm779_vm3, %v1960_v52, 0.0  ;;  %v5075_v19 = vld [vmem:[%s6581_s15] sm:$0xff]  }
 0xaab   : > { %v1945_v55 = vpop.xlane.xlu1 %1944  ;;  %1968 = vadd.xlane.f32.xlu0 %v1967_v47  ;;  %4750 = vmatpush3.bf16.msra.mxu0 %v5075_v19  ;;  %v5077_v47 = vld [vmem:[%s6581_s15 + $0x10] sm:$0xff]  }
 0xaac   : > { %v1956_v49 = vsub.f32 %v5882_v27, %v1951_v45  ;;  %v1952_v43 = vmul.f32 0.03125, %v1945_v55  ;;  %4751 = vmatprep.subr.bf16.mxu0 %v5328_v1  ;;  %v5076_v45 = vld [vmem:[%s6581_s15 + $0x8] sm:$0xff]   ;;  %v5078_v55 = vld [vmem:[%s6581_s15 + $0x18] sm:$0xff]  }
 0xaae   : > { %v1957_v54 = vsub.f32 %v5885_v28, %v1952_v43  ;;  %v1961_v56 = vmul.f32 %v1956_v49, %v1956_v49 }
 0xaaf   : > { %4752 = vmatpush3.bf16.msra.mxu0 %v5076_v45 }
 0xab0   : > { %v1970_v57 = vsel %vm779_vm3, %v1961_v56, 0.0  ;;  %v1962_v58 = vmul.f32 %v1957_v54, %v1957_v54  ;;  %4753 = vmatprep.subr.bf16.mxu0 %v5328_v1 }
 0xab1   : > { %1971 = vadd.xlane.f32.xlu1 %v1970_v57  ;;  %v1948_v59 = vpop.xlane.xlu0 %1947 }
 0xab2   : > { %v1953_v60 = vmul.f32 0.03125, %v1948_v59  ;;  %v1973_v62 = vsel %vm779_vm3, %v1962_v58, 0.0 }
 0xab3   : > { %1974 = vadd.xlane.f32.xlu0 %v1973_v62  ;;  %4754 = vmatpush3.bf16.msra.mxu0 %v5077_v47 }
 0xab4   : > { %v1958_v0 = vsub.f32 %v5892_v38, %v1953_v60  ;;  %4755 = vmatprep.subr.bf16.mxu0 %v5328_v1 }
 0xab6   : > { %v1963_v2 = vmul.f32 %v1958_v0, %v1958_v0 }
 0xab7   : > { %4756 = vmatpush3.bf16.msra.mxu0 %v5078_v55 }
 0xab8   : > { %v1976_v3 = vsel %vm779_vm3, %v1963_v2, 0.0  ;;  %4785 = vmatprep.subr.bf16.mxu0 %v5328_v1 }
 0xab9   : > { %1977 = vadd.xlane.f32.xlu1 %v1976_v3 }
 0xb36   : > { %v1966_v53 = vpop.xlane.xlu1 %1965 }
 0xb37   : > { %v1979_v44 = vmul.f32 0.03125, %v1966_v53 }
 0xb38   : > { %v1969_v5 = vpop.xlane.xlu0 %1968 }
 0xb39   : > { %v1984_v6 = vadd.f32 1e-05, %v1979_v44  ;;  %v1980_v61 = vmul.f32 0.03125, %v1969_v5 }
 0xb3b   : > { %5151 = vrsqrt.f32 %v1984_v6  ;;  %v1985_v8 = vadd.f32 1e-05, %v1980_v61 }
 0xb3d   : > { %5153 = vrsqrt.f32 %v1985_v8 }
 0xb3e   : > { %v1972_v63 = vpop.xlane.xlu1 %1971 }
 0xb3f   : > { %v1981_v11 = vmul.f32 0.03125, %v1972_v63 }
 0xb40   : > { %v1975_v15 = vpop.xlane.xlu0 %1974 }
 0xb41   : > { %v1986_v17 = vadd.f32 1e-05, %v1981_v11  ;;  %v1982_v7 = vmul.f32 0.03125, %v1975_v15 }
 0xb43   : > { %5155 = vrsqrt.f32 %v1986_v17  ;;  %v1987_v10 = vadd.f32 1e-05, %v1982_v7 }
 0xb45   : > { %v5152_v13 = vpop.eup %5151  ;;  %5157 = vrsqrt.f32 %v1987_v10 }
 0xb46   : > { %v1994_v24 = vmul.f32 %v5152_v13, %v1954_v48  ;;  %v1978_v26 = vpop.xlane.xlu1 %1977 }
 0xb47   : > { %v5154_v16 = vpop.eup %5153  ;;  %v1983_v18 = vmul.f32 0.03125, %v1978_v26 }
 0xb48   : > { %v2005_v9 = vmul.f32 %v4230_v23, %v1994_v24  ;;  %v1995_v20 = vmul.f32 %v5154_v16, %v1955_v41 }
 0xb49   : > { %v1988_v14 = vadd.f32 1e-05, %v1983_v18 }
 0xb4a   : > { %v2006_v30 = vmul.f32 %v4230_v23, %v1995_v20  ;;  %v2016_v32 = vadd.f32 %v4231_v22, %v2005_v9 }
 0xb4b   : > { %5159 = vrsqrt.f32 %v1988_v14 }
 0xb4c   : > { %v2017_v33 = vadd.f32 %v4231_v22, %v2006_v30 }
 0xb4d   : > { %v5156_v34 = vpop.eup %5155 }
 0xb4e   : > { %v1996_v35 = vmul.f32 %v5156_v34, %v1956_v49  ;;  %v2021_v36 = vpack.c.bf16 %v2017_v33, %v2016_v32  ;;  %v4232_v49 = vld [vmem:[%s6580_s14] ss:$0 sm:$0xff] }
 0xb4f   : > { %v5158_v25 = vpop.eup %5157 }
 0xb50   : > { %v1997_v37 = vmul.f32 %v5158_v25, %v1957_v54  ;;  %4738 = vmatmul.mubr.msk.bf16.vlgmr.msra.gmra.mrb[76].mxu1 %vm779_vm3, %v2021_v36  ;;  %v2007_v29 = vmul.f32 %v4230_v23, %v1996_v35 }
 0xb51   : > { %4741 = vmatprep.mubr.msk.bf16.mxu1 %vm5329_vm1, %v5328_v1 }
 0xb52   : > { %v2008_v39 = vmul.f32 %v4230_v23, %v1997_v37  ;;  %v2018_v40 = vadd.f32 %v4231_v22, %v2007_v29 }
 0xb54   : > { %v2019_v46 = vadd.f32 %v4231_v22, %v2008_v39 }
 0xb55   : > { %v5160_v48 = vpop.eup %5159 }
 0xb56   : > { %v2022_v31 = vpack.c.bf16 %v2019_v46, %v2018_v40  ;;  %v1998_v41 = vmul.f32 %v5160_v48, %v1958_v0 }
 0xb58   : > { %4742 = vmatmul.mubr.msk.bf16.gmra.mrb[80].mxu1 %vm779_vm3, %v2022_v31  ;;  %v2009_v42 = vmul.f32 %v4230_v23, %v1998_v41 }
 0xb59   : > { %4745 = vmatprep.mubr.msk.bf16.mxu1 %vm5329_vm1, %v5328_v1 }
 0xb5a   : > { %v2020_v50 = vadd.f32 %v4231_v22, %v2009_v42 }
 0xb5c   : > { %v2023_v52 = vpack.c.bf16 %v2020_v50, %v2020_v50 }
 0xb60   : > { %4746 = vmatmul.mubr.msk.bf16.gmra.mrb[84].mxu1 %vm779_vm3, %v2023_v52 }
 0xb61   : > { %4773 = vmatprep.mubr.msk.bf16.mxu1 %vm5329_vm1, %v5328_v1 }
 0xc23   : > { %v2090_v43 = vpop.f32.mrb[76].mxu1 }
 0xc24   : > { %v5948_v54 = vadd.f32 %v4232_v49, %v2090_v43  ;;  %v4739_v56 = vpop.f32.mrb[77].mxu1 }
 0xc25   : > { %v2093_v57 = vpop.f32.mrb[78].mxu1 }
 0xc26   : > { %v5951_v58 = vmul.f32 0.70710677, %v5948_v54  ;;  %v5953_v59 = vadd.f32 %v4232_v49, %v2093_v57  ;;  %v4740_v60 = vpop.f32.mrb[79].mxu1 }
 0xc28   : > { %v2122_v62 = vand.u32 2147483647, %v5951_v58  ;;  %v5957_v0 = vmul.f32 0.70710677, %v5953_v59  ;;  %vm2222_vm7 = vcmp.ge.f32.partialorder %v5951_v58, 0.0  ;;  %v2113_v58 = vmul.f32 0.5, %v5953_v59 }
 0xc2a   : > { %v2127_v2 = vmul.f32 0.3275911, %v2122_v62  ;;  %v2123_v3 = vand.u32 2147483647, %v5957_v0  ;;  %v2192_v13 = vsub.f32 0.0, %v2122_v62  ;;  %vm2223_vm8 = vcmp.ge.f32.partialorder %v5957_v0, 0.0 }
 0xc2b   : > { %v2098_v51 = vpop.f32.mrb[80].mxu1 }
 0xc2c   : > { %v2132_v4 = vadd.f32 1.0, %v2127_v2  ;;  %v2128_v53 = vmul.f32 0.3275911, %v2123_v3  ;;  %v4743_v44 = vpop.f32.mrb[81].mxu1  ;;  %v5960_v5 = vadd.f32 %v4232_v49, %v2098_v51  ;;  %v2193_v22 = vsub.f32 0.0, %v2123_v3 }
 0xc2d   : > { %v2101_v6 = vpop.f32.mrb[82].mxu1  ;;  %v2197_v32 = vmul.f32 %v2192_v13, %v2122_v62 }
 0xc2e   : > { %5161 = vrcp.f32 %v2132_v4  ;;  %v2133_v61 = vadd.f32 1.0, %v2128_v53  ;;  %v4744_v8 = vpop.f32.mrb[83].mxu1  ;;  %v5963_v63 = vmul.f32 0.70710677, %v5960_v5  ;;  %v5965_v11 = vadd.f32 %v4232_v49, %v2101_v6 }
 0xc2f   : > { %v2198_v29 = vmul.f32 %v2193_v22, %v2123_v3  ;;  %v2202_v39 = vmul.f32 1.442695, %v2197_v32 }
 0xc30   : > { %5163 = vrcp.f32 %v2133_v61  ;;  %v2124_v15 = vand.u32 2147483647, %v5963_v63  ;;  %v5969_v17 = vmul.f32 0.70710677, %v5965_v11  ;;  %vm2224_vm10 = vcmp.ge.f32.partialorder %v5963_v63, 0.0 }
 0xc31   : > { %v2204_v50 = vmul.f32 1.442695, %v2198_v29  ;;  %v2115_v63 = vmul.f32 0.5, %v5965_v11 }
 0xc32   : > { %v2129_v7 = vmul.f32 0.3275911, %v2124_v15  ;;  %v2125_v23 = vand.u32 2147483647, %v5969_v17  ;;  %v2194_v31 = vsub.f32 0.0, %v2124_v15  ;;  %vm2225_vm11 = vcmp.ge.f32.partialorder %v5969_v17, 0.0 }
 0xc33   : > { %v2106_v10 = vpop.f32.mrb[84].mxu1 }
 0xc34   : > { %v5972_v24 = vadd.f32 %v4232_v49, %v2106_v10  ;;  %v4747_v26 = vpop.f32.mrb[85].mxu1  ;;  %v2134_v16 = vadd.f32 1.0, %v2129_v7  ;;  %v2130_v9 = vmul.f32 0.3275911, %v2125_v23  ;;  %v2195_v19 = vsub.f32 0.0, %v2125_v23 }
 0xc35   : > { %v2109_v18 = vpop.f32.mrb[86].mxu1  ;;  %v2199_v55 = vmul.f32 %v2194_v31, %v2124_v15 }
 0xc36   : > { %v5975_v20 = vmul.f32 0.70710677, %v5972_v24  ;;  %5165 = vrcp.f32 %v2134_v16  ;;  %v4748_v14 = vpop.f32.mrb[87].mxu1  ;;  %v2135_v33 = vadd.f32 1.0, %v2130_v9  ;;  %v2200_v2 = vmul.f32 %v2195_v19, %v2125_v23 }
 0xc37   : > { %v2206_v4 = vmul.f32 1.442695, %v2199_v55  ;;  %v2116_v17 = vmul.f32 0.5, %v5972_v24 }
 0xc38   : > { %v5162_v30 = vpop.eup %5161  ;;  %v2126_v34 = vand.u32 2147483647, %v5975_v20  ;;  %5167 = vrcp.f32 %v2135_v33  ;;  %v2208_v15 = vmul.f32 1.442695, %v2200_v2  ;;  %v2112_v2 = vmul.f32 0.5, %v5948_v54 }
 0xc39   : > { %v2147_v35 = vmul.f32 1.0614054, %v5162_v30  ;;  %vm2226_vm12 = vcmp.ge.f32.partialorder %v5975_v20, 0.0  ;;  %v4245_v20 = vld [vmem:[%s6582_s16] ss:$0 sm:$0xff] }
 0xc3a   : > { %v2131_v36 = vmul.f32 0.3275911, %v2126_v34  ;;  %v5164_v25 = vpop.eup %5163  ;;  %v2196_v3 = vsub.f32 0.0, %v2126_v34 }
 0xc3b   : > { %v2152_v37 = vadd.f32 -1.4531521, %v2147_v35  ;;  %v2148_v40 = vmul.f32 1.0614054, %v5164_v25 }
 0xc3c   : > { %v2136_v46 = vadd.f32 1.0, %v2131_v36  ;;  %v2201_v26 = vmul.f32 %v2196_v3, %v2126_v34 }
 0xc3d   : > { %v2157_v48 = vmul.f32 %v5162_v30, %v2152_v37  ;;  %v2153_v41 = vadd.f32 -1.4531521, %v2148_v40 }
 0xc3e   : > { %5169 = vrcp.f32 %v2136_v46  ;;  %v2210_v29 = vmul.f32 1.442695, %v2201_v26 }
 0xc3f   : > { %v2162_v42 = vadd.f32 1.4214138, %v2157_v48  ;;  %5171 = vpow2.f32 %v2202_v39  ;;  %v2158_v52 = vmul.f32 %v5164_v25, %v2153_v41 }
 0xc40   : > { %v5166_v45 = vpop.eup %5165  ;;  %5173 = vpow2.f32 %v2204_v50 }
 0xc41   : > { %v2167_v47 = vmul.f32 %v5162_v30, %v2162_v42  ;;  %v2163_v49 = vadd.f32 1.4214138, %v2158_v52  ;;  %v2149_v43 = vmul.f32 1.0614054, %v5166_v45  ;;  %5175 = vpow2.f32 %v2206_v4 }
 0xc42   : > { %v5168_v57 = vpop.eup %5167  ;;  %5177 = vpow2.f32 %v2208_v15 }
 0xc43   : > { %v2172_v56 = vadd.f32 -0.28449672, %v2167_v47  ;;  %v2168_v60 = vmul.f32 %v5164_v25, %v2163_v49  ;;  %v2154_v62 = vadd.f32 -1.4531521, %v2149_v43  ;;  %v2150_v53 = vmul.f32 1.0614054, %v5168_v57 }
 0xc44   : > { %5179 = vpow2.f32 %v2210_v29 }
 0xc45   : > { %v2177_v51 = vmul.f32 %v5162_v30, %v2172_v56  ;;  %v2173_v44 = vadd.f32 -0.28449672, %v2168_v60  ;;  %v2159_v6 = vmul.f32 %v5166_v45, %v2154_v62  ;;  %v2155_v8 = vadd.f32 -1.4531521, %v2150_v53 }
 0xc47   : > { %v2182_v61 = vadd.f32 0.2548296, %v2177_v51  ;;  %v2178_v10 = vmul.f32 %v5164_v25, %v2173_v44  ;;  %v2164_v13 = vadd.f32 1.4214138, %v2159_v6  ;;  %v2160_v18 = vmul.f32 %v5168_v57, %v2155_v8 }
 0xc48   : > { %v5170_v7 = vpop.eup %5169 }
 0xc49   : > { %v2187_v16 = vmul.f32 %v5162_v30, %v2182_v61  ;;  %v2151_v9 = vmul.f32 1.0614054, %v5170_v7  ;;  %v5172_v22 = vpop.eup %5171  ;;  %v2183_v14 = vadd.f32 0.2548296, %v2178_v10  ;;  %v2169_v23 = vmul.f32 %v5166_v45, %v2164_v13 }
 0xc4a   : > { %v2165_v33 = vadd.f32 1.4214138, %v2160_v18  ;;  %v5174_v39 = vpop.eup %5173 }
 0xc4b   : > { %v2212_v32 = vmul.f32 %v5172_v22, %v2187_v16  ;;  %v2156_v35 = vadd.f32 -1.4531521, %v2151_v9  ;;  %v2188_v36 = vmul.f32 %v5164_v25, %v2183_v14  ;;  %v2174_v37 = vadd.f32 -0.28449672, %v2169_v23  ;;  %v5176_v43 = vpop.eup %5175 }
 0xc4c   : > { %v2170_v46 = vmul.f32 %v5168_v57, %v2165_v33  ;;  %v5178_v6 = vpop.eup %5177  ;;  %v2114_v23 = vmul.f32 0.5, %v5960_v5 }
 0xc4d   : > { %v2217_v40 = vsub.f32 1.0, %v2212_v32  ;;  %v2161_v48 = vmul.f32 %v5170_v7, %v2156_v35  ;;  %v2213_v31 = vmul.f32 %v5174_v39, %v2188_v36  ;;  %v2179_v34 = vmul.f32 %v5166_v45, %v2174_v37 }
 0xc4e   : > { %v2175_v41 = vadd.f32 -0.28449672, %v2170_v46  ;;  %v5180_v16 = vpop.eup %5179 }
 0xc4f   : > { %v2227_v30 = vsub.f32 0.0, %v2217_v40  ;;  %v2166_v42 = vadd.f32 1.4214138, %v2161_v48  ;;  %v2218_v50 = vsub.f32 1.0, %v2213_v31  ;;  %v2184_v52 = vadd.f32 0.2548296, %v2179_v34 }
 0xc50   : > { %v2180_v47 = vmul.f32 %v5168_v57, %v2175_v41 }
 0xc51   : > { %v2232_v19 = vsel %vm2222_vm7, %v2217_v40, %v2227_v30  ;;  %v2171_v25 = vmul.f32 %v5170_v7, %v2166_v42  ;;  %v2228_v55 = vsub.f32 0.0, %v2218_v50  ;;  %v2189_v49 = vmul.f32 %v5166_v45, %v2184_v52 }
 0xc52   : > { %v2237_v56 = vadd.f32 1.0, %v2232_v19  ;;  %v2185_v60 = vadd.f32 0.2548296, %v2180_v47 }
 0xc53   : > { %v2176_v62 = vadd.f32 -0.28449672, %v2171_v25  ;;  %v2233_v3 = vsel %vm2223_vm8, %v2218_v50, %v2228_v55  ;;  %v2214_v51 = vmul.f32 %v5176_v43, %v2189_v49 }
 0xc54   : > { %v2238_v4 = vadd.f32 1.0, %v2233_v3  ;;  %v2190_v53 = vmul.f32 %v5168_v57, %v2185_v60  ;;  %v2242_v8 = vmul.f32 %v2237_v56, %v2112_v2 }
 0xc55   : > { %v2181_v44 = vmul.f32 %v5170_v7, %v2176_v62  ;;  %v2219_v61 = vsub.f32 1.0, %v2214_v51 }
 0xc56   : > { %v2243_v10 = vmul.f32 %v2238_v4, %v2113_v58  ;;  %v2215_v45 = vmul.f32 %v5178_v6, %v2190_v53 }
 0xc57   : > { %v2186_v13 = vadd.f32 0.2548296, %v2181_v44  ;;  %v2229_v15 = vsub.f32 0.0, %v2219_v61 }
 0xc58   : > { %v2247_v0 = vpack.c.bf16 %v2243_v10, %v2242_v8  ;;  %v2220_v26 = vsub.f32 1.0, %v2215_v45 }
 0xc59   : > { %v2191_v54 = vmul.f32 %v5170_v7, %v2186_v13  ;;  %v2234_v18 = vsel %vm2224_vm10, %v2219_v61, %v2229_v15 }
 0xc5a   : > { %v2230_v9 = vsub.f32 0.0, %v2220_v26  ;;  %4758 = vmatmul.mubr.msk.bf16.vlgmr.msra.gmra.mrb[80].mxu0 %vm2282_vm9, %v2247_v0  ;;  %v2239_v57 = vadd.f32 1.0, %v2234_v18 }
 0xc5b   : > { %v2216_v59 = vmul.f32 %v5180_v16, %v2191_v54  ;;  %4761 = vmatprep.mubr.msk.bf16.mxu0 %vm5329_vm1, %v5328_v1 }
 0xc5c   : > { %v2235_v22 = vsel %vm2225_vm11, %v2220_v26, %v2230_v9  ;;  %v2244_v33 = vmul.f32 %v2239_v57, %v2114_v23 }
 0xc5d   : > { %v2221_v14 = vsub.f32 1.0, %v2216_v59  ;;  %v2240_v32 = vadd.f32 1.0, %v2235_v22 }
 0xc5f   : > { %v2231_v7 = vsub.f32 0.0, %v2221_v14  ;;  %v2245_v35 = vmul.f32 %v2240_v32, %v2115_v63  ;;  %v5079_v32 = vld [vmem:[%s6622_s26 + $0x20] sm:$0xff]  }
 0xc60   : > { %4786 = vmatpush3.bf16.msra.mxu0 %v5079_v32 }
 0xc61   : > { %v2236_v36 = vsel %vm2226_vm12, %v2221_v14, %v2231_v7  ;;  %v2248_v37 = vpack.c.bf16 %v2245_v35, %v2244_v33  ;;  %v5081_v7 = vld [vmem:[%s6623_s24 + $0x20] sm:$0xff]   ;;  %4787 = vmatprep.subr.bf16.mxu0 %v5328_v1  ;;  %v5080_v33 = vld [vmem:[%s6622_s26 + $0x28] sm:$0xff]  }
 0xc62   : > { %v2241_v29 = vadd.f32 1.0, %v2236_v36  ;;  %4770 = vmatpush3.bf16.msra.mxu1 %v5081_v7  ;;  %v5082_v35 = vld [vmem:[%s6623_s24 + $0x28] sm:$0xff]  }
 0xc63   : > { %4762 = vmatmul.mubr.msk.bf16.gmra.mrb[84].mxu0 %vm2282_vm9, %v2248_v37  ;;  %4771 = vmatprep.subr.bf16.mxu1 %v5328_v1 }
 0xc64   : > { %4765 = vmatprep.mubr.msk.bf16.mxu0 %vm5329_vm1, %v5328_v1  ;;  %v2246_v39 = vmul.f32 %v2241_v29, %v2116_v17  ;;  %4788 = vmatpush3.bf16.msra.mxu0 %v5080_v33 }
 0xc65   : > { %4817 = vmatprep.subr.bf16.mxu0 %v5328_v1 }
 0xc66   : > { %v2249_v5 = vpack.c.bf16 %v2246_v39, %v2246_v39  ;;  %4772 = vmatpush3.bf16.msra.mxu1 %v5082_v35 }
 0xc67   : > { %4801 = vmatprep.subr.bf16.mxu1 %v5328_v1 }
 0xc6b   : > { %4766 = vmatmul.mubr.msk.bf16.gmra.mrb[88].mxu0 %vm2282_vm9, %v2249_v5 }
 0xc6c   : > { %4789 = vmatprep.mubr.msk.bf16.mxu0 %vm5329_vm1, %v5328_v1 }
 0xd2d   : > { %v2326_v11 = vpop.f32.mrb[80].mxu0 }
 0xd2e   : > { %v2348_v40 = vadd.f32 %v2326_v11, %v5872_v21  ;;  %v4759_v24 = vpop.f32.mrb[81].mxu0 }
 0xd2f   : > { %v2329_v46 = vpop.f32.mrb[82].mxu0 }
 0xd30   : > { %v6001_v48 = vadd.f32 %v4245_v20, %v2348_v40  ;;  %v2349_v31 = vadd.f32 %v2329_v46, %v5875_v12  ;;  %v4760_v34 = vpop.f32.mrb[83].mxu0 }
 0xd32   : > { %v6004_v30 = vadd.f32 %v4245_v20, %v2349_v31  ;;  %v2369_v41 = vsel %vm779_vm3, %v6001_v48, 0.0 }
 0xd33   : > { %2370 = vadd.xlane.f32.xlu0 %v2369_v41  ;;  %v4248_v41 = vld [vmem:[%s6575_s9 + $0x1] ss:$0 sm:$0xff] }
 0xd34   : > { %v2372_v42 = vsel %vm779_vm3, %v6004_v30, 0.0 }
 0xd35   : > { %2373 = vadd.xlane.f32.xlu1 %v2372_v42 }
 0xd36   : > { %v2334_v50 = vpop.f32.mrb[84].mxu0 }
 0xd37   : > { %v2350_v21 = vadd.f32 %v2334_v50, %v5882_v27  ;;  %v4763_v52 = vpop.f32.mrb[85].mxu0 }
 0xd38   : > { %v2337_v19 = vpop.f32.mrb[86].mxu0 }
 0xd39   : > { %v6011_v47 = vadd.f32 %v4245_v20, %v2350_v21  ;;  %v2351_v12 = vadd.f32 %v2337_v19, %v5885_v28  ;;  %v4764_v25 = vpop.f32.mrb[87].mxu0 }
 0xd3a   : > { %v4249_v25 = vld [vmem:[%s6576_s10 + $0x1] ss:$0 sm:$0xff] }
 0xd3b   : > { %v6014_v55 = vadd.f32 %v4245_v20, %v2351_v12  ;;  %v2375_v49 = vsel %vm779_vm3, %v6011_v47, 0.0 }
 0xd3c   : > { %2376 = vadd.xlane.f32.xlu0 %v2375_v49 }
 0xd3d   : > { %v2378_v43 = vsel %vm779_vm3, %v6014_v55, 0.0 }
 0xd3e   : > { %2379 = vadd.xlane.f32.xlu1 %v2378_v43  ;;  %v2342_v56 = vpop.f32.mrb[88].mxu0 }
 0xd3f   : > { %v2352_v27 = vadd.f32 %v2342_v56, %v5892_v38  ;;  %v4767_v60 = vpop.f32.mrb[89].mxu0 }
 0xd40   : > { %v2345_v62 = vpop.f32.mrb[90].mxu0 }
 0xd41   : > { %v6021_v2 = vadd.f32 %v4245_v20, %v2352_v27  ;;  %v4768_v3 = vpop.f32.mrb[91].mxu0 }
 0xd42   : > { %v5083_v3 = vld [vmem:[%s6624_s27 + $0x20] sm:$0xff]  }
 0xd43   : > { %v2381_v28 = vsel %vm779_vm3, %v6021_v2, 0.0 }
 0xd44   : > { %2382 = vadd.xlane.f32.xlu0 %v2381_v28 }
 0xdc0   : > { %v2371_v51 = vpop.xlane.xlu0 %2370 }
 0xdc1   : > { %v2384_v58 = vmul.f32 0.03125, %v2371_v51 }
 0xdc2   : > { %v2374_v4 = vpop.xlane.xlu1 %2373 }
 0xdc3   : > { %v2389_v53 = vsub.f32 %v6001_v48, %v2384_v58  ;;  %v2385_v44 = vmul.f32 0.03125, %v2374_v4 }
 0xdc5   : > { %v2390_v6 = vsub.f32 %v6004_v30, %v2385_v44  ;;  %v2394_v61 = vmul.f32 %v2389_v53, %v2389_v53 }
 0xdc7   : > { %v2399_v38 = vsel %vm779_vm3, %v2394_v61, 0.0  ;;  %v2395_v8 = vmul.f32 %v2390_v6, %v2390_v6 }
 0xdc8   : > { %2400 = vadd.xlane.f32.xlu1 %v2399_v38 }
 0xdc9   : > { %v2377_v10 = vpop.xlane.xlu0 %2376  ;;  %v2402_v45 = vsel %vm779_vm3, %v2395_v8, 0.0 }
 0xdca   : > { %v2386_v13 = vmul.f32 0.03125, %v2377_v10  ;;  %2403 = vadd.xlane.f32.xlu0 %v2402_v45 }
 0xdcb   : > { %v2380_v15 = vpop.xlane.xlu1 %2379 }
 0xdcc   : > { %v2391_v0 = vsub.f32 %v6011_v47, %v2386_v13  ;;  %v2387_v26 = vmul.f32 0.03125, %v2380_v15 }
 0xdce   : > { %v6031_v54 = vsub.f32 %v6014_v55, %v2387_v26  ;;  %v2396_v16 = vmul.f32 %v2391_v0, %v2391_v0 }
 0xdd0   : > { %v2405_v18 = vsel %vm779_vm3, %v2396_v16, 0.0  ;;  %v2397_v9 = vmul.f32 %v6031_v54, %v6031_v54 }
 0xdd1   : > { %2406 = vadd.xlane.f32.xlu1 %v2405_v18  ;;  %v2383_v59 = vpop.xlane.xlu0 %2382 }
 0xdd2   : > { %v2388_v57 = vmul.f32 0.03125, %v2383_v59  ;;  %v2408_v22 = vsel %vm779_vm3, %v2397_v9, 0.0 }
 0xdd3   : > { %2409 = vadd.xlane.f32.xlu0 %v2408_v22 }
 0xdd4   : > { %v6038_v14 = vsub.f32 %v6021_v2, %v2388_v57 }
 0xdd6   : > { %v2398_v23 = vmul.f32 %v6038_v14, %v6038_v14 }
 0xdd8   : > { %v2411_v63 = vsel %vm779_vm3, %v2398_v23, 0.0 }
 0xdd9   : > { %2412 = vadd.xlane.f32.xlu1 %v2411_v63 }
 0xe55   : > { %v2401_v36 = vpop.xlane.xlu1 %2400 }
 0xe56   : > { %v2414_v37 = vmul.f32 0.03125, %v2401_v36 }
 0xe57   : > { %v2404_v29 = vpop.xlane.xlu0 %2403 }
 0xe58   : > { %v2419_v17 = vadd.f32 1e-05, %v2414_v37  ;;  %v2415_v39 = vmul.f32 0.03125, %v2404_v29 }
 0xe5a   : > { %5181 = vrsqrt.f32 %v2419_v17  ;;  %v2420_v5 = vadd.f32 1e-05, %v2415_v39 }
 0xe5c   : > { %5183 = vrsqrt.f32 %v2420_v5 }
 0xe5e   : > { %v2407_v11 = vpop.xlane.xlu1 %2406 }
 0xe5f   : > { %v2416_v20 = vmul.f32 0.03125, %v2407_v11 }
 0xe60   : > { %v2410_v40 = vpop.xlane.xlu0 %2409 }
 0xe61   : > { %v2421_v24 = vadd.f32 1e-05, %v2416_v20  ;;  %v2417_v46 = vmul.f32 0.03125, %v2410_v40 }
 0xe63   : > { %5185 = vrsqrt.f32 %v2421_v24  ;;  %v2422_v31 = vadd.f32 1e-05, %v2417_v46 }
 0xe64   : > { %v5182_v34 = vpop.eup %5181 }
 0xe65   : > { %v2429_v42 = vmul.f32 %v5182_v34, %v2389_v53  ;;  %5187 = vrsqrt.f32 %v2422_v31  ;;  %v5084_v53 = vld [vmem:[%s6624_s27 + $0x28] sm:$0xff]  }
 0xe66   : > { %v5184_v50 = vpop.eup %5183  ;;  %v2413_v21 = vpop.xlane.xlu1 %2412 }
 0xe67   : > { %v2440_v52 = vmul.f32 %v4248_v41, %v2429_v42  ;;  %v2430_v19 = vmul.f32 %v5184_v50, %v2390_v6  ;;  %v2418_v12 = vmul.f32 0.03125, %v2413_v21 }
 0xe69   : > { %v2441_v49 = vmul.f32 %v4248_v41, %v2430_v19  ;;  %v2423_v43 = vadd.f32 1e-05, %v2418_v12  ;;  %v2451_v56 = vadd.f32 %v4249_v25, %v2440_v52 }
 0xe6b   : > { %v2452_v27 = vadd.f32 %v4249_v25, %v2441_v49  ;;  %5189 = vrsqrt.f32 %v2423_v43  ;;  %v5085_v49 = vld [vmem:[%s6623_s24 + $0x30] sm:$0xff]   ;;  %v5086_v43 = vld [vmem:[%s6623_s24 + $0x38] sm:$0xff]  }
 0xe6d   : > { %v5186_v60 = vpop.eup %5185  ;;  %v6065_v62 = vpack.c.bf16 %v2452_v27, %v2451_v56 }
 0xe6e   : > { %v2431_v28 = vmul.f32 %v5186_v60, %v2391_v0 }
 0xe6f   : > { %v5188_v51 = vpop.eup %5187  ;;  %4774 = vmatmul.mubr.msk.bf16.vlgmr.msra.gmra.mrb[88].mxu1 %vm779_vm3, %v6065_v62  ;;  %4790 = vmatmul.mubr.msk.bf16.vlgmr.msra.gmra.mrb[92].mxu0 %vm779_vm3, %v6065_v62 }
 0xe70   : > { %v2442_v58 = vmul.f32 %v4248_v41, %v2431_v28  ;;  %v2432_v4 = vmul.f32 %v5188_v51, %v6031_v54  ;;  %4777 = vmatprep.mubr.msk.bf16.mxu1 %vm5329_vm1, %v5328_v1  ;;  %4793 = vmatprep.mubr.msk.bf16.mxu0 %vm5329_vm1, %v5328_v1 }
 0xe71   : > { %4802 = vmatpush3.bf16.msra.mxu1 %v5083_v3 }
 0xe72   : > { %v2443_v44 = vmul.f32 %v4248_v41, %v2432_v4  ;;  %4803 = vmatprep.subr.bf16.mxu1 %v5328_v1  ;;  %v2453_v6 = vadd.f32 %v4249_v25, %v2442_v58 }
 0xe74   : > { %v2454_v61 = vadd.f32 %v4249_v25, %v2443_v44 }
 0xe75   : > { %v5190_v38 = vpop.eup %5189  ;;  %4804 = vmatpush3.bf16.msra.mxu1 %v5084_v53 }
 0xe76   : > { %v2433_v8 = vmul.f32 %v5190_v38, %v6038_v14  ;;  %v6084_v10 = vpack.c.bf16 %v2454_v61, %v2453_v6  ;;  %4835 = vmatprep.subr.bf16.mxu1 %v5328_v1  ;;  %v5087_v38 = vld [vmem:[%s6624_s27 + $0x30] sm:$0xff]  }
 0xe78   : > { %v2444_v45 = vmul.f32 %v4248_v41, %v2433_v8  ;;  %4778 = vmatmul.mubr.msk.bf16.gmra.mrb[92].mxu1 %vm779_vm3, %v6084_v10  ;;  %4794 = vmatmul.mubr.msk.bf16.gmra.mrb[96].mxu0 %vm779_vm3, %v6084_v10  ;;  %v5088_v8 = vld [vmem:[%s6624_s27 + $0x38] sm:$0xff]  }
 0xe79   : > { %4781 = vmatprep.mubr.msk.bf16.mxu1 %vm5329_vm1, %v5328_v1  ;;  %4797 = vmatprep.mubr.msk.bf16.mxu0 %vm5329_vm1, %v5328_v1 }
 0xe7a   : > { %v2455_v13 = vadd.f32 %v4249_v25, %v2444_v45 }
 0xe7c   : > { %v6095_v15 = vpack.c.bf16 %v2455_v13, %v2455_v13 }
 0xe80   : > { %4782 = vmatmul.mubr.msk.bf16.gmra.mrb[96].mxu1 %vm779_vm3, %v6095_v15  ;;  %4798 = vmatmul.mubr.msk.bf16.gmra.mrb[100].mxu0 %vm779_vm3, %v6095_v15 }
 0xe81   : > { %4805 = vmatprep.mubr.msk.bf16.mxu1 %vm5329_vm1, %v5328_v1  ;;  %4823 = vmatprep.mubr.msk.bf16.mxu0 %vm5329_vm1, %v5328_v1 }
 0xe88   : > { %4806 = vmatmul.mubr.msk.bf16.vlgmr.msra.gmra.mrb[100].mxu1 %vm779_vm3, %v6065_v62 }
 0xe89   : > { %4809 = vmatprep.mubr.msk.bf16.mxu1 %vm5329_vm1, %v5328_v1 }
 0xe90   : > { %4810 = vmatmul.mubr.msk.bf16.gmra.mrb[104].mxu1 %vm779_vm3, %v6084_v10 }
 0xe91   : > { %4813 = vmatprep.mubr.msk.bf16.mxu1 %vm5329_vm1, %v5328_v1 }
 0xe98   : > { %4814 = vmatmul.mubr.msk.bf16.gmra.mrb[108].mxu1 %vm779_vm3, %v6095_v15 }
 0xe99   : > { %4841 = vmatprep.mubr.msk.bf16.mxu1 %vm5329_vm1, %v5328_v1 }
 0xf42   : > { %v2519_v0 = vpop.f32.mrb[88].mxu1  ;;  %v2592_v26 = vpop.f32.mrb[92].mxu0 }
 0xf43   : > { %v4775_v54 = vpop.f32.mrb[89].mxu1  ;;  %v4791_v16 = vpop.f32.mrb[93].mxu0 }
 0xf44   : > { %v2522_v18 = vpop.f32.mrb[90].mxu1  ;;  %v2595_v9 = vpop.f32.mrb[94].mxu0 }
 0xf45   : > { %v2687_v59 = vpack.c.bf16 %v2522_v18, %v2519_v0  ;;  %v2690_v57 = vpack.c.bf16 %v2595_v9, %v2592_v26  ;;  %v4776_v22 = vpop.f32.mrb[91].mxu1  ;;  %v4792_v14 = vpop.f32.mrb[95].mxu0  ;;  %v6179_v18 = vld [vmem:[%s6625_s2] ss:$0 sm:$0xff]  ;;  %s675_s2 = scalar_lea.vmem [#allocation2], %s674_s5 }
 0xf46   : > { %s4096_s3 = sshll.u32 %s675_s2, 4  ;;  %s6526_s3 = int_to_ptr.vmem [resolvable:$true] %s4096_s3 }
 0xf47   : > { %v2703_v23 = vsel %vm1102_vm4, %v2690_v57, 0  ;;  %s5264_s4 = scalar_lea.vmem %s6526_s3, 16 }
 0xf48   : > { %4818 = vmatpush3.bf16.xpose.msra.mxu0 %v2703_v23  ;;  %p5265_p11 = scmp.ne.s32.totalorder %s6526_s3, %s5264_s4 }
 0xf49   : > { %4819 = vmatprep.subr.bf16.mxu0 %v5328_v1 }
 0xf4a   : > { %p5266_p12 = pnand %p5265_p11, %p5485_p5 }
 0xf4b   : > { %v2527_v63 = vpop.f32.mrb[92].mxu1  ;;  %v2600_v32 = vpop.f32.mrb[96].mxu0 }
 0xf4c   : > { %v4779_v7 = vpop.f32.mrb[93].mxu1  ;;  %v4795_v33 = vpop.f32.mrb[97].mxu0  ;;  %p5267_p13 = pneg %p5266_p12 }
 0xf4d   : > { %v2530_v35 = vpop.f32.mrb[94].mxu1  ;;  %v2603_v36 = vpop.f32.mrb[98].mxu0 }
 0xf4e   : > { %v2688_v37 = vpack.c.bf16 %v2530_v35, %v2527_v63  ;;  %v2691_v29 = vpack.c.bf16 %v2603_v36, %v2600_v32  ;;  %v4780_v17 = vpop.f32.mrb[95].mxu1  ;;  %v4796_v39 = vpop.f32.mrb[99].mxu0 }
 0xf50   : > { %v2706_v5 = vsel %vm1102_vm4, %v2691_v29, 0 }
 0xf51   : > { %4820 = vmatpush3.bf16.xpose.msra.mxu0 %v2706_v5 }
 0xf52   : > { %4821 = vmatprep.subr.bf16.mxu0 %v5328_v1 }
 0xf53   : > { %v2535_v11 = vpop.f32.mrb[96].mxu1  ;;  %v2608_v20 = vpop.f32.mrb[100].mxu0 }
 0xf54   : > { %v2692_v40 = vpack.c.bf16 %v2608_v20, %v2608_v20  ;;  %v4783_v24 = vpop.f32.mrb[97].mxu1  ;;  %v4799_v46 = vpop.f32.mrb[101].mxu0  ;;  %v2689_v44 = vpack.c.bf16 %v2535_v11, %v2535_v11 }
 0xf55   : > { %v2538_v31 = vpop.f32.mrb[98].mxu1  ;;  %v2611_v34 = vpop.f32.mrb[102].mxu0 }
 0xf56   : > { %v4784_v41 = vpop.f32.mrb[99].mxu1  ;;  %v4800_v42 = vpop.f32.mrb[103].mxu0  ;;  %v2709_v50 = vsel %vm1102_vm4, %v2692_v40, 0 }
 0xf59   : > { %4822 = vmatpush3.bf16.xpose.msra.mxu0 %v2709_v50 }
 0xf5a   : > { %4853 = vmatprep.subr.bf16.mxu0 %v5328_v1 }
 0xf5b   : > { %v2665_v21 = vpop.f32.mrb[100].mxu1 }
 0xf5c   : > { %v4807_v52 = vpop.f32.mrb[101].mxu1 }
 0xf5d   : > { %v2668_v19 = vpop.f32.mrb[102].mxu1 }
 0xf5e   : > { %v2835_v12 = vpack.c.bf16 %v2668_v19, %v2665_v21  ;;  %v4808_v25 = vpop.f32.mrb[103].mxu1 }
 0xf60   : > { %4824 = vmatmul.mubr.msk.bf16.vlgmr.msra.gmra.mrb[104].mxu0 %vm1102_vm4, %v2687_v59  ;;  %4836 = vmatpush3.bf16.msra.mxu1 %v2835_v12 }
 0xf61   : > { %4827 = vmatprep.mubr.msk.bf16.mxu0 %vm5329_vm1, %v5328_v1  ;;  %4837 = vmatprep.subr.bf16.mxu1 %v5328_v1 }
 0xf62   : > { %4854 = vmatpush3.bf16.msra.mxu0 %v5085_v49 }
 0xf63   : > { %v2673_v56 = vpop.f32.mrb[104].mxu1  ;;  %4855 = vmatprep.subr.bf16.mxu0 %v5328_v1 }
 0xf64   : > { %v4811_v27 = vpop.f32.mrb[105].mxu1 }
 0xf65   : > { %v2676_v60 = vpop.f32.mrb[106].mxu1 }
 0xf66   : > { %v2836_v3 = vpack.c.bf16 %v2676_v60, %v2673_v56  ;;  %v4812_v28 = vpop.f32.mrb[107].mxu1  ;;  %4856 = vmatpush3.bf16.msra.mxu0 %v5086_v43 }
 0xf67   : > { %4885 = vmatprep.subr.bf16.mxu0 %v5328_v1 }
 0xf68   : > { %4828 = vmatmul.mubr.msk.bf16.gmra.mrb[108].mxu0 %vm1102_vm4, %v2688_v37  ;;  %4838 = vmatpush3.bf16.msra.mxu1 %v2836_v3 }
 0xf69   : > { %4839 = vmatprep.subr.bf16.mxu1 %v5328_v1  ;;  %4831 = vmatprep.mubr.msk.bf16.mxu0 %vm5329_vm1, %v5328_v1 }
 0xf6b   : > { %v2681_v51 = vpop.f32.mrb[108].mxu1 }
 0xf6c   : > { %v2837_v58 = vpack.c.bf16 %v2681_v51, %v2681_v51  ;;  %v4815_v4 = vpop.f32.mrb[109].mxu1 }
 0xf6d   : > { %v2684_v53 = vpop.f32.mrb[110].mxu1 }
 0xf6e   : > { %v2848_v6 = vsel %vm1264_vm5, %v2837_v58, 0  ;;  %v4816_v61 = vpop.f32.mrb[111].mxu1 }
 0xf6f   : > { %4840 = vmatpush3.bf16.msra.mxu1 %v2848_v6 }
 0xf70   : > { %4832 = vmatmul.mubr.msk.bf16.gmra.mrb[112].mxu0 %vm1102_vm4, %v2689_v44  ;;  %4869 = vmatprep.subr.bf16.mxu1 %v5328_v1 }
 0xf71   : > { %4857 = vmatprep.mubr.msk.bf16.mxu0 %vm5329_vm1, %v5328_v1 }
 0xf78   : > { %4858 = vmatmul.mubr.msk.bf16.vlgmr.msra.gmra.mrb[116].mxu0 %vm779_vm3, %v6065_v62 }
 0xf79   : > { %4861 = vmatprep.mubr.msk.bf16.mxu0 %vm5329_vm1, %v5328_v1  ;;  %4886 = vmatpush3.bf16.msra.mxu0 %v5087_v38 }
 0xf7a   : > { %4887 = vmatprep.subr.bf16.mxu0 %v5328_v1 }
 0xf7d   : > { %4888 = vmatpush3.bf16.msra.mxu0 %v5088_v8 }
 0xf7e   : > { %4919 = vmatprep.subr.bf16.mxu0 %v5328_v1 }
 0xf80   : > { %4862 = vmatmul.mubr.msk.bf16.gmra.mrb[120].mxu0 %vm779_vm3, %v6084_v10 }
 0xf81   : > { %4865 = vmatprep.mubr.msk.bf16.mxu0 %vm5329_vm1, %v5328_v1 }
 0xf88   : > { %4866 = vmatmul.mubr.msk.bf16.gmra.mrb[124].mxu0 %vm779_vm3, %v6095_v15 }
 0xf89   : > { %4889 = vmatprep.mubr.msk.bf16.mxu0 %vm5329_vm1, %v5328_v1 }
 0xf90   : > { %4890 = vmatmul.mubr.msk.bf16.vlgmr.msra.gmra.mrb[128].mxu0 %vm779_vm3, %v6065_v62 }
 0xf91   : > { %4893 = vmatprep.mubr.msk.bf16.mxu0 %vm5329_vm1, %v5328_v1 }
 0xf98   : > { %4894 = vmatmul.mubr.msk.bf16.gmra.mrb[132].mxu0 %vm779_vm3, %v6084_v10 }
 0xf99   : > { %4897 = vmatprep.mubr.msk.bf16.mxu0 %vm5329_vm1, %v5328_v1 }
 0xfa0   : > { %4898 = vmatmul.mubr.msk.bf16.gmra.mrb[136].mxu0 %vm779_vm3, %v6095_v15 }
 0xfa1   : > { %4925 = vmatprep.mubr.msk.bf16.mxu0 %vm5329_vm1, %v5328_v1 }
0x1033   : > { %v2745_v45 = vpop.f32.mrb[104].mxu0 }
0x1034   : > { %v2767_v13 = vmul.f32 0.25, %v2745_v45  ;;  %v4825_v0 = vpop.f32.mrb[105].mxu0 }
0x1035   : > { %v2748_v26 = vpop.f32.mrb[106].mxu0 }
0x1036   : > { %v2768_v54 = vmul.f32 0.25, %v2748_v26  ;;  %v4826_v16 = vpop.f32.mrb[107].mxu0  ;;  %v6182_v9 = vadd.f32 %v6179_v18, %v2767_v13 }
0x1038   : > { %v2777_v59 = vsel %vm1193_vm6, %v6182_v9, -inf  ;;  %v6187_v57 = vadd.f32 %v6179_v18, %v2768_v54 }
0x1039   : > { %2778 = vmax.xlane.f32.xlu0 %v2777_v59 }
0x103a   : > { %v2780_v22 = vsel %vm1193_vm6, %v6187_v57, -inf }
0x103b   : > { %2781 = vmax.xlane.f32.xlu1 %v2780_v22  ;;  %v2753_v14 = vpop.f32.mrb[108].mxu0 }
0x103c   : > { %v2769_v23 = vmul.f32 0.25, %v2753_v14  ;;  %v4829_v63 = vpop.f32.mrb[109].mxu0 }
0x103d   : > { %v2756_v32 = vpop.f32.mrb[110].mxu0 }
0x103e   : > { %v2770_v7 = vmul.f32 0.25, %v2756_v32  ;;  %v4830_v33 = vpop.f32.mrb[111].mxu0  ;;  %v2774_v35 = vadd.f32 %v6179_v18, %v2769_v23 }
0x1040   : > { %v2783_v36 = vsel %vm1193_vm6, %v2774_v35, -inf  ;;  %v2775_v37 = vadd.f32 %v6179_v18, %v2770_v7 }
0x1041   : > { %2784 = vmax.xlane.f32.xlu0 %v2783_v36 }
0x1042   : > { %v2786_v29 = vsel %vm1193_vm6, %v2775_v37, -inf }
0x1043   : > { %2787 = vmax.xlane.f32.xlu1 %v2786_v29  ;;  %v2761_v17 = vpop.f32.mrb[112].mxu0 }
0x1044   : > { %v2771_v39 = vmul.f32 0.25, %v2761_v17  ;;  %v4833_v5 = vpop.f32.mrb[113].mxu0 }
0x1045   : > { %v2764_v11 = vpop.f32.mrb[114].mxu0 }
0x1046   : > { %v4834_v20 = vpop.f32.mrb[115].mxu0  ;;  %v2776_v40 = vadd.f32 %v6179_v18, %v2771_v39 }
0x1048   : > { %v2789_v24 = vsel %vm1193_vm6, %v2776_v40, -inf }
0x1049   : > { %2790 = vmax.xlane.f32.xlu0 %v2789_v24 }
0x104b   : > { %v6197_v46 = vpop.f32.mrb[116].mxu0 }
0x104c   : > { %v4859_v31 = vpop.f32.mrb[117].mxu0 }
0x104d   : > { %v6199_v34 = vpop.f32.mrb[118].mxu0 }
0x104e   : > { %v3131_v41 = vpack.c.bf16 %v6199_v34, %v6197_v46  ;;  %v4860_v42 = vpop.f32.mrb[119].mxu0 }
0x1053   : > { %v6203_v50 = vpop.f32.mrb[120].mxu0 }
0x1054   : > { %v4863_v21 = vpop.f32.mrb[121].mxu0 }
0x1055   : > { %v6205_v52 = vpop.f32.mrb[122].mxu0 }
0x1056   : > { %v3132_v19 = vpack.c.bf16 %v6205_v52, %v6203_v50  ;;  %v4864_v12 = vpop.f32.mrb[123].mxu0 }
0x105b   : > { %v6209_v25 = vpop.f32.mrb[124].mxu0 }
0x105c   : > { %v4867_v49 = vpop.f32.mrb[125].mxu0 }
0x105d   : > { %v2982_v43 = vpop.f32.mrb[126].mxu0 }
0x105e   : > { %v4868_v56 = vpop.f32.mrb[127].mxu0 }
0x1063   : > { %v3109_v27 = vpop.f32.mrb[128].mxu0 }
0x1064   : > { %v4891_v60 = vpop.f32.mrb[129].mxu0 }
0x1065   : > { %v3112_v3 = vpop.f32.mrb[130].mxu0 }
0x1066   : > { %v3279_v28 = vpack.c.bf16 %v3112_v3, %v3109_v27  ;;  %v4892_v51 = vpop.f32.mrb[131].mxu0  ;;  %v5089_v3 = vld [vmem:[%s6622_s26 + $0x30] sm:$0xff]  }
0x1068   : > { %4920 = vmatpush3.bf16.msra.mxu0 %v3279_v28 }
0x1069   : > { %4921 = vmatprep.subr.bf16.mxu0 %v5328_v1 }
0x106b   : > { %v3117_v58 = vpop.f32.mrb[132].mxu0 }
0x106c   : > { %v4895_v4 = vpop.f32.mrb[133].mxu0 }
0x106d   : > { %v3120_v53 = vpop.f32.mrb[134].mxu0  ;;  %v5090_v4 = vld [vmem:[%s6622_s26 + $0x38] sm:$0xff]  }
0x106e   : > { %v3280_v44 = vpack.c.bf16 %v3120_v53, %v3117_v58  ;;  %v4896_v6 = vpop.f32.mrb[135].mxu0 }
0x1070   : > { %4922 = vmatpush3.bf16.msra.mxu0 %v3280_v44 }
0x1071   : > { %4923 = vmatprep.subr.bf16.mxu0 %v5328_v1 }
0x1073   : > { %v3125_v61 = vpop.f32.mrb[136].mxu0 }
0x1074   : > { %v3281_v38 = vpack.c.bf16 %v3125_v61, %v3125_v61  ;;  %v4899_v8 = vpop.f32.mrb[137].mxu0 }
0x1075   : > { %v3128_v45 = vpop.f32.mrb[138].mxu0 }
0x1076   : > { %v3292_v13 = vsel %vm1264_vm5, %v3281_v38, 0  ;;  %v4900_v0 = vpop.f32.mrb[139].mxu0 }
0x1077   : > { %4924 = vmatpush3.bf16.msra.mxu0 %v3292_v13 }
0x1078   : > { %4951 = vmatprep.subr.bf16.mxu0 %v5328_v1 }
0x10c6   : > { %v2779_v26 = vpop.xlane.xlu0 %2778 }
0x10c7   : > { %v2792_v54 = vsub.f32 %v6182_v9, %v2779_v26 }
0x10c8   : > { %v2782_v16 = vpop.xlane.xlu1 %2781 }
0x10c9   : > { %v2797_v59 = vmul.f32 1.442695, %v2792_v54  ;;  %v2793_v22 = vsub.f32 %v6187_v57, %v2782_v16 }
0x10cb   : > { %5191 = vpow2.f32 %v2797_v59  ;;  %v2799_v14 = vmul.f32 1.442695, %v2793_v22 }
0x10cd   : > { %5193 = vpow2.f32 %v2799_v14 }
0x10ce   : > { %v2785_v23 = vpop.xlane.xlu0 %2784 }
0x10cf   : > { %v2794_v63 = vsub.f32 %v2774_v35, %v2785_v23 }
0x10d0   : > { %v2788_v32 = vpop.xlane.xlu1 %2787 }
0x10d1   : > { %v2801_v7 = vmul.f32 1.442695, %v2794_v63  ;;  %v2795_v33 = vsub.f32 %v2775_v37, %v2788_v32 }
0x10d3   : > { %5195 = vpow2.f32 %v2801_v7  ;;  %v2803_v36 = vmul.f32 1.442695, %v2795_v33 }
0x10d5   : > { %v5192_v29 = vpop.eup %5191  ;;  %5197 = vpow2.f32 %v2803_v36 }
0x10d6   : > { %v2791_v17 = vpop.xlane.xlu0 %2790  ;;  %v2807_v39 = vsel %vm1193_vm6, %v5192_v29, 0.0 }
0x10d7   : > { %v5194_v9 = vpop.eup %5193  ;;  %v2796_v5 = vsub.f32 %v2776_v40, %v2791_v17  ;;  %2808 = vadd.xlane.f32.xlu1 %v2807_v39 }
0x10d8   : > { %v2810_v57 = vsel %vm1193_vm6, %v5194_v9, 0.0 }
0x10d9   : > { %v2805_v11 = vmul.f32 1.442695, %v2796_v5  ;;  %2811 = vadd.xlane.f32.xlu0 %v2810_v57 }
0x10db   : > { %5199 = vpow2.f32 %v2805_v11 }
0x10dd   : > { %v5196_v20 = vpop.eup %5195 }
0x10de   : > { %v2813_v35 = vsel %vm1193_vm6, %v5196_v20, 0.0 }
0x10df   : > { %v5198_v24 = vpop.eup %5197  ;;  %2814 = vadd.xlane.f32.xlu1 %v2813_v35 }
0x10e0   : > { %v2816_v37 = vsel %vm1193_vm6, %v5198_v24, 0.0 }
0x10e1   : > { %2817 = vadd.xlane.f32.xlu0 %v2816_v37 }
0x10e5   : > { %v5200_v31 = vpop.eup %5199 }
0x10e6   : > { %v2819_v42 = vsel %vm1193_vm6, %v5200_v31, 0.0 }
0x10e7   : > { %2820 = vadd.xlane.f32.xlu1 %v2819_v42 }
0x1164   : > { %v2809_v21 = vpop.xlane.xlu1 %2808 }
0x1165   : > { %5201 = vrcp.f32 %v2809_v21 }
0x1166   : > { %v2812_v40 = vpop.xlane.xlu0 %2811 }
0x1167   : > { %5203 = vrcp.f32 %v2812_v40 }
0x116c   : > { %v2815_v12 = vpop.xlane.xlu1 %2814 }
0x116d   : > { %5205 = vrcp.f32 %v2815_v12  ;;  %v3133_v12 = vpack.c.bf16 %v6209_v25, %v6209_v25 }
0x116e   : > { %v2818_v49 = vpop.xlane.xlu0 %2817 }
0x116f   : > { %v5202_v43 = vpop.eup %5201  ;;  %5207 = vrcp.f32 %v2818_v49 }
0x1170   : > { %v2827_v27 = vmul.f32 %v5202_v43, %v5192_v29 }
0x1171   : > { %v5204_v56 = vpop.eup %5203 }
0x1172   : > { %v2828_v60 = vmul.f32 %v5204_v56, %v5194_v9 }
0x1174   : > { %v2832_v28 = vpack.c.bf16 %v2828_v60, %v2827_v27  ;;  %v2821_v51 = vpop.xlane.xlu1 %2820 }
0x1175   : > { %5209 = vrcp.f32 %v2821_v51 }
0x1176   : > { %4842 = vmatmul.mubr.msk.bf16.vlgmr.msra.gmra.mrb[112].mxu1 %vm1193_vm6, %v2832_v28 }
0x1177   : > { %v5206_v58 = vpop.eup %5205  ;;  %4870 = vmatpush3.bf16.msra.mxu1 %v5089_v3  ;;  %4845 = vmatprep.mubr.msk.bf16.mxu1 %vm5329_vm1, %v5328_v1 }
0x1178   : > { %4871 = vmatprep.subr.bf16.mxu1 %v5328_v1  ;;  %v2829_v44 = vmul.f32 %v5206_v58, %v5196_v20 }
0x1179   : > { %v5208_v53 = vpop.eup %5207 }
0x117a   : > { %v2830_v6 = vmul.f32 %v5208_v53, %v5198_v24 }
0x117b   : > { %4872 = vmatpush3.bf16.msra.mxu1 %v5090_v4 }
0x117c   : > { %v2833_v61 = vpack.c.bf16 %v2830_v6, %v2829_v44  ;;  %4901 = vmatprep.subr.bf16.mxu1 %v5328_v1 }
0x117e   : > { %4846 = vmatmul.mubr.msk.bf16.gmra.mrb[116].mxu1 %vm1193_vm6, %v2833_v61 }
0x117f   : > { %v5210_v38 = vpop.eup %5209  ;;  %4849 = vmatprep.mubr.msk.bf16.mxu1 %vm5329_vm1, %v5328_v1 }
0x1180   : > { %v2831_v8 = vmul.f32 %v5210_v38, %v5200_v31 }
0x1182   : > { %v2834_v45 = vpack.c.bf16 %v2831_v8, %v2831_v8 }
0x1186   : > { %4850 = vmatmul.mubr.msk.bf16.gmra.mrb[120].mxu1 %vm1193_vm6, %v2834_v45 }
0x1187   : > { %4873 = vmatprep.mubr.msk.bf16.mxu1 %vm5329_vm1, %v5328_v1 }
0x118e   : > { %4874 = vmatmul.mubr.msk.bf16.vlgmr.msra.gmra.mrb[124].mxu1 %vm779_vm3, %v6065_v62 }
0x118f   : > { %4877 = vmatprep.mubr.msk.bf16.mxu1 %vm5329_vm1, %v5328_v1 }
0x1196   : > { %4878 = vmatmul.mubr.msk.bf16.gmra.mrb[128].mxu1 %vm779_vm3, %v6084_v10 }
0x1197   : > { %4881 = vmatprep.mubr.msk.bf16.mxu1 %vm5329_vm1, %v5328_v1 }
0x119e   : > { %4882 = vmatmul.mubr.msk.bf16.gmra.mrb[132].mxu1 %vm779_vm3, %v6095_v15 }
0x119f   : > { %4907 = vmatprep.mubr.msk.bf16.mxu1 %vm5329_vm1, %v5328_v1 }
0x1249   : > { %v6251_v13 = vpop.f32.mrb[112].mxu1 }
0x124a   : > { %v4843_v0 = vpop.f32.mrb[113].mxu1 }
0x124b   : > { %v6253_v26 = vpop.f32.mrb[114].mxu1 }
0x124c   : > { %v2906_v62 = vpack.c.bf16 %v6253_v26, %v6251_v13  ;;  %v4844_v54 = vpop.f32.mrb[115].mxu1 }
0x1251   : > { %v6257_v16 = vpop.f32.mrb[116].mxu1 }
0x1252   : > { %v4847_v10 = vpop.f32.mrb[117].mxu1 }
0x1253   : > { %v6259_v59 = vpop.f32.mrb[118].mxu1 }
0x1254   : > { %v2907_v15 = vpack.c.bf16 %v6259_v59, %v6257_v16  ;;  %v4848_v22 = vpop.f32.mrb[119].mxu1 }
0x1259   : > { %v6263_v14 = vpop.f32.mrb[120].mxu1 }
0x125a   : > { %v4851_v23 = vpop.f32.mrb[121].mxu1 }
0x125b   : > { %v2903_v63 = vpop.f32.mrb[122].mxu1 }
0x125c   : > { %v4852_v32 = vpop.f32.mrb[123].mxu1 }
0x1261   : > { %v3036_v7 = vpop.f32.mrb[124].mxu1 }
0x1262   : > { %v4875_v33 = vpop.f32.mrb[125].mxu1 }
0x1263   : > { %v3039_v36 = vpop.f32.mrb[126].mxu1 }
0x1264   : > { %v3134_v29 = vpack.c.bf16 %v3039_v36, %v3036_v7  ;;  %v4876_v17 = vpop.f32.mrb[127].mxu1 }
0x1266   : > { %v3147_v39 = vsel %vm1102_vm4, %v3134_v29, 0 }
0x1267   : > { %4902 = vmatpush3.bf16.xpose.msra.mxu1 %v3147_v39 }
0x1268   : > { %4903 = vmatprep.subr.bf16.mxu1 %v5328_v1 }
0x1269   : > { %v3044_v9 = vpop.f32.mrb[128].mxu1 }
0x126a   : > { %v4879_v5 = vpop.f32.mrb[129].mxu1 }
0x126b   : > { %v3047_v57 = vpop.f32.mrb[130].mxu1 }
0x126c   : > { %v3135_v11 = vpack.c.bf16 %v3047_v57, %v3044_v9  ;;  %v4880_v20 = vpop.f32.mrb[131].mxu1 }
0x126e   : > { %v3150_v35 = vsel %vm1102_vm4, %v3135_v11, 0 }
0x126f   : > { %4904 = vmatpush3.bf16.xpose.msra.mxu1 %v3150_v35 }
0x1270   : > { %4905 = vmatprep.subr.bf16.mxu1 %v5328_v1 }
0x1271   : > { %v3052_v24 = vpop.f32.mrb[132].mxu1 }
0x1272   : > { %v3136_v37 = vpack.c.bf16 %v3052_v24, %v3052_v24  ;;  %v4883_v31 = vpop.f32.mrb[133].mxu1 }
0x1273   : > { %v3055_v42 = vpop.f32.mrb[134].mxu1 }
0x1274   : > { %v4884_v21 = vpop.f32.mrb[135].mxu1  ;;  %v3153_v40 = vsel %vm1102_vm4, %v3136_v37, 0 }
0x1277   : > { %4906 = vmatpush3.bf16.xpose.msra.mxu1 %v3153_v40 }
0x1278   : > { %4937 = vmatprep.subr.bf16.mxu1 %v5328_v1 }
0x127e   : > { %4908 = vmatmul.mubr.msk.bf16.vlgmr.msra.gmra.mrb[136].mxu1 %vm1102_vm4, %v3131_v41 }
0x127f   : > { %4911 = vmatprep.mubr.msk.bf16.mxu1 %vm5329_vm1, %v5328_v1 }
0x1286   : > { %4912 = vmatmul.mubr.msk.bf16.gmra.mrb[140].mxu1 %vm1102_vm4, %v3132_v19 }
0x1287   : > { %4915 = vmatprep.mubr.msk.bf16.mxu1 %vm5329_vm1, %v5328_v1 }
0x128e   : > { %4916 = vmatmul.mubr.msk.bf16.gmra.mrb[144].mxu1 %vm1102_vm4, %v3133_v12 }
0x128f   : > { %4939 = vmatprep.mubr.msk.bf16.mxu1 %vm5329_vm1, %v5328_v1 }
0x1351   : > { %v3189_v46 = vpop.f32.mrb[136].mxu1 }
0x1352   : > { %v3211_v34 = vmul.f32 0.25, %v3189_v46  ;;  %v4909_v41 = vpop.f32.mrb[137].mxu1 }
0x1353   : > { %v3192_v49 = vpop.f32.mrb[138].mxu1 }
0x1354   : > { %v3212_v43 = vmul.f32 0.25, %v3192_v49  ;;  %v4910_v56 = vpop.f32.mrb[139].mxu1  ;;  %v3216_v50 = vadd.f32 %v6179_v18, %v3211_v34  ;;  %v5092_v34 = vld [vmem:[%s6626_s7 + $0x18] sm:$0xff]  }
0x1355   : > { %4938 = vmatpush3.bf16.msra.mxu1 %v5092_v34 }
0x1356   : > { %v3221_v52 = vsel %vm1193_vm6, %v3216_v50, -inf  ;;  %v3217_v19 = vadd.f32 %v6179_v18, %v3212_v43  ;;  %4965 = vmatprep.subr.bf16.mxu1 %v5328_v1 }
0x1357   : > { %3222 = vmax.xlane.f32.xlu0 %v3221_v52 }
0x1358   : > { %v3224_v25 = vsel %vm1193_vm6, %v3217_v19, -inf }
0x1359   : > { %3225 = vmax.xlane.f32.xlu1 %v3224_v25  ;;  %v3197_v27 = vpop.f32.mrb[140].mxu1 }
0x135a   : > { %v3213_v60 = vmul.f32 0.25, %v3197_v27  ;;  %v4913_v3 = vpop.f32.mrb[141].mxu1  ;;  %v5091_v27 = vld [vmem:[%s6626_s7 + $0x10] sm:$0xff]   ;;  %s5268_s7 = sshll.u32 %s5331_s0, 4  ;;  %s5269_s7 = int_to_ptr.vmem [resolvable:$false] %s5268_s7 }
0x135b   : > { %v3200_v28 = vpop.f32.mrb[142].mxu1  ;;  %s5270_s25 = scalar_lea.vmem %s5269_s7, 32  ;;  %p5271_p0 = scmp.lt.s32.totalorder %s6526_s3, %s5269_s7 }
0x135c   : > { %v3214_v51 = vmul.f32 0.25, %v3200_v28  ;;  %v4914_v58 = vpop.f32.mrb[143].mxu1  ;;  %v3218_v4 = vadd.f32 %v6179_v18, %v3213_v60  ;;  %p5272_p1 = scmp.lt.s32.totalorder %s5270_s25, %s5264_s4 }
0x135e   : > { %v3227_v53 = vsel %vm1193_vm6, %v3218_v4, -inf  ;;  %v3219_v44 = vadd.f32 %v6179_v18, %v3214_v51  ;;  %p5273_p2 = por %p5272_p1, %p5271_p0 }
0x135f   : > { %3228 = vmax.xlane.f32.xlu0 %v3227_v53 }
0x1360   : > { %v3230_v6 = vsel %vm1193_vm6, %v3219_v44, -inf  ;;  %p5274_p3 = pnand %p5273_p2, %p5267_p13 }
0x1361   : > { %3231 = vmax.xlane.f32.xlu1 %v3230_v6  ;;  %v3205_v61 = vpop.f32.mrb[144].mxu1 }
0x1362   : > { %v3215_v38 = vmul.f32 0.25, %v3205_v61  ;;  %v4917_v8 = vpop.f32.mrb[145].mxu1 }
0x1363   : > { %v3208_v45 = vpop.f32.mrb[146].mxu1 }
0x1364   : > { %v4918_v0 = vpop.f32.mrb[147].mxu1  ;;  %v3220_v54 = vadd.f32 %v6179_v18, %v3215_v38  ;;  %v2908_v38 = vpack.c.bf16 %v6263_v14, %v6263_v14 }
0x1366   : > { %v3233_v10 = vsel %vm1193_vm6, %v3220_v54, -inf }
0x1367   : > { %3234 = vmax.xlane.f32.xlu0 %v3233_v10 }
0x13e4   : > { %v3223_v22 = vpop.xlane.xlu0 %3222 }
0x13e5   : > { %v3236_v23 = vsub.f32 %v3216_v50, %v3223_v22 }
0x13e6   : > { %v3226_v63 = vpop.xlane.xlu1 %3225 }
0x13e7   : > { %v3241_v32 = vmul.f32 1.442695, %v3236_v23  ;;  %v3237_v7 = vsub.f32 %v3217_v19, %v3226_v63 }
0x13e9   : > { %5211 = vpow2.f32 %v3241_v32  ;;  %v3243_v33 = vmul.f32 1.442695, %v3237_v7 }
0x13eb   : > { %5213 = vpow2.f32 %v3243_v33 }
0x13ec   : > { %v3229_v36 = vpop.xlane.xlu0 %3228 }
0x13ed   : > { %v3238_v29 = vsub.f32 %v3218_v4, %v3229_v36 }
0x13ee   : > { %v3232_v17 = vpop.xlane.xlu1 %3231 }
0x13ef   : > { %v3245_v39 = vmul.f32 1.442695, %v3238_v29  ;;  %v3239_v9 = vsub.f32 %v3219_v44, %v3232_v17 }
0x13f1   : > { %5215 = vpow2.f32 %v3245_v39  ;;  %v3247_v5 = vmul.f32 1.442695, %v3239_v9 }
0x13f3   : > { %v5212_v57 = vpop.eup %5211  ;;  %5217 = vpow2.f32 %v3247_v5 }
0x13f4   : > { %v3235_v18 = vpop.xlane.xlu0 %3234  ;;  %v3251_v11 = vsel %vm1193_vm6, %v5212_v57, 0.0 }
0x13f5   : > { %v5214_v20 = vpop.eup %5213  ;;  %v3240_v35 = vsub.f32 %v3220_v54, %v3235_v18  ;;  %3252 = vadd.xlane.f32.xlu1 %v3251_v11 }
0x13f6   : > { %v3254_v24 = vsel %vm1193_vm6, %v5214_v20, 0.0 }
0x13f7   : > { %v3249_v37 = vmul.f32 1.442695, %v3240_v35  ;;  %3255 = vadd.xlane.f32.xlu0 %v3254_v24 }
0x13f9   : > { %5219 = vpow2.f32 %v3249_v37  ;;  %v4329_v37 = vld [vmem:[%s6574_s8 + $0x1] ss:$0 sm:$0xff] }
0x13fb   : > { %v5216_v31 = vpop.eup %5215 }
0x13fc   : > { %v3257_v42 = vsel %vm1193_vm6, %v5216_v31, 0.0 }
0x13fd   : > { %v5218_v21 = vpop.eup %5217  ;;  %3258 = vadd.xlane.f32.xlu1 %v3257_v42 }
0x13fe   : > { %v3260_v40 = vsel %vm1193_vm6, %v5218_v21, 0.0 }
0x13ff   : > { %3261 = vadd.xlane.f32.xlu0 %v3260_v40 }
0x1403   : > { %v5220_v12 = vpop.eup %5219 }
0x1404   : > { %v3263_v46 = vsel %vm1193_vm6, %v5220_v12, 0.0 }
0x1405   : > { %3264 = vadd.xlane.f32.xlu1 %v3263_v46 }
0x1482   : > { %v3253_v41 = vpop.xlane.xlu1 %3252 }
0x1483   : > { %5221 = vrcp.f32 %v3253_v41 }
0x1484   : > { %v3256_v49 = vpop.xlane.xlu0 %3255 }
0x1485   : > { %5223 = vrcp.f32 %v3256_v49 }
0x148a   : > { %v3259_v43 = vpop.xlane.xlu1 %3258 }
0x148b   : > { %5225 = vrcp.f32 %v3259_v43 }
0x148c   : > { %v3262_v56 = vpop.xlane.xlu0 %3261 }
0x148d   : > { %v5222_v50 = vpop.eup %5221  ;;  %5227 = vrcp.f32 %v3262_v56 }
0x148e   : > { %v3271_v19 = vmul.f32 %v5222_v50, %v5212_v57 }
0x148f   : > { %v5224_v52 = vpop.eup %5223 }
0x1490   : > { %v3272_v25 = vmul.f32 %v5224_v52, %v5214_v20 }
0x1492   : > { %v3276_v60 = vpack.c.bf16 %v3272_v25, %v3271_v19  ;;  %v3265_v3 = vpop.xlane.xlu1 %3264 }
0x1493   : > { %5229 = vrcp.f32 %v3265_v3 }
0x1494   : > { %4926 = vmatmul.mubr.msk.bf16.vlgmr.msra.gmra.mrb[140].mxu0 %vm1193_vm6, %v3276_v60 }
0x1495   : > { %v5226_v28 = vpop.eup %5225  ;;  %4929 = vmatprep.mubr.msk.bf16.mxu0 %vm5329_vm1, %v5328_v1  ;;  %4952 = vmatpush3.bf16.msra.mxu0 %v5091_v27 }
0x1496   : > { %4981 = vmatprep.subr.bf16.mxu0 %v5328_v1  ;;  %v3273_v58 = vmul.f32 %v5226_v28, %v5216_v31 }
0x1497   : > { %v5228_v51 = vpop.eup %5227 }
0x1498   : > { %v3274_v4 = vmul.f32 %v5228_v51, %v5218_v21 }
0x149a   : > { %v3277_v53 = vpack.c.bf16 %v3274_v4, %v3273_v58 }
0x149c   : > { %4930 = vmatmul.mubr.msk.bf16.gmra.mrb[144].mxu0 %vm1193_vm6, %v3277_v53 }
0x149d   : > { %v5230_v44 = vpop.eup %5229  ;;  %4933 = vmatprep.mubr.msk.bf16.mxu0 %vm5329_vm1, %v5328_v1 }
0x149e   : > { %v3275_v6 = vmul.f32 %v5230_v44, %v5220_v12 }
0x14a0   : > { %v3278_v61 = vpack.c.bf16 %v3275_v6, %v3275_v6 }
0x14a4   : > { %4934 = vmatmul.mubr.msk.bf16.gmra.mrb[148].mxu0 %vm1193_vm6, %v3278_v61 }
0x14a5   : > { %4953 = vmatprep.mubr.msk.bf16.mxu0 %vm5329_vm1, %v5328_v1 }
0x14ac   : > { %4954 = vmatmul.mubr.msk.bf16.vlgmr.msra.gmra.mrb[152].mxu0 %vm1102_vm4, %v2906_v62 }
0x14ad   : > { %4957 = vmatprep.mubr.msk.bf16.mxu0 %vm5329_vm1, %v5328_v1 }
0x14b4   : > { %4958 = vmatmul.mubr.msk.bf16.gmra.mrb[156].mxu0 %vm1102_vm4, %v2907_v15 }
0x14b5   : > { %4961 = vmatprep.mubr.msk.bf16.mxu0 %vm5329_vm1, %v5328_v1 }
0x14bc   : > { %4962 = vmatmul.mubr.msk.bf16.gmra.mrb[160].mxu0 %vm1102_vm4, %v2908_v38 }
0x14bd   : > { %4989 = vmatprep.mubr.msk.bf16.mxu0 %vm5329_vm1, %v5328_v1 }
0x1567   : > { %v3328_v13 = vpop.f32.mrb[140].mxu0 }
0x1568   : > { %v4927_v26 = vpop.f32.mrb[141].mxu0 }
0x1569   : > { %v3331_v62 = vpop.f32.mrb[142].mxu0 }
0x156a   : > { %v3350_v8 = vpack.c.bf16 %v3331_v62, %v3328_v13  ;;  %v4928_v45 = vpop.f32.mrb[143].mxu0 }
0x156c   : > { %4940 = vmatmul.mubr.msk.bf16.vlgmr.msra.gmra.mrb[148].mxu1 %vm1102_vm4, %v3350_v8 }
0x156d   : > { %4943 = vmatprep.mubr.msk.bf16.mxu1 %vm5329_vm1, %v5328_v1 }
0x156f   : > { %v3336_v16 = vpop.f32.mrb[144].mxu0 }
0x1570   : > { %v4931_v59 = vpop.f32.mrb[145].mxu0 }
0x1571   : > { %v3339_v15 = vpop.f32.mrb[146].mxu0 }
0x1572   : > { %v3351_v0 = vpack.c.bf16 %v3339_v15, %v3336_v16  ;;  %v4932_v14 = vpop.f32.mrb[147].mxu0 }
0x1574   : > { %4944 = vmatmul.mubr.msk.bf16.gmra.mrb[152].mxu1 %vm1102_vm4, %v3351_v0 }
0x1575   : > { %4947 = vmatprep.mubr.msk.bf16.mxu1 %vm5329_vm1, %v5328_v1 }
0x1577   : > { %v3344_v54 = vpop.f32.mrb[148].mxu0 }
0x1578   : > { %v4935_v10 = vpop.f32.mrb[149].mxu0  ;;  %v3352_v23 = vpack.c.bf16 %v3344_v54, %v3344_v54 }
0x1579   : > { %v3347_v22 = vpop.f32.mrb[150].mxu0 }
0x157a   : > { %v4936_v63 = vpop.f32.mrb[151].mxu0 }
0x157c   : > { %4948 = vmatmul.mubr.msk.bf16.gmra.mrb[156].mxu1 %vm1102_vm4, %v3352_v23 }
0x157d   : > { %4969 = vmatprep.mubr.msk.bf16.mxu1 %vm5329_vm1, %v5328_v1 }
0x157f   : > { %v3476_v32 = vpop.f32.mrb[152].mxu0 }
0x1580   : > { %v4955_v7 = vpop.f32.mrb[153].mxu0 }
0x1581   : > { %v3479_v33 = vpop.f32.mrb[154].mxu0 }
0x1582   : > { %v4956_v36 = vpop.f32.mrb[155].mxu0 }
0x1587   : > { %v3484_v29 = vpop.f32.mrb[156].mxu0 }
0x1588   : > { %v4959_v17 = vpop.f32.mrb[157].mxu0 }
0x1589   : > { %v3487_v39 = vpop.f32.mrb[158].mxu0 }
0x158a   : > { %v4960_v9 = vpop.f32.mrb[159].mxu0 }
0x158b   : > { %v5093_v9 = vld [vmem:[%s6579_s13 + $0x10] sm:$0xff]  }
0x158c   : > { %4966 = vmatpush3.bf16.msra.mxu1 %v5093_v9 }
0x158d   : > { %4967 = vmatprep.subr.bf16.mxu1 %v5328_v1 }
0x158f   : > { %v3492_v5 = vpop.f32.mrb[160].mxu0 }
0x1590   : > { %v4963_v57 = vpop.f32.mrb[161].mxu0 }
0x1591   : > { %v3495_v18 = vpop.f32.mrb[162].mxu0 }
0x1592   : > { %v4964_v11 = vpop.f32.mrb[163].mxu0 }
0x163f   : > { %v3405_v20 = vpop.f32.mrb[148].mxu1 }
0x1640   : > { %v3477_v35 = vadd.f32 %v3476_v32, %v3405_v20  ;;  %v4941_v24 = vpop.f32.mrb[149].mxu1 }
0x1641   : > { %v3408_v31 = vpop.f32.mrb[150].mxu1 }
0x1642   : > { %v3498_v42 = vadd.f32 %v3477_v35, %v6001_v48  ;;  %v3480_v21 = vadd.f32 %v3479_v33, %v3408_v31  ;;  %v4942_v40 = vpop.f32.mrb[151].mxu1 }
0x1644   : > { %v6350_v12 = vadd.f32 %v4329_v37, %v3498_v42  ;;  %v3499_v46 = vadd.f32 %v3480_v21, %v6004_v30 }
0x1646   : > { %v6353_v34 = vadd.f32 %v4329_v37, %v3499_v46  ;;  %v3520_v41 = vsel %vm779_vm3, %v6350_v12, 0.0 }
0x1647   : > { %v3413_v49 = vpop.f32.mrb[152].mxu1  ;;  %3521 = vadd.xlane.f32.xlu0 %v3520_v41 }
0x1648   : > { %v3485_v43 = vadd.f32 %v3484_v29, %v3413_v49  ;;  %v4945_v56 = vpop.f32.mrb[153].mxu1  ;;  %v3523_v50 = vsel %vm779_vm3, %v6353_v34, 0.0  ;;  %v4332_v49 = vld [vmem:[%s6577_s11 + $0x1] ss:$0 sm:$0xff] }
0x1649   : > { %v3416_v52 = vpop.f32.mrb[154].mxu1  ;;  %3524 = vadd.xlane.f32.xlu1 %v3523_v50 }
0x164a   : > { %v3500_v48 = vadd.f32 %v3485_v43, %v6011_v47  ;;  %v3488_v19 = vadd.f32 %v3487_v39, %v3416_v52  ;;  %v4946_v25 = vpop.f32.mrb[155].mxu1 }
0x164b   : > { %v4333_v25 = vld [vmem:[%s6578_s12 + $0x1] ss:$0 sm:$0xff] }
0x164c   : > { %v6360_v27 = vadd.f32 %v4329_v37, %v3500_v48  ;;  %v3501_v30 = vadd.f32 %v3488_v19, %v6014_v55 }
0x164e   : > { %v6363_v60 = vadd.f32 %v4329_v37, %v3501_v30  ;;  %v3526_v3 = vsel %vm779_vm3, %v6360_v27, 0.0 }
0x164f   : > { %v3421_v28 = vpop.f32.mrb[156].mxu1  ;;  %3527 = vadd.xlane.f32.xlu0 %v3526_v3 }
0x1650   : > { %v3493_v51 = vadd.f32 %v3492_v5, %v3421_v28  ;;  %v4949_v58 = vpop.f32.mrb[157].mxu1  ;;  %v3529_v4 = vsel %vm779_vm3, %v6363_v60, 0.0  ;;  %v5094_v5 = vld [vmem:[%s6579_s13 + $0x18] sm:$0xff]  }
0x1651   : > { %v3424_v53 = vpop.f32.mrb[158].mxu1  ;;  %3530 = vadd.xlane.f32.xlu1 %v3529_v4  ;;  %4968 = vmatpush3.bf16.msra.mxu1 %v5094_v5 }
0x1652   : > { %v3502_v47 = vadd.f32 %v3493_v51, %v6021_v2  ;;  %v4950_v44 = vpop.f32.mrb[159].mxu1  ;;  %5001 = vmatprep.subr.bf16.mxu1 %v5328_v1 }
0x1654   : > { %v6370_v6 = vadd.f32 %v4329_v37, %v3502_v47 }
0x1656   : > { %v3532_v55 = vsel %vm779_vm3, %v6370_v6, 0.0 }
0x1657   : > { %3533 = vadd.xlane.f32.xlu0 %v3532_v55 }
0x16d4   : > { %v3522_v61 = vpop.xlane.xlu0 %3521 }
0x16d5   : > { %v3535_v38 = vmul.f32 0.03125, %v3522_v61 }
0x16d6   : > { %v3525_v13 = vpop.xlane.xlu1 %3524 }
0x16d7   : > { %v3540_v26 = vsub.f32 %v6350_v12, %v3535_v38  ;;  %v3536_v62 = vmul.f32 0.03125, %v3525_v13 }
0x16d9   : > { %v3541_v8 = vsub.f32 %v6353_v34, %v3536_v62  ;;  %v3545_v45 = vmul.f32 %v3540_v26, %v3540_v26 }
0x16db   : > { %v3550_v16 = vsel %vm779_vm3, %v3545_v45, 0.0  ;;  %v3546_v59 = vmul.f32 %v3541_v8, %v3541_v8 }
0x16dc   : > { %v3528_v2 = vpop.xlane.xlu0 %3527  ;;  %3551 = vadd.xlane.f32.xlu1 %v3550_v16 }
0x16dd   : > { %v3537_v15 = vmul.f32 0.03125, %v3528_v2  ;;  %v3553_v0 = vsel %vm779_vm3, %v3546_v59, 0.0  ;;  %v5095_v2 = vld [vmem:[%s6581_s15 + $0x20] sm:$0xff]  }
0x16de   : > { %v3531_v14 = vpop.xlane.xlu1 %3530  ;;  %3554 = vadd.xlane.f32.xlu0 %v3553_v0  ;;  %4982 = vmatpush3.bf16.msra.mxu0 %v5095_v2  ;;  %v5097_v0 = vld [vmem:[%s6581_s15 + $0x30] sm:$0xff]  }
0x16df   : > { %v3542_v54 = vsub.f32 %v6360_v27, %v3537_v15  ;;  %v3538_v10 = vmul.f32 0.03125, %v3531_v14  ;;  %4983 = vmatprep.subr.bf16.mxu0 %v5328_v1  ;;  %v5096_v15 = vld [vmem:[%s6581_s15 + $0x28] sm:$0xff]   ;;  %v5098_v14 = vld [vmem:[%s6581_s15 + $0x38] sm:$0xff]  }
0x16e1   : > { %v3543_v22 = vsub.f32 %v6363_v60, %v3538_v10  ;;  %v3547_v23 = vmul.f32 %v3542_v54, %v3542_v54  ;;  %v3954_v10 = vld [vmem:[%s6585_s19] sm:$0xff] }
0x16e2   : > { %4984 = vmatpush3.bf16.msra.mxu0 %v5096_v15 }
0x16e3   : > { %v3556_v63 = vsel %vm779_vm3, %v3547_v23, 0.0  ;;  %v3548_v32 = vmul.f32 %v3543_v22, %v3543_v22  ;;  %4985 = vmatprep.subr.bf16.mxu0 %v5328_v1  ;;  %v3956_v23 = vld [vmem:[%s6585_s19 + $0x10] sm:$0xff] }
0x16e4   : > { %3557 = vadd.xlane.f32.xlu1 %v3556_v63  ;;  %v3534_v7 = vpop.xlane.xlu0 %3533  ;;  %v3957_v63 = vld [vmem:[%s6585_s19 + $0x18] sm:$0xff] }
0x16e5   : > { %v3539_v33 = vmul.f32 0.03125, %v3534_v7  ;;  %v3559_v36 = vsel %vm779_vm3, %v3548_v32, 0.0  ;;  %v3958_v32 = vld [vmem:[%s6585_s19 + $0x20] sm:$0xff] }
0x16e6   : > { %3560 = vadd.xlane.f32.xlu0 %v3559_v36  ;;  %4986 = vmatpush3.bf16.msra.mxu0 %v5097_v0  ;;  %v4339_v7 = vld [vmem:[%s6580_s14 + $0x1] ss:$0 sm:$0xff] }
0x16e7   : > { %v3544_v29 = vsub.f32 %v6370_v6, %v3539_v33  ;;  %4987 = vmatprep.subr.bf16.mxu0 %v5328_v1 }
0x16e9   : > { %v3549_v17 = vmul.f32 %v3544_v29, %v3544_v29 }
0x16ea   : > { %4988 = vmatpush3.bf16.msra.mxu0 %v5098_v14 }
0x16eb   : > { %v3562_v39 = vsel %vm779_vm3, %v3549_v17, 0.0 }
0x16ec   : > { %3563 = vadd.xlane.f32.xlu1 %v3562_v39 }
0x1769   : > { %v3552_v57 = vpop.xlane.xlu1 %3551 }
0x176a   : > { %v3565_v18 = vmul.f32 0.03125, %v3552_v57 }
0x176b   : > { %v3555_v11 = vpop.xlane.xlu0 %3554 }
0x176c   : > { %v3570_v20 = vadd.f32 1e-05, %v3565_v18  ;;  %v3566_v35 = vmul.f32 0.03125, %v3555_v11 }
0x176e   : > { %5231 = vrsqrt.f32 %v3570_v20  ;;  %v3571_v24 = vadd.f32 1e-05, %v3566_v35 }
0x1770   : > { %5233 = vrsqrt.f32 %v3571_v24 }
0x1771   : > { %v3558_v37 = vpop.xlane.xlu1 %3557 }
0x1772   : > { %v3567_v31 = vmul.f32 0.03125, %v3558_v37 }
0x1773   : > { %v3561_v42 = vpop.xlane.xlu0 %3560 }
0x1774   : > { %v3572_v21 = vadd.f32 1e-05, %v3567_v31  ;;  %v3568_v40 = vmul.f32 0.03125, %v3561_v42 }
0x1776   : > { %5235 = vrsqrt.f32 %v3572_v21  ;;  %v3573_v46 = vadd.f32 1e-05, %v3568_v40 }
0x1778   : > { %v5232_v41 = vpop.eup %5231  ;;  %5237 = vrsqrt.f32 %v3573_v46 }
0x1779   : > { %v3580_v43 = vmul.f32 %v5232_v41, %v3540_v26  ;;  %v3564_v56 = vpop.xlane.xlu1 %3563 }
0x177a   : > { %v5234_v50 = vpop.eup %5233  ;;  %v3569_v52 = vmul.f32 0.03125, %v3564_v56 }
0x177b   : > { %v3591_v48 = vmul.f32 %v4332_v49, %v3580_v43  ;;  %v3581_v19 = vmul.f32 %v5234_v50, %v3541_v8 }
0x177c   : > { %v3574_v30 = vadd.f32 1e-05, %v3569_v52 }
0x177d   : > { %v3592_v3 = vmul.f32 %v4332_v49, %v3581_v19  ;;  %v3602_v28 = vadd.f32 %v4333_v25, %v3591_v48 }
0x177e   : > { %5239 = vrsqrt.f32 %v3574_v30 }
0x177f   : > { %v3603_v51 = vadd.f32 %v4333_v25, %v3592_v3 }
0x1780   : > { %v5236_v58 = vpop.eup %5235 }
0x1781   : > { %v3582_v4 = vmul.f32 %v5236_v58, %v3542_v54  ;;  %v3607_v53 = vpack.c.bf16 %v3603_v51, %v3602_v28  ;;  %v3955_v54 = vld [vmem:[%s6585_s19 + $0x8] sm:$0xff] }
0x1782   : > { %v5238_v47 = vpop.eup %5237 }
0x1783   : > { %v3583_v44 = vmul.f32 %v5238_v47, %v3543_v22  ;;  %4970 = vmatmul.mubr.msk.bf16.vlgmr.msra.gmra.mrb[160].mxu1 %vm779_vm3, %v3607_v53  ;;  %v3593_v55 = vmul.f32 %v4332_v49, %v3582_v4  ;;  %v5330_v22 = vmov 0  }
0x1784   : > { %4973 = vmatprep.mubr.msk.bf16.mxu1 %vm5329_vm1, %v5328_v1  ;;  %5055 = vset.pattern.permute.xlu1 %v5330_v22 }
0x1785   : > { %v3594_v61 = vmul.f32 %v4332_v49, %v3583_v44  ;;  %v3604_v38 = vadd.f32 %v4333_v25, %v3593_v55  ;;  %5054 = vset.pattern.permute.xlu0 %v5330_v22  ;;  %3966 = vperm.xlu1 %5055, %v3955_v54  }
0x1786   : > { %3961 = vperm.xlu0 %5054, %v3954_v10  }
0x1787   : > { %v3605_v13 = vadd.f32 %v4333_v25, %v3594_v61 }
0x1788   : > { %v5240_v26 = vpop.eup %5239 }
0x1789   : > { %v3608_v62 = vpack.c.bf16 %v3605_v13, %v3604_v38  ;;  %v3584_v8 = vmul.f32 %v5240_v26, %v3544_v29  ;;  %3971 = vperm.xlu1 %5055, %v3956_v23  }
0x178b   : > { %4974 = vmatmul.mubr.msk.bf16.gmra.mrb[164].mxu1 %vm779_vm3, %v3608_v62  ;;  %v3595_v45 = vmul.f32 %v4332_v49, %v3584_v8 }
0x178c   : > { %4977 = vmatprep.mubr.msk.bf16.mxu1 %vm5329_vm1, %v5328_v1 }
0x178d   : > { %v3606_v16 = vadd.f32 %v4333_v25, %v3595_v45  ;;  %3976 = vperm.xlu1 %5055, %v3957_v63  }
0x178f   : > { %v3609_v59 = vpack.c.bf16 %v3606_v16, %v3606_v16 }
0x1791   : > { %3981 = vperm.xlu1 %5055, %v3958_v32  }
0x1793   : > { %4978 = vmatmul.mubr.msk.bf16.gmra.mrb[168].mxu1 %vm779_vm3, %v3609_v59 }
0x1794   : > { %5005 = vmatprep.mubr.msk.bf16.mxu1 %vm5329_vm1, %v5328_v1 }
0x1856   : > { %v3678_v33 = vpop.f32.mrb[160].mxu1 }
0x1857   : > { %v6440_v36 = vadd.f32 %v4339_v7, %v3678_v33  ;;  %v4971_v29 = vpop.f32.mrb[161].mxu1 }
0x1858   : > { %v3681_v17 = vpop.f32.mrb[162].mxu1 }
0x1859   : > { %v6443_v39 = vmul.f32 0.70710677, %v6440_v36  ;;  %v6445_v9 = vadd.f32 %v4339_v7, %v3681_v17  ;;  %v4972_v5 = vpop.f32.mrb[163].mxu1 }
0x185b   : > { %v3710_v57 = vand.u32 2147483647, %v6443_v39  ;;  %v6449_v18 = vmul.f32 0.70710677, %v6445_v9  ;;  %vm3810_vm13 = vcmp.ge.f32.partialorder %v6443_v39, 0.0  ;;  %v3701_v39 = vmul.f32 0.5, %v6445_v9 }
0x185d   : > { %v3715_v11 = vmul.f32 0.3275911, %v3710_v57  ;;  %v3711_v20 = vand.u32 2147483647, %v6449_v18  ;;  %v3780_v48 = vsub.f32 0.0, %v3710_v57  ;;  %vm3811_vm14 = vcmp.ge.f32.partialorder %v6449_v18, 0.0 }
0x185e   : > { %v3686_v35 = vpop.f32.mrb[164].mxu1 }
0x185f   : > { %v3720_v24 = vadd.f32 1.0, %v3715_v11  ;;  %v3716_v37 = vmul.f32 0.3275911, %v3711_v20  ;;  %v4975_v31 = vpop.f32.mrb[165].mxu1  ;;  %v6452_v42 = vadd.f32 %v4339_v7, %v3686_v35  ;;  %v3781_v4 = vsub.f32 0.0, %v3711_v20 }
0x1860   : > { %v3689_v21 = vpop.f32.mrb[166].mxu1  ;;  %v3785_v44 = vmul.f32 %v3780_v48, %v3710_v57 }
0x1861   : > { %5241 = vrcp.f32 %v3720_v24  ;;  %v3721_v40 = vadd.f32 1.0, %v3716_v37  ;;  %v4976_v46 = vpop.f32.mrb[167].mxu1  ;;  %v6455_v41 = vmul.f32 0.70710677, %v6452_v42  ;;  %v6457_v49 = vadd.f32 %v4339_v7, %v3689_v21 }
0x1862   : > { %v3786_v8 = vmul.f32 %v3781_v4, %v3711_v20  ;;  %v3790_v45 = vmul.f32 1.442695, %v3785_v44 }
0x1863   : > { %5243 = vrcp.f32 %v3721_v40  ;;  %v3712_v43 = vand.u32 2147483647, %v6455_v41  ;;  %v6461_v56 = vmul.f32 0.70710677, %v6457_v49  ;;  %vm3812_vm15 = vcmp.ge.f32.partialorder %v6455_v41, 0.0 }
0x1864   : > { %v3792_v54 = vmul.f32 1.442695, %v3786_v8  ;;  %v3703_v41 = vmul.f32 0.5, %v6457_v49 }
0x1865   : > { %v3717_v50 = vmul.f32 0.3275911, %v3712_v43  ;;  %v3713_v19 = vand.u32 2147483647, %v6461_v56  ;;  %v3782_v15 = vsub.f32 0.0, %v3712_v43  ;;  %vm3813_vm0 = vcmp.ge.f32.partialorder %v6461_v56, 0.0 }
0x1866   : > { %v3694_v52 = vpop.f32.mrb[168].mxu1 }
0x1867   : > { %v6464_v25 = vadd.f32 %v4339_v7, %v3694_v52  ;;  %v4979_v30 = vpop.f32.mrb[169].mxu1  ;;  %v3722_v3 = vadd.f32 1.0, %v3717_v50  ;;  %v3718_v51 = vmul.f32 0.3275911, %v3713_v19  ;;  %v3783_v22 = vsub.f32 0.0, %v3713_v19 }
0x1868   : > { %v3697_v28 = vpop.f32.mrb[170].mxu1  ;;  %v3787_v32 = vmul.f32 %v3782_v15, %v3712_v43 }
0x1869   : > { %v6467_v58 = vmul.f32 0.70710677, %v6464_v25  ;;  %5245 = vrcp.f32 %v3722_v3  ;;  %v4980_v53 = vpop.f32.mrb[171].mxu1  ;;  %v3723_v55 = vadd.f32 1.0, %v3718_v51  ;;  %v3788_v11 = vmul.f32 %v3783_v22, %v3713_v19 }
0x186a   : > { %v3794_v24 = vmul.f32 1.442695, %v3787_v32  ;;  %v3704_v56 = vmul.f32 0.5, %v6464_v25  ;;  %v3967_v25 = vpop.permute.xlu1 %3966 }
0x186b   : > { %v5242_v47 = vpop.eup %5241  ;;  %v3714_v61 = vand.u32 2147483647, %v6467_v58  ;;  %5247 = vrcp.f32 %v3723_v55  ;;  %v3796_v43 = vmul.f32 1.442695, %v3788_v11  ;;  %v3700_v11 = vmul.f32 0.5, %v6440_v36 }
0x186c   : > { %v3735_v38 = vmul.f32 1.0614054, %v5242_v47  ;;  %vm3814_vm2 = vcmp.ge.f32.partialorder %v6467_v58, 0.0 }
0x186d   : > { %v3719_v13 = vmul.f32 0.3275911, %v3714_v61  ;;  %v5244_v26 = vpop.eup %5243  ;;  %v3784_v20 = vsub.f32 0.0, %v3714_v61 }
0x186e   : > { %v3740_v62 = vadd.f32 -1.4531521, %v3735_v38  ;;  %v3736_v16 = vmul.f32 1.0614054, %v5244_v26 }
0x186f   : > { %v3724_v59 = vadd.f32 1.0, %v3719_v13  ;;  %v3789_v30 = vmul.f32 %v3784_v20, %v3714_v61 }
0x1870   : > { %v3745_v2 = vmul.f32 %v5242_v47, %v3740_v62  ;;  %v3741_v0 = vadd.f32 -1.4531521, %v3736_v16 }
0x1871   : > { %5249 = vrcp.f32 %v3724_v59  ;;  %v3798_v8 = vmul.f32 1.442695, %v3789_v30 }
0x1872   : > { %v3750_v14 = vadd.f32 1.4214138, %v3745_v2  ;;  %5251 = vpow2.f32 %v3790_v45  ;;  %v3746_v10 = vmul.f32 %v5244_v26, %v3741_v0 }
0x1873   : > { %v5246_v23 = vpop.eup %5245  ;;  %5253 = vpow2.f32 %v3792_v54 }
0x1874   : > { %v3755_v63 = vmul.f32 %v5242_v47, %v3750_v14  ;;  %v3751_v7 = vadd.f32 1.4214138, %v3746_v10  ;;  %v3737_v33 = vmul.f32 1.0614054, %v5246_v23  ;;  %5255 = vpow2.f32 %v3794_v24 }
0x1875   : > { %v5248_v17 = vpop.eup %5247  ;;  %5257 = vpow2.f32 %v3796_v43 }
0x1876   : > { %v3760_v29 = vadd.f32 -0.28449672, %v3755_v63  ;;  %v3756_v5 = vmul.f32 %v5244_v26, %v3751_v7  ;;  %v3742_v57 = vadd.f32 -1.4531521, %v3737_v33  ;;  %v3738_v37 = vmul.f32 1.0614054, %v5248_v17 }
0x1877   : > { %5259 = vpow2.f32 %v3798_v8 }
0x1878   : > { %v3765_v35 = vmul.f32 %v5242_v47, %v3760_v29  ;;  %v3761_v31 = vadd.f32 -0.28449672, %v3756_v5  ;;  %v3747_v21 = vmul.f32 %v5246_v23, %v3742_v57  ;;  %v3743_v46 = vadd.f32 -1.4531521, %v3738_v37 }
0x187a   : > { %v3770_v40 = vadd.f32 0.2548296, %v3765_v35  ;;  %v3766_v52 = vmul.f32 %v5244_v26, %v3761_v31  ;;  %v3752_v48 = vadd.f32 1.4214138, %v3747_v21  ;;  %v3748_v28 = vmul.f32 %v5248_v17, %v3743_v46 }
0x187b   : > { %v5250_v50 = vpop.eup %5249 }
0x187c   : > { %v3775_v3 = vmul.f32 %v5242_v47, %v3770_v40  ;;  %v3739_v51 = vmul.f32 1.0614054, %v5250_v50  ;;  %v5252_v4 = vpop.eup %5251  ;;  %v3771_v53 = vadd.f32 0.2548296, %v3766_v52  ;;  %v3757_v19 = vmul.f32 %v5246_v23, %v3752_v48 }
0x187d   : > { %v3753_v55 = vadd.f32 1.4214138, %v3748_v28  ;;  %v5254_v45 = vpop.eup %5253 }
0x187e   : > { %v3800_v44 = vmul.f32 %v5252_v4, %v3775_v3  ;;  %v3744_v38 = vadd.f32 -1.4531521, %v3739_v51  ;;  %v3776_v13 = vmul.f32 %v5244_v26, %v3771_v53  ;;  %v3762_v62 = vadd.f32 -0.28449672, %v3757_v19  ;;  %v5256_v33 = vpop.eup %5255 }
0x187f   : > { %v3758_v59 = vmul.f32 %v5248_v17, %v3753_v55  ;;  %v5258_v21 = vpop.eup %5257  ;;  %v3702_v19 = vmul.f32 0.5, %v6452_v42 }
0x1880   : > { %v3805_v16 = vsub.f32 1.0, %v3800_v44  ;;  %v3749_v2 = vmul.f32 %v5250_v50, %v3744_v38  ;;  %v3801_v15 = vmul.f32 %v5254_v45, %v3776_v13  ;;  %v3767_v61 = vmul.f32 %v5246_v23, %v3762_v62 }
0x1881   : > { %v3763_v0 = vadd.f32 -0.28449672, %v3758_v59  ;;  %v5260_v36 = vpop.eup %5259 }
0x1882   : > { %v3815_v47 = vsub.f32 0.0, %v3805_v16  ;;  %v3754_v14 = vadd.f32 1.4214138, %v3749_v2  ;;  %v3806_v54 = vsub.f32 1.0, %v3801_v15  ;;  %v3772_v10 = vadd.f32 0.2548296, %v3767_v61  ;;  %v3962_v15 = vpop.permute.xlu0 %3961 }
0x1883   : > { %v3768_v63 = vmul.f32 %v5248_v17, %v3763_v0 }
0x1884   : > { %v3820_v22 = vsel %vm3810_vm13, %v3805_v16, %v3815_v47  ;;  %v3759_v26 = vmul.f32 %v5250_v50, %v3754_v14  ;;  %v3816_v32 = vsub.f32 0.0, %v3806_v54  ;;  %v3777_v7 = vmul.f32 %v5246_v23, %v3772_v10  ;;  %v4361_v16 = vld [vmem:[%s6582_s16 + $0x1] ss:$0 sm:$0xff] }
0x1885   : > { %v3825_v29 = vadd.f32 1.0, %v3820_v22  ;;  %v3773_v5 = vadd.f32 0.2548296, %v3768_v63  ;;  %v3972_v22 = vpop.permute.xlu1 %3971 }
0x1886   : > { %v3764_v57 = vadd.f32 -0.28449672, %v3759_v26  ;;  %v3821_v20 = vsel %vm3811_vm14, %v3806_v54, %v3816_v32  ;;  %v3802_v35 = vmul.f32 %v5256_v33, %v3777_v7 }
0x1887   : > { %v3826_v24 = vadd.f32 1.0, %v3821_v20  ;;  %v3778_v37 = vmul.f32 %v5248_v17, %v3773_v5  ;;  %v3830_v46 = vmul.f32 %v3825_v29, %v3700_v11 }
0x1888   : > { %v3769_v31 = vmul.f32 %v5250_v50, %v3764_v57  ;;  %v3807_v40 = vsub.f32 1.0, %v3802_v35 }
0x1889   : > { %v3831_v52 = vmul.f32 %v3826_v24, %v3701_v39  ;;  %v3803_v23 = vmul.f32 %v5258_v21, %v3778_v37  ;;  %v3977_v35 = vpop.permute.xlu1 %3976 }
0x188a   : > { %v3774_v48 = vadd.f32 0.2548296, %v3769_v31  ;;  %v3817_v43 = vsub.f32 0.0, %v3807_v40 }
0x188b   : > { %v3835_v30 = vpack.c.bf16 %v3831_v52, %v3830_v46  ;;  %v3808_v18 = vsub.f32 1.0, %v3803_v23 }
0x188c   : > { %v3779_v3 = vmul.f32 %v5250_v50, %v3774_v48  ;;  %v3822_v28 = vsel %vm3812_vm15, %v3807_v40, %v3817_v43 }
0x188d   : > { %v3818_v51 = vsub.f32 0.0, %v3808_v18  ;;  %4990 = vmatmul.mubr.msk.bf16.vlgmr.msra.gmra.mrb[164].mxu0 %vm2282_vm9, %v3835_v30  ;;  %v3827_v9 = vadd.f32 1.0, %v3822_v28  ;;  %v3982_v43 = vpop.permute.xlu1 %3981 }
0x188e   : > { %v3804_v4 = vmul.f32 %v5260_v36, %v3779_v3  ;;  %4993 = vmatprep.mubr.msk.bf16.mxu0 %vm5329_vm1, %v5328_v1 }
0x188f   : > { %v3823_v17 = vsel %vm3813_vm0, %v3808_v18, %v3818_v51  ;;  %v3832_v55 = vmul.f32 %v3827_v9, %v3702_v19 }
0x1890   : > { %v3809_v53 = vsub.f32 1.0, %v3804_v4  ;;  %v3828_v44 = vadd.f32 1.0, %v3823_v17 }
0x1892   : > { %v3819_v50 = vsub.f32 0.0, %v3809_v53  ;;  %v3833_v38 = vmul.f32 %v3828_v44, %v3703_v41 }
0x1894   : > { %v3824_v13 = vsel %vm3814_vm2, %v3809_v53, %v3819_v50  ;;  %v3836_v62 = vpack.c.bf16 %v3833_v38, %v3832_v55  ;;  %v5099_v50 = vld [vmem:[%s6586_s20] sm:$0xff]   ;;  %v5100_v55 = vld [vmem:[%s6586_s20 + $0x8] sm:$0xff]  }
0x1895   : > { %v3829_v8 = vadd.f32 1.0, %v3824_v13  ;;  %5002 = vmatpush3.bf16.msra.mxu1 %v5099_v50 }
0x1896   : > { %4994 = vmatmul.mubr.msk.bf16.gmra.mrb[168].mxu0 %vm2282_vm9, %v3836_v62  ;;  %5003 = vmatprep.subr.bf16.mxu1 %v5328_v1 }
0x1897   : > { %4997 = vmatprep.mubr.msk.bf16.mxu0 %vm5329_vm1, %v5328_v1  ;;  %v3834_v45 = vmul.f32 %v3829_v8, %v3704_v56  ;;  %v4004_v56 = vld [vmem:[%s6583_s17] sm:$0x1] }
0x1898   : > { %v4005_v1 = vld [vmem:[%s6584_s18] sm:$0x1] }
0x1899   : > { %v3837_v42 = vpack.c.bf16 %v3834_v45, %v3834_v45  ;;  %5004 = vmatpush3.bf16.msra.mxu1 %v5100_v55 }
0x189e   : > { %4998 = vmatmul.mubr.msk.bf16.gmra.mrb[172].mxu0 %vm2282_vm9, %v3837_v42 }
0x1960   : > { %v3914_v49 = vpop.f32.mrb[164].mxu0 }
0x1961   : > { %v3936_v58 = vadd.f32 %v3914_v49, %v6350_v12  ;;  %v4991_v59 = vpop.f32.mrb[165].mxu0 }
0x1962   : > { %v3917_v2 = vpop.f32.mrb[166].mxu0 }
0x1963   : > { %v3937_v61 = vadd.f32 %v3917_v2, %v6353_v34  ;;  %v4992_v47 = vpop.f32.mrb[167].mxu0  ;;  %v3949_v0 = vadd.f32 %v4361_v16, %v3936_v58  ;;  %v4026_v58 = vld [vmem:[%s6587_s21] sm:$0x1] }
0x1965   : > { %v3950_v14 = vadd.f32 %v4361_v16, %v3937_v61  ;;  %v3984_v54 = vmul.f32 %v3962_v15, %v3949_v0 }
0x1967   : > { %v3985_v10 = vmul.f32 %v3967_v25, %v3950_v14  ;;  %v3989_v63 = vsel %vm779_vm3, %v3984_v54, 0.0 }
0x1969   : > { %v3990_v26 = vsel %vm779_vm3, %v3985_v10, 0.0  ;;  %v3922_v32 = vpop.f32.mrb[168].mxu0 }
0x196a   : > { %v3991_v7 = vadd.f32 %v3990_v26, %v3989_v63  ;;  %v3938_v12 = vadd.f32 %v3922_v32, %v6360_v27  ;;  %v4995_v33 = vpop.f32.mrb[169].mxu0 }
0x196b   : > { %v3925_v29 = vpop.f32.mrb[170].mxu0 }
0x196c   : > { %v3951_v5 = vadd.f32 %v4361_v16, %v3938_v12  ;;  %v3939_v57 = vadd.f32 %v3925_v29, %v6363_v60  ;;  %v4996_v34 = vpop.f32.mrb[171].mxu0 }
0x196e   : > { %v3986_v11 = vmul.f32 %v3972_v22, %v3951_v5  ;;  %v3952_v20 = vadd.f32 %v4361_v16, %v3939_v57 }
0x1970   : > { %v3992_v39 = vsel %vm779_vm3, %v3986_v11, 0.0  ;;  %v3987_v24 = vmul.f32 %v3977_v35, %v3952_v20 }
0x1971   : > { %v3993_v37 = vadd.f32 %v3992_v39, %v3991_v7  ;;  %v3930_v31 = vpop.f32.mrb[172].mxu0 }
0x1972   : > { %v3994_v21 = vsel %vm779_vm3, %v3987_v24, 0.0  ;;  %v3940_v40 = vadd.f32 %v3930_v31, %v6370_v6  ;;  %v4999_v46 = vpop.f32.mrb[173].mxu0 }
0x1973   : > { %v3995_v27 = vadd.f32 %v3994_v21, %v3993_v37  ;;  %v3933_v52 = vpop.f32.mrb[174].mxu0 }
0x1974   : > { %v3953_v23 = vadd.f32 %v4361_v16, %v3940_v40  ;;  %v5000_v48 = vpop.f32.mrb[175].mxu0 }
0x1976   : > { %v3988_v60 = vmul.f32 %v3982_v43, %v3953_v23 }
0x1978   : > { %v3996_v30 = vsel %vm779_vm3, %v3988_v60, 0.0 }
0x1979   : > { %v3997_v18 = vadd.f32 %v3996_v30, %v3995_v27 }
0x197b   : > { %v3998_v3 = vrot.slane %v3997_v18, 4 }
0x197d   : > { %v3999_v36 = vadd.f32 %v3998_v3, %v3997_v18 }
0x197f   : > { %v4000_v28 = vrot.slane %v3999_v36, 2 }
0x1981   : > { %v4001_v51 = vadd.f32 %v4000_v28, %v3999_v36 }
0x1983   : > { %v4002_v4 = vrot.slane %v4001_v51, 1 }
0x1985   : > { %v4003_v9 = vadd.f32 %v4002_v4, %v4001_v51 }
0x1987   : > { %v4006_v17 = vsel %vm779_vm3, %v4003_v9, 0.0 }
0x1988   : > { %4007 = vadd.xlane.f32.xlu1 %v4006_v17 }
0x1a15   : > { %v4008_v6 = vpop.xlane.xlu1 %4007 }
0x1a16   : > { %v4009_v53 = vmul.f32 0.03125, %v4008_v6 }
0x1a18   : > { %v4010_v19 = vsub.f32 %v4003_v9, %v4009_v53 }
0x1a1a   : > { %v4011_v41 = vmul.f32 %v4010_v19, %v4010_v19 }
0x1a1c   : > { %v4012_v44 = vsel %vm779_vm3, %v4011_v41, 0.0 }
0x1a1d   : > { %4013 = vadd.xlane.f32.xlu0 %v4012_v44 }
0x1aaa   : > { %v4014_v38 = vpop.xlane.xlu0 %4013 }
0x1aab   : > { %v4015_v13 = vmul.f32 0.03125, %v4014_v38 }
0x1aad   : > { %v4016_v62 = vadd.f32 1e-05, %v4015_v13 }
0x1aaf   : > { %5261 = vrsqrt.f32 %v4016_v62 }
0x1ab9   : > { %v5262_v8 = vpop.eup %5261 }
0x1aba   : > { %v4018_v45 = vmul.f32 %v5262_v8, %v4010_v19 }
0x1abc   : > { %v4019_v42 = vmul.f32 %v4018_v45, %v4004_v56 }
0x1abe   : > { %v4020_v49 = vadd.f32 %v4019_v42, %v4005_v1 }
0x1ac0   : > { %v4021_v16 = vpack.c.bf16 %v4020_v49, %v4020_v49 }
0x1ac2   : > { %5006 = vmatmul.mubr.msk.bf16.vlgmr.msra.gmra.mrb[172].mxu1 %vm779_vm3, %v4021_v16 }
0x1b95   : > { %v4076_v59 = vpop.f32.mrb[172].mxu1 }
0x1b96   : > { %v4077_v2 = vadd.f32 %v4076_v59, %v4026_v58  ;;  %v5007_v15 = vpop.f32.mrb[173].mxu1 }
0x1b97   : > { %v4079_v25 = vpop.f32.mrb[174].mxu1 }
0x1b98   : > { %4082 = vst [vmem:[%s675_s2] sm:$0x1] %v4077_v2  ;;  %v5008_v61 = vpop.f32.mrb[175].mxu1 }
0x1b99   : > { %5277 = shalt.err (!%p5274_p3)
}
0x1b9a   : > { %s5278_s2 = scalar_lea.hbm %s6524_s1, 16  ;;  %s5282_s30 = scalar_lea.hbm %s6588_s22, 32 }
0x1b9b   : > { %p5279_p4 = scmp.ne.s32.totalorder %s6524_s1, %s5278_s2  ;;  %p5283_p9 = scmp.lt.u32.totalorder %s6524_s1, %s6588_s22 }
0x1b9c   : > { %p5284_p10 = scmp.lt.u32.totalorder %s5282_s30, %s5278_s2  ;;  %p5286_p12 = scmp.lt.u32.totalorder %s5278_s2, %s6524_s1 }
0x1b9d   : > { %p5280_p7 = pnand %p5279_p4, %p5485_p5 }
0x1b9e   : > { %p5285_p11 = por %p5284_p10, %p5283_p9 }
0x1b9f   : > { %p5281_p8 = pneg %p5280_p7 }
0x1ba0   : > { %p5287_p13 = por %p5286_p12, %p5285_p11 }
0x1ba2   : > { %p5288_p0 = pnand %p5287_p13, %p5281_p8 }
0x1ba4   : > { %5291 = shalt.err (!%p5288_p0)
}
0x1ba5   : > { %5012 = dma.vmem_to_hbm [thread:$0]  (%p5485_p5), %s6526_s3, 16, %s6524_s1, %s4084_s29  }
0x1ba6 PF: > { %s6627_s4 = sld [smem:[#allocation7_spill]]  ;;  %s6628_s25 = sld [smem:[#allocation5_spill]] }
0x1bac   : > { %p5018_p1 = scmp.ge.s32.totalorder %s6627_s4, 2  ;;  %s4108_s23 = sand.u32 1, %s6628_s25  }
0x1bad   : > { %s4109_s0 = scalar_lea.sflag [#allocation3], %s4108_s23 }
0x1bae   : > { %p5015_p2 = pnand %p5018_p1, %p5489_p6 }
0x1bb0   : > { %5309 = dma.done.wait (!%p5015_p2), %s4109_s0, 16  }
0x1bb1   : > { %5311 = vsyncadd (!%p5015_p2), %s4109_s0, 4294967280  ;;  %s6630_s30 = sld [smem:[#allocation8_spill]]  ;;  %s6631_s2 = sld [smem:[#allocation6_spill]] }
0x1bb2   : > { %s6632_s29 = sld [smem:[#allocation9_spill]]  ;;  %s6633_s3 = smov %s5318_s28 }
0x1bb7   : > { %p32_p3 = scmp.ge.s32.totalorder %s6630_s30, 4   ;;  %s6634_s28 = smov %s6631_s2 }
0x1bb9   :  { %34 = sbr.rel (!%p32_p3) target bundleno = 12 (0xc), region = 164 }
0x1bc0   :  { %4113 = vsyncpa [#allocation3], 1 }
0x1bc1   :  { %4115 = vsyncpa [#allocation3 + $0x1], 1 }

</bundles_post_ra>
